<compile_context>
chip_gen: v5e
topology: v5e:2x2
jax: 0.10.0
libtpu: 0.0.40
codegen_flags: <defaults>
</compile_context>

<pallas_src>
import functools

import jax
import jax.numpy as jnp
from jax import lax
from jax.experimental import pallas as pl
from jax.experimental.pallas import tpu as pltpu


# ----------------------------------------------------------------------------
# Fused kernel
# ----------------------------------------------------------------------------
def _leaky(v, slope):
    return jnp.where(v >= 0, v, slope * v)


def critic_kernel(x_ref, *refs, bt, L, K, cin, C, slope):
    """One batch tile of `bt` samples; the whole network stays in VMEM.

    Activation rows are time-major (row = t*bt + b) so slices / reshapes are
    whole-sublane-tile operations (bt % 8 == 0).

      x_ref  : (L + 2*pad, bt, cin)  zero-padded ('same') raw input
      refs   : w1 (K*cin, C), b1 (1, C),
               [wi (K*C, C), bi (1, C)]   for conv layers 2..n_conv,
               wf1 (ds*C, H), bf1 (1, H), wf2 (1, H), bf2 (1, 1),
               o_ref (bt, 1),
               pa_ref (L//2 + 2*pad, bt, C)  scratch: padded activations
               fc_ref (bt, ds*C)             scratch: FC1 input flatten
    """
    pad = (K - 1) // 2

    pa_ref, fc_ref = refs[-2], refs[-1]
    o_ref = refs[-3]
    wrefs = refs[:-3]
    n_conv = (len(wrefs) - 4) // 2
    wf1_ref, bf1_ref, wf2_ref, bf2_ref = wrefs[2 * n_conv:2 * n_conv + 4]

    def pool(y, rows):
        # y: (rows, C) with rows ordered t*bt + b -> MaxPool1d(2) over t.
        y3 = y.reshape(rows // (2 * bt), 2 * bt, C)
        return jnp.maximum(y3[:, :bt, :], y3[:, bt:, :])     # (rows/(2bt), bt, C)

    # ---- layer 1: Cin=cin conv via per-tap accumulation (no host im2col) ---
    w1 = wrefs[0][...]                                       # (K*cin, C)
    b1 = wrefs[1][...]                                       # (1, C)
    y = jnp.zeros((L * bt, C), jnp.float32)
    for k in range(K):
        xk = x_ref[k:k + L, :, :].reshape(L * bt, cin)
        if cin == 1:
            y = y + xk * w1[k:k + 1, :]                      # VPU broadcast-mul
        else:
            y = y + jnp.dot(xk, w1[k * cin:(k + 1) * cin, :],
                            preferred_element_type=jnp.float32)
    pooled = pool(_leaky(y + b1, slope), L * bt)             # (L//2, bt, C)
    valid = L // 2
    Lbuf = valid + 2 * pad

    # Zero the 'same' pads once; everything in [pad+valid, Lbuf) stays zero.
    pa_ref[0:pad, :, :] = jnp.zeros((pad, bt, C), jnp.float32)
    pa_ref[pad + valid:Lbuf, :, :] = jnp.zeros((Lbuf - pad - valid, bt, C),
                                               jnp.float32)
    pa_ref[pad:pad + valid, :, :] = pooled

    # ---- layers 2..n_conv: per-tap accumulated dots over valid rows only ---
    for i in range(1, n_conv):
        w_ref, b_ref = wrefs[2 * i], wrefs[2 * i + 1]
        rows = valid * bt
        acc = jnp.zeros((rows, C), jnp.float32)
        for k in range(K):
            a_k = pa_ref[k:k + valid, :, :].reshape(rows, C)
            acc = acc + jnp.dot(a_k, w_ref[k * C:(k + 1) * C, :],
                                preferred_element_type=jnp.float32)
        pooled = pool(_leaky(acc + b_ref[...], slope), rows)  # (valid//2, bt, C)
        new_valid = valid // 2
        if i < n_conv - 1:
            # Zero only the stale strip the next layer's edge taps can read.
            pa_ref[pad + new_valid:pad + valid, :, :] = jnp.zeros(
                (valid - new_valid, bt, C), jnp.float32)
            pa_ref[pad:pad + new_valid, :, :] = pooled
        valid = new_valid

    # ---- FC head: one fused FC1 matmul; FC2 on the VPU ---------------------
    for t in range(valid):                                   # valid == ds_size
        fc_ref[:, t * C:(t + 1) * C] = pooled[t]             # time-major flatten
    feat = jnp.dot(fc_ref[...], wf1_ref[...],
                   preferred_element_type=jnp.float32) + bf1_ref[...]
    feat = _leaky(feat, 0.01)                                # nn.LeakyReLU() default
    val = jnp.sum(feat * wf2_ref[...], axis=-1, keepdims=True) + bf2_ref[...]
    o_ref[...] = val.astype(o_ref.dtype)


# ----------------------------------------------------------------------------
# Wrapper (single pallas_call, gridded over batch tiles)
# ----------------------------------------------------------------------------
def _round_up(n, m):
    return ((n + m - 1) // m) * m


def critic_forward(x, kparams, *, relu_slope=0.2, batch_tile=128):
    """x: (B, nb_features, seq_len) or (B, seq_len) -> validity (B, 1)."""
    if x.ndim == 2:                                  # mirror torch x.view(B, 1, -1)
        x = x.reshape(x.shape[0], 1, -1)
    x = x.astype(jnp.float32)
    B, cin, L = x.shape

    conv = kparams["conv"]
    w1 = conv[0][0]
    C = w1.shape[1]
    K = w1.shape[0] // cin
    pad = (K - 1) // 2
    n_conv = len(conv)
    wf1, bf1 = kparams["wf1"], kparams["bf1"]
    wf2, bf2 = kparams["wf2"], kparams["bf2"]
    ds_size = wf1.shape[0] // C
    assert L % (2 ** n_conv) == 0 and L // (2 ** n_conv) == ds_size, (
        "kernel assumes seq_len divisible by 2**nb_layers (default 48 / 16)")

    # Batch tiling: one grid step per `bt` samples, ("parallel",) so >=2 steps
    # feed both v7x TensorCores at large B.  bt multiple of 8 for sublane
    # tiling; ~10 MiB VMEM at bt=128 fits v5e/v6e/v7x scoped defaults.
    bt = _round_up(min(batch_tile, _round_up(B, 8)), 8)
    Bp = _round_up(B, bt)

    # Host prep: only zero-pad + transpose to time-major (no im2col gather).
    xp = jnp.pad(x, ((0, Bp - B), (0, 0), (pad, pad)))       # (Bp, cin, L+2p)
    xt = jnp.transpose(xp, (2, 0, 1))                        # (L+2p, Bp, cin)

    weights = []
    for w, b in conv:
        weights += [w, b]
    weights += [wf1, bf1, wf2, bf2]

    def _const_spec(a):
        nd = a.ndim
        return pl.BlockSpec(a.shape, lambda i, _nd=nd: (0,) * _nd)

    kernel = functools.partial(critic_kernel, bt=bt, L=L, K=K, cin=cin, C=C,
                               slope=relu_slope)

    out = pl.pallas_call(
        kernel,
        out_shape=jax.ShapeDtypeStruct((Bp, 1), jnp.float32),
        grid_spec=pltpu.PrefetchScalarGridSpec(
            num_scalar_prefetch=0,
            grid=(Bp // bt,),
            in_specs=[pl.BlockSpec((L + 2 * pad, bt, cin), lambda i: (0, i, 0))]
                     + [_const_spec(a) for a in weights],
            out_specs=pl.BlockSpec((bt, 1), lambda i: (i, 0)),
            scratch_shapes=[
                pltpu.VMEM((L // 2 + 2 * pad, bt, C), jnp.float32),  # activations
                pltpu.VMEM((bt, ds_size * C), jnp.float32),          # FC1 input
            ],
        ),
        compiler_params=pltpu.CompilerParams(
            dimension_semantics=("parallel",),
            vmem_limit_bytes=32 * 1024 * 1024,
        ),
    )(xt, *weights)
    return out[:B]


# ----------------------------------------------------------------------------
# Parameters (deterministic, synthetic; torch layouts) + kernel-layout prep
# ----------------------------------------------------------------------------
def spectral_normalize(w_oik, key, n_iter=10, eps=1e-12):
    """Divide a conv weight (Cout, Cin, K) by its estimated spectral norm
    (power iteration on the (Cout, Cin*K) reshape, mirroring torch)."""
    cout = w_oik.shape[0]
    mat = w_oik.reshape(cout, -1)
    u = jax.random.normal(key, (cout,), jnp.float32)
    u = u / (jnp.linalg.norm(u) + eps)
    v = jnp.zeros((mat.shape[1],), jnp.float32)
    for _ in range(n_iter):
        v = mat.T @ u
        v = v / (jnp.linalg.norm(v) + eps)
        u = mat @ v
        u = u / (jnp.linalg.norm(u) + eps)
    sigma = u @ (mat @ v)
    return w_oik / sigma


def make_params(key, nb_features=1, seq_len=48, kernel_size=7, channel_nb=32,
                nb_layers=4):
    """Synthetic parameters in PyTorch layouts, spectral norm already applied
    to the conv weights (the module's forward uses the spectral-normed conv)."""
    convs = []
    cin = nb_features
    for _ in range(nb_layers):
        key, kw, kb, ku = jax.random.split(key, 4)
        w = 0.1 * jax.random.normal(kw, (channel_nb, cin, kernel_size), jnp.float32)
        w = spectral_normalize(w, ku)
        b = 0.1 * jax.random.normal(kb, (channel_nb,), jnp.float32)
        convs.append((w, b))
        cin = channel_nb
    ds_size = -(-seq_len // (2 ** nb_layers))                # ceil(48/16) = 3
    fc_in = channel_nb * ds_size                             # 96
    key, k1, k2, k3, k4 = jax.random.split(key, 5)
    return {
        "conv": convs,                                       # (Cout,Cin,K), (Cout,)
        "fc1_w": 0.1 * jax.random.normal(k1, (64, fc_in), jnp.float32),
        "fc1_b": 0.1 * jax.random.normal(k2, (64,), jnp.float32),
        "fc2_w": 0.1 * jax.random.normal(k3, (1, 64), jnp.float32),
        "fc2_b": 0.1 * jax.random.normal(k4, (1,), jnp.float32),
    }


def prepare_kernel_params(params):
    """Convert torch-layout params to the layouts the fused kernel consumes."""
    conv = []
    for w_oik, b in params["conv"]:
        cout, cin, k = w_oik.shape
        # per-tap layout: rows ordered (k, ci) -> w_im[k*Cin + ci, co]
        w_im = jnp.transpose(w_oik, (2, 1, 0)).reshape(k * cin, cout)
        conv.append((w_im, b.reshape(1, cout)))
    cout = params["conv"][-1][0].shape[0]
    fc1_w = params["fc1_w"]                                  # (H, C*T), j = c*T + t
    hdim, fc_in = fc1_w.shape
    t = fc_in // cout
    # Fold torch's channel-major flatten into a time-major weight:
    # wf1[t*C + c, h] = fc1_w[h, c*T + t]
    wf1 = jnp.transpose(fc1_w.reshape(hdim, cout, t), (2, 1, 0)).reshape(
        t * cout, hdim)
    return {
        "conv": conv,
        "wf1": wf1,                                          # (T*C, H)
        "bf1": params["fc1_b"].reshape(1, hdim),
        "wf2": params["fc2_w"].reshape(1, hdim),             # (1, H)
        "bf2": params["fc2_b"].reshape(1, 1),
    }


# ----------------------------------------------------------------------------
# Pure-JAX reference (exact PyTorch semantics) for a correctness check
# ----------------------------------------------------------------------------
def critic_reference(x, params, relu_slope=0.2):
    if x.ndim == 2:
        x = x.reshape(x.shape[0], 1, -1)
    h = x.astype(jnp.float32)
    for w_oik, b in params["conv"]:
        p = (w_oik.shape[2] - 1) // 2
        y = lax.conv_general_dilated(
            h, w_oik, window_strides=(1,), padding=[(p, p)],
            dimension_numbers=("NCH", "OIH", "NCH"),
            precision=lax.Precision.HIGHEST)
        y = y + b[None, :, None]
        y = jnp.where(y >= 0, y, relu_slope * y)
        bsz, cch, ln = y.shape
        h = jnp.max(y.reshape(bsz, cch, ln // 2, 2), axis=3)    # MaxPool1d(2)
    flat = h.reshape(h.shape[0], -1)                            # torch .view on NCL
    f = jnp.dot(flat, params["fc1_w"].T,
                precision=lax.Precision.HIGHEST) + params["fc1_b"]
    f = jnp.where(f >= 0, f, 0.01 * f)
    return jnp.dot(f, params["fc2_w"].T,
                   precision=lax.Precision.HIGHEST) + params["fc2_b"]


if __name__ == "__main__":
    key = jax.random.PRNGKey(0)
    kx, kp = jax.random.split(key)
    x = jax.random.normal(kx, (2, 1, 48), jnp.float32)      # (batch, n_dim, seq_len)

    params = make_params(kp)
    kparams = prepare_kernel_params(params)

    fwd = jax.jit(critic_forward)
    validity = jax.block_until_ready(fwd(x, kparams))
    assert validity.shape == (2, 1) and validity.dtype == jnp.float32

    ref = critic_reference(x, params)
    err = float(jnp.max(jnp.abs(validity - ref)))
    assert err < 5e-3, f"kernel/reference mismatch: max abs err = {err}"
    print("KERNEL_OK")
</pallas_src>

<mosaic_0001>
module attributes {stable_mosaic.version = 11 : i64} {
  func.func @critic_kernel(%arg0: i32, %arg1: memref<54x8x1xf32, #tpu.memory_space<vmem>>, %arg2: memref<7x32xf32, #tpu.memory_space<vmem>>, %arg3: memref<1x32xf32, #tpu.memory_space<vmem>>, %arg4: memref<224x32xf32, #tpu.memory_space<vmem>>, %arg5: memref<1x32xf32, #tpu.memory_space<vmem>>, %arg6: memref<224x32xf32, #tpu.memory_space<vmem>>, %arg7: memref<1x32xf32, #tpu.memory_space<vmem>>, %arg8: memref<224x32xf32, #tpu.memory_space<vmem>>, %arg9: memref<1x32xf32, #tpu.memory_space<vmem>>, %arg10: memref<96x64xf32, #tpu.memory_space<vmem>>, %arg11: memref<1x64xf32, #tpu.memory_space<vmem>>, %arg12: memref<1x64xf32, #tpu.memory_space<vmem>>, %arg13: memref<1x1xf32, #tpu.memory_space<vmem>>, %arg14: memref<8x1xf32, #tpu.memory_space<vmem>>, %arg15: memref<30x8x32xf32, #tpu.memory_space<vmem>>, %arg16: memref<8x96xf32, #tpu.memory_space<vmem>>) attributes {dimension_semantics = [#tpu.dimension_semantics<parallel>], iteration_bounds = array<i64: 1>, scalar_prefetch = 0 : i64, scratch_operands = 2 : i64, tpu.core_type = #tpu.core_type<tc>, window_params = [{transform_indices = @transform_0, window_bounds = array<i64: 54, 8, 1>}, {pipeline_mode = #tpu.pipeline_mode<synchronous>, transform_indices = @transform_1, window_bounds = array<i64: 7, 32>}, {pipeline_mode = #tpu.pipeline_mode<synchronous>, transform_indices = @transform_2, window_bounds = array<i64: 1, 32>}, {pipeline_mode = #tpu.pipeline_mode<synchronous>, transform_indices = @transform_3, window_bounds = array<i64: 224, 32>}, {pipeline_mode = #tpu.pipeline_mode<synchronous>, transform_indices = @transform_4, window_bounds = array<i64: 1, 32>}, {pipeline_mode = #tpu.pipeline_mode<synchronous>, transform_indices = @transform_5, window_bounds = array<i64: 224, 32>}, {pipeline_mode = #tpu.pipeline_mode<synchronous>, transform_indices = @transform_6, window_bounds = array<i64: 1, 32>}, {pipeline_mode = #tpu.pipeline_mode<synchronous>, transform_indices = @transform_7, window_bounds = array<i64: 224, 32>}, {pipeline_mode = #tpu.pipeline_mode<synchronous>, transform_indices = @transform_8, window_bounds = array<i64: 1, 32>}, {pipeline_mode = #tpu.pipeline_mode<synchronous>, transform_indices = @transform_9, window_bounds = array<i64: 96, 64>}, {pipeline_mode = #tpu.pipeline_mode<synchronous>, transform_indices = @transform_10, window_bounds = array<i64: 1, 64>}, {pipeline_mode = #tpu.pipeline_mode<synchronous>, transform_indices = @transform_11, window_bounds = array<i64: 1, 64>}, {pipeline_mode = #tpu.pipeline_mode<synchronous>, transform_indices = @transform_12, window_bounds = array<i64: 1, 1>}, {transform_indices = @transform_13, window_bounds = array<i64: 8, 1>}]} {
    %c0 = arith.constant 0 : index
    %c0_0 = arith.constant 0 : index
    %0 = vector.load %arg2[%c0, %c0_0] : memref<7x32xf32, #tpu.memory_space<vmem>>, vector<7x32xf32>
    %c0_1 = arith.constant 0 : index
    %c0_2 = arith.constant 0 : index
    %1 = vector.load %arg3[%c0_1, %c0_2] : memref<1x32xf32, #tpu.memory_space<vmem>>, vector<1x32xf32>
    %cst = arith.constant 0.000000e+00 : f32
    %2 = vector.broadcast %cst : f32 to vector<384x32xf32>
    %c0_3 = arith.constant 0 : index
    %c0_4 = arith.constant 0 : index
    %c0_5 = arith.constant 0 : index
    %3 = vector.load %arg1[%c0_3, %c0_4, %c0_5] : memref<54x8x1xf32, #tpu.memory_space<vmem>>, vector<48x8x1xf32>
    %4 = vector.shape_cast %3 : vector<48x8x1xf32> to vector<384x1xf32>
    %5 = vector.extract_strided_slice %0 {offsets = [0, 0], sizes = [1, 32], strides = [1, 1]} : vector<7x32xf32> to vector<1x32xf32>
    %6 = vector.broadcast %4 : vector<384x1xf32> to vector<384x32xf32>
    %7 = vector.broadcast %5 : vector<1x32xf32> to vector<384x32xf32>
    %8 = arith.mulf %6, %7 : vector<384x32xf32>
    %9 = arith.addf %2, %8 : vector<384x32xf32>
    %c1 = arith.constant 1 : index
    %c0_6 = arith.constant 0 : index
    %c0_7 = arith.constant 0 : index
    %10 = vector.load %arg1[%c1, %c0_6, %c0_7] : memref<54x8x1xf32, #tpu.memory_space<vmem>>, vector<48x8x1xf32>
    %11 = vector.shape_cast %10 : vector<48x8x1xf32> to vector<384x1xf32>
    %12 = vector.extract_strided_slice %0 {offsets = [1, 0], sizes = [1, 32], strides = [1, 1]} : vector<7x32xf32> to vector<1x32xf32>
    %13 = vector.broadcast %11 : vector<384x1xf32> to vector<384x32xf32>
    %14 = vector.broadcast %12 : vector<1x32xf32> to vector<384x32xf32>
    %15 = arith.mulf %13, %14 : vector<384x32xf32>
    %16 = arith.addf %9, %15 : vector<384x32xf32>
    %c2 = arith.constant 2 : index
    %c0_8 = arith.constant 0 : index
    %c0_9 = arith.constant 0 : index
    %17 = vector.load %arg1[%c2, %c0_8, %c0_9] : memref<54x8x1xf32, #tpu.memory_space<vmem>>, vector<48x8x1xf32>
    %18 = vector.shape_cast %17 : vector<48x8x1xf32> to vector<384x1xf32>
    %19 = vector.extract_strided_slice %0 {offsets = [2, 0], sizes = [1, 32], strides = [1, 1]} : vector<7x32xf32> to vector<1x32xf32>
    %20 = vector.broadcast %18 : vector<384x1xf32> to vector<384x32xf32>
    %21 = vector.broadcast %19 : vector<1x32xf32> to vector<384x32xf32>
    %22 = arith.mulf %20, %21 : vector<384x32xf32>
    %23 = arith.addf %16, %22 : vector<384x32xf32>
    %c3 = arith.constant 3 : index
    %c0_10 = arith.constant 0 : index
    %c0_11 = arith.constant 0 : index
    %24 = vector.load %arg1[%c3, %c0_10, %c0_11] : memref<54x8x1xf32, #tpu.memory_space<vmem>>, vector<48x8x1xf32>
    %25 = vector.shape_cast %24 : vector<48x8x1xf32> to vector<384x1xf32>
    %26 = vector.extract_strided_slice %0 {offsets = [3, 0], sizes = [1, 32], strides = [1, 1]} : vector<7x32xf32> to vector<1x32xf32>
    %27 = vector.broadcast %25 : vector<384x1xf32> to vector<384x32xf32>
    %28 = vector.broadcast %26 : vector<1x32xf32> to vector<384x32xf32>
    %29 = arith.mulf %27, %28 : vector<384x32xf32>
    %30 = arith.addf %23, %29 : vector<384x32xf32>
    %c4 = arith.constant 4 : index
    %c0_12 = arith.constant 0 : index
    %c0_13 = arith.constant 0 : index
    %31 = vector.load %arg1[%c4, %c0_12, %c0_13] : memref<54x8x1xf32, #tpu.memory_space<vmem>>, vector<48x8x1xf32>
    %32 = vector.shape_cast %31 : vector<48x8x1xf32> to vector<384x1xf32>
    %33 = vector.extract_strided_slice %0 {offsets = [4, 0], sizes = [1, 32], strides = [1, 1]} : vector<7x32xf32> to vector<1x32xf32>
    %34 = vector.broadcast %32 : vector<384x1xf32> to vector<384x32xf32>
    %35 = vector.broadcast %33 : vector<1x32xf32> to vector<384x32xf32>
    %36 = arith.mulf %34, %35 : vector<384x32xf32>
    %37 = arith.addf %30, %36 : vector<384x32xf32>
    %c5 = arith.constant 5 : index
    %c0_14 = arith.constant 0 : index
    %c0_15 = arith.constant 0 : index
    %38 = vector.load %arg1[%c5, %c0_14, %c0_15] : memref<54x8x1xf32, #tpu.memory_space<vmem>>, vector<48x8x1xf32>
    %39 = vector.shape_cast %38 : vector<48x8x1xf32> to vector<384x1xf32>
    %40 = vector.extract_strided_slice %0 {offsets = [5, 0], sizes = [1, 32], strides = [1, 1]} : vector<7x32xf32> to vector<1x32xf32>
    %41 = vector.broadcast %39 : vector<384x1xf32> to vector<384x32xf32>
    %42 = vector.broadcast %40 : vector<1x32xf32> to vector<384x32xf32>
    %43 = arith.mulf %41, %42 : vector<384x32xf32>
    %44 = arith.addf %37, %43 : vector<384x32xf32>
    %c6 = arith.constant 6 : index
    %c0_16 = arith.constant 0 : index
    %c0_17 = arith.constant 0 : index
    %45 = vector.load %arg1[%c6, %c0_16, %c0_17] : memref<54x8x1xf32, #tpu.memory_space<vmem>>, vector<48x8x1xf32>
    %46 = vector.shape_cast %45 : vector<48x8x1xf32> to vector<384x1xf32>
    %47 = vector.extract_strided_slice %0 {offsets = [6, 0], sizes = [1, 32], strides = [1, 1]} : vector<7x32xf32> to vector<1x32xf32>
    %48 = vector.broadcast %46 : vector<384x1xf32> to vector<384x32xf32>
    %49 = vector.broadcast %47 : vector<1x32xf32> to vector<384x32xf32>
    %50 = arith.mulf %48, %49 : vector<384x32xf32>
    %51 = arith.addf %44, %50 : vector<384x32xf32>
    %52 = vector.broadcast %1 : vector<1x32xf32> to vector<384x32xf32>
    %53 = arith.addf %51, %52 : vector<384x32xf32>
    %cst_18 = arith.constant 0.000000e+00 : f32
    %54 = vector.broadcast %cst_18 : f32 to vector<384x32xf32>
    %55 = arith.cmpf oge, %53, %54 : vector<384x32xf32>
    %cst_19 = arith.constant 2.000000e-01 : f32
    %56 = vector.broadcast %cst_19 : f32 to vector<384x32xf32>
    %57 = arith.mulf %56, %53 : vector<384x32xf32>
    %58 = arith.select %55, %53, %57 : vector<384x32xi1>, vector<384x32xf32>
    %59 = vector.shape_cast %58 : vector<384x32xf32> to vector<24x16x32xf32>
    %60 = vector.extract_strided_slice %59 {offsets = [0, 0, 0], sizes = [24, 8, 32], strides = [1, 1, 1]} : vector<24x16x32xf32> to vector<24x8x32xf32>
    %61 = vector.extract_strided_slice %59 {offsets = [0, 8, 0], sizes = [24, 8, 32], strides = [1, 1, 1]} : vector<24x16x32xf32> to vector<24x8x32xf32>
    %62 = arith.maximumf %60, %61 : vector<24x8x32xf32>
    %cst_20 = arith.constant 0.000000e+00 : f32
    %63 = vector.broadcast %cst_20 : f32 to vector<3x8x32xf32>
    %c0_21 = arith.constant 0 : index
    %c0_22 = arith.constant 0 : index
    %c0_23 = arith.constant 0 : index
    %64 = vector.load %arg15[%c0_21, %c0_22, %c0_23] : memref<30x8x32xf32, #tpu.memory_space<vmem>>, vector<3x8x32xf32>
    tpu.vector_store %arg15[%c0_21, %c0_22, %c0_23], %63 {strides = array<i32>} : memref<30x8x32xf32, #tpu.memory_space<vmem>>, vector<3x8x32xf32>,
    %cst_24 = arith.constant 0.000000e+00 : f32
    %65 = vector.broadcast %cst_24 : f32 to vector<3x8x32xf32>
    %c27 = arith.constant 27 : index
    %c0_25 = arith.constant 0 : index
    %c0_26 = arith.constant 0 : index
    %66 = vector.load %arg15[%c27, %c0_25, %c0_26] : memref<30x8x32xf32, #tpu.memory_space<vmem>>, vector<3x8x32xf32>
    tpu.vector_store %arg15[%c27, %c0_25, %c0_26], %65 {strides = array<i32>} : memref<30x8x32xf32, #tpu.memory_space<vmem>>, vector<3x8x32xf32>,
    %c3_27 = arith.constant 3 : index
    %c0_28 = arith.constant 0 : index
    %c0_29 = arith.constant 0 : index
    %67 = vector.load %arg15[%c3_27, %c0_28, %c0_29] : memref<30x8x32xf32, #tpu.memory_space<vmem>>, vector<24x8x32xf32>
    tpu.vector_store %arg15[%c3_27, %c0_28, %c0_29], %62 {strides = array<i32>} : memref<30x8x32xf32, #tpu.memory_space<vmem>>, vector<24x8x32xf32>,
    %cst_30 = arith.constant 0.000000e+00 : f32
    %68 = vector.broadcast %cst_30 : f32 to vector<192x32xf32>
    %c0_31 = arith.constant 0 : index
    %c0_32 = arith.constant 0 : index
    %c0_33 = arith.constant 0 : index
    %69 = vector.load %arg15[%c0_31, %c0_32, %c0_33] : memref<30x8x32xf32, #tpu.memory_space<vmem>>, vector<24x8x32xf32>
    %70 = vector.shape_cast %69 : vector<24x8x32xf32> to vector<192x32xf32>
    %c0_34 = arith.constant 0 : index
    %c0_35 = arith.constant 0 : index
    %71 = vector.load %arg4[%c0_34, %c0_35] : memref<224x32xf32, #tpu.memory_space<vmem>>, vector<32x32xf32>
    %cst_36 = arith.constant dense<0.000000e+00> : vector<192x32xf32>
    %72 = tpu.matmul %70, %71, %cst_36 {dimension_numbers = #tpu.dot_dimension_numbers<[1], [0], [0], [1], [0, 0, 1, 1], [], []>} : vector<192x32xf32>, vector<32x32xf32>, vector<192x32xf32> -> vector<192x32xf32>
    %73 = arith.addf %68, %72 : vector<192x32xf32>
    %c1_37 = arith.constant 1 : index
    %c0_38 = arith.constant 0 : index
    %c0_39 = arith.constant 0 : index
    %74 = vector.load %arg15[%c1_37, %c0_38, %c0_39] : memref<30x8x32xf32, #tpu.memory_space<vmem>>, vector<24x8x32xf32>
    %75 = vector.shape_cast %74 : vector<24x8x32xf32> to vector<192x32xf32>
    %c32 = arith.constant 32 : index
    %c0_40 = arith.constant 0 : index
    %76 = vector.load %arg4[%c32, %c0_40] : memref<224x32xf32, #tpu.memory_space<vmem>>, vector<32x32xf32>
    %cst_41 = arith.constant dense<0.000000e+00> : vector<192x32xf32>
    %77 = tpu.matmul %75, %76, %cst_41 {dimension_numbers = #tpu.dot_dimension_numbers<[1], [0], [0], [1], [0, 0, 1, 1], [], []>} : vector<192x32xf32>, vector<32x32xf32>, vector<192x32xf32> -> vector<192x32xf32>
    %78 = arith.addf %73, %77 : vector<192x32xf32>
    %c2_42 = arith.constant 2 : index
    %c0_43 = arith.constant 0 : index
    %c0_44 = arith.constant 0 : index
    %79 = vector.load %arg15[%c2_42, %c0_43, %c0_44] : memref<30x8x32xf32, #tpu.memory_space<vmem>>, vector<24x8x32xf32>
    %80 = vector.shape_cast %79 : vector<24x8x32xf32> to vector<192x32xf32>
    %c64 = arith.constant 64 : index
    %c0_45 = arith.constant 0 : index
    %81 = vector.load %arg4[%c64, %c0_45] : memref<224x32xf32, #tpu.memory_space<vmem>>, vector<32x32xf32>
    %cst_46 = arith.constant dense<0.000000e+00> : vector<192x32xf32>
    %82 = tpu.matmul %80, %81, %cst_46 {dimension_numbers = #tpu.dot_dimension_numbers<[1], [0], [0], [1], [0, 0, 1, 1], [], []>} : vector<192x32xf32>, vector<32x32xf32>, vector<192x32xf32> -> vector<192x32xf32>
    %83 = arith.addf %78, %82 : vector<192x32xf32>
    %c3_47 = arith.constant 3 : index
    %c0_48 = arith.constant 0 : index
    %c0_49 = arith.constant 0 : index
    %84 = vector.load %arg15[%c3_47, %c0_48, %c0_49] : memref<30x8x32xf32, #tpu.memory_space<vmem>>, vector<24x8x32xf32>
    %85 = vector.shape_cast %84 : vector<24x8x32xf32> to vector<192x32xf32>
    %c96 = arith.constant 96 : index
    %c0_50 = arith.constant 0 : index
    %86 = vector.load %arg4[%c96, %c0_50] : memref<224x32xf32, #tpu.memory_space<vmem>>, vector<32x32xf32>
    %cst_51 = arith.constant dense<0.000000e+00> : vector<192x32xf32>
    %87 = tpu.matmul %85, %86, %cst_51 {dimension_numbers = #tpu.dot_dimension_numbers<[1], [0], [0], [1], [0, 0, 1, 1], [], []>} : vector<192x32xf32>, vector<32x32xf32>, vector<192x32xf32> -> vector<192x32xf32>
    %88 = arith.addf %83, %87 : vector<192x32xf32>
    %c4_52 = arith.constant 4 : index
    %c0_53 = arith.constant 0 : index
    %c0_54 = arith.constant 0 : index
    %89 = vector.load %arg15[%c4_52, %c0_53, %c0_54] : memref<30x8x32xf32, #tpu.memory_space<vmem>>, vector<24x8x32xf32>
    %90 = vector.shape_cast %89 : vector<24x8x32xf32> to vector<192x32xf32>
    %c128 = arith.constant 128 : index
    %c0_55 = arith.constant 0 : index
    %91 = vector.load %arg4[%c128, %c0_55] : memref<224x32xf32, #tpu.memory_space<vmem>>, vector<32x32xf32>
    %cst_56 = arith.constant dense<0.000000e+00> : vector<192x32xf32>
    %92 = tpu.matmul %90, %91, %cst_56 {dimension_numbers = #tpu.dot_dimension_numbers<[1], [0], [0], [1], [0, 0, 1, 1], [], []>} : vector<192x32xf32>, vector<32x32xf32>, vector<192x32xf32> -> vector<192x32xf32>
    %93 = arith.addf %88, %92 : vector<192x32xf32>
    %c5_57 = arith.constant 5 : index
    %c0_58 = arith.constant 0 : index
    %c0_59 = arith.constant 0 : index
    %94 = vector.load %arg15[%c5_57, %c0_58, %c0_59] : memref<30x8x32xf32, #tpu.memory_space<vmem>>, vector<24x8x32xf32>
    %95 = vector.shape_cast %94 : vector<24x8x32xf32> to vector<192x32xf32>
    %c160 = arith.constant 160 : index
    %c0_60 = arith.constant 0 : index
    %96 = vector.load %arg4[%c160, %c0_60] : memref<224x32xf32, #tpu.memory_space<vmem>>, vector<32x32xf32>
    %cst_61 = arith.constant dense<0.000000e+00> : vector<192x32xf32>
    %97 = tpu.matmul %95, %96, %cst_61 {dimension_numbers = #tpu.dot_dimension_numbers<[1], [0], [0], [1], [0, 0, 1, 1], [], []>} : vector<192x32xf32>, vector<32x32xf32>, vector<192x32xf32> -> vector<192x32xf32>
    %98 = arith.addf %93, %97 : vector<192x32xf32>
    %c6_62 = arith.constant 6 : index
    %c0_63 = arith.constant 0 : index
    %c0_64 = arith.constant 0 : index
    %99 = vector.load %arg15[%c6_62, %c0_63, %c0_64] : memref<30x8x32xf32, #tpu.memory_space<vmem>>, vector<24x8x32xf32>
    %100 = vector.shape_cast %99 : vector<24x8x32xf32> to vector<192x32xf32>
    %c192 = arith.constant 192 : index
    %c0_65 = arith.constant 0 : index
    %101 = vector.load %arg4[%c192, %c0_65] : memref<224x32xf32, #tpu.memory_space<vmem>>, vector<32x32xf32>
    %cst_66 = arith.constant dense<0.000000e+00> : vector<192x32xf32>
    %102 = tpu.matmul %100, %101, %cst_66 {dimension_numbers = #tpu.dot_dimension_numbers<[1], [0], [0], [1], [0, 0, 1, 1], [], []>} : vector<192x32xf32>, vector<32x32xf32>, vector<192x32xf32> -> vector<192x32xf32>
    %103 = arith.addf %98, %102 : vector<192x32xf32>
    %c0_67 = arith.constant 0 : index
    %c0_68 = arith.constant 0 : index
    %104 = vector.load %arg5[%c0_67, %c0_68] : memref<1x32xf32, #tpu.memory_space<vmem>>, vector<1x32xf32>
    %105 = vector.broadcast %104 : vector<1x32xf32> to vector<192x32xf32>
    %106 = arith.addf %103, %105 : vector<192x32xf32>
    %cst_69 = arith.constant 0.000000e+00 : f32
    %107 = vector.broadcast %cst_69 : f32 to vector<192x32xf32>
    %108 = arith.cmpf oge, %106, %107 : vector<192x32xf32>
    %cst_70 = arith.constant 2.000000e-01 : f32
    %109 = vector.broadcast %cst_70 : f32 to vector<192x32xf32>
    %110 = arith.mulf %109, %106 : vector<192x32xf32>
    %111 = arith.select %108, %106, %110 : vector<192x32xi1>, vector<192x32xf32>
    %112 = vector.shape_cast %111 : vector<192x32xf32> to vector<12x16x32xf32>
    %113 = vector.extract_strided_slice %112 {offsets = [0, 0, 0], sizes = [12, 8, 32], strides = [1, 1, 1]} : vector<12x16x32xf32> to vector<12x8x32xf32>
    %114 = vector.extract_strided_slice %112 {offsets = [0, 8, 0], sizes = [12, 8, 32], strides = [1, 1, 1]} : vector<12x16x32xf32> to vector<12x8x32xf32>
    %115 = arith.maximumf %113, %114 : vector<12x8x32xf32>
    %cst_71 = arith.constant 0.000000e+00 : f32
    %116 = vector.broadcast %cst_71 : f32 to vector<12x8x32xf32>
    %c15 = arith.constant 15 : index
    %c0_72 = arith.constant 0 : index
    %c0_73 = arith.constant 0 : index
    %117 = vector.load %arg15[%c15, %c0_72, %c0_73] : memref<30x8x32xf32, #tpu.memory_space<vmem>>, vector<12x8x32xf32>
    tpu.vector_store %arg15[%c15, %c0_72, %c0_73], %116 {strides = array<i32>} : memref<30x8x32xf32, #tpu.memory_space<vmem>>, vector<12x8x32xf32>,
    %c3_74 = arith.constant 3 : index
    %c0_75 = arith.constant 0 : index
    %c0_76 = arith.constant 0 : index
    %118 = vector.load %arg15[%c3_74, %c0_75, %c0_76] : memref<30x8x32xf32, #tpu.memory_space<vmem>>, vector<12x8x32xf32>
    tpu.vector_store %arg15[%c3_74, %c0_75, %c0_76], %115 {strides = array<i32>} : memref<30x8x32xf32, #tpu.memory_space<vmem>>, vector<12x8x32xf32>,
    %cst_77 = arith.constant 0.000000e+00 : f32
    %119 = vector.broadcast %cst_77 : f32 to vector<96x32xf32>
    %c0_78 = arith.constant 0 : index
    %c0_79 = arith.constant 0 : index
    %c0_80 = arith.constant 0 : index
    %120 = vector.load %arg15[%c0_78, %c0_79, %c0_80] : memref<30x8x32xf32, #tpu.memory_space<vmem>>, vector<12x8x32xf32>
    %121 = vector.shape_cast %120 : vector<12x8x32xf32> to vector<96x32xf32>
    %c0_81 = arith.constant 0 : index
    %c0_82 = arith.constant 0 : index
    %122 = vector.load %arg6[%c0_81, %c0_82] : memref<224x32xf32, #tpu.memory_space<vmem>>, vector<32x32xf32>
    %cst_83 = arith.constant dense<0.000000e+00> : vector<96x32xf32>
    %123 = tpu.matmul %121, %122, %cst_83 {dimension_numbers = #tpu.dot_dimension_numbers<[1], [0], [0], [1], [0, 0, 1, 1], [], []>} : vector<96x32xf32>, vector<32x32xf32>, vector<96x32xf32> -> vector<96x32xf32>
    %124 = arith.addf %119, %123 : vector<96x32xf32>
    %c1_84 = arith.constant 1 : index
    %c0_85 = arith.constant 0 : index
    %c0_86 = arith.constant 0 : index
    %125 = vector.load %arg15[%c1_84, %c0_85, %c0_86] : memref<30x8x32xf32, #tpu.memory_space<vmem>>, vector<12x8x32xf32>
    %126 = vector.shape_cast %125 : vector<12x8x32xf32> to vector<96x32xf32>
    %c32_87 = arith.constant 32 : index
    %c0_88 = arith.constant 0 : index
    %127 = vector.load %arg6[%c32_87, %c0_88] : memref<224x32xf32, #tpu.memory_space<vmem>>, vector<32x32xf32>
    %cst_89 = arith.constant dense<0.000000e+00> : vector<96x32xf32>
    %128 = tpu.matmul %126, %127, %cst_89 {dimension_numbers = #tpu.dot_dimension_numbers<[1], [0], [0], [1], [0, 0, 1, 1], [], []>} : vector<96x32xf32>, vector<32x32xf32>, vector<96x32xf32> -> vector<96x32xf32>
    %129 = arith.addf %124, %128 : vector<96x32xf32>
    %c2_90 = arith.constant 2 : index
    %c0_91 = arith.constant 0 : index
    %c0_92 = arith.constant 0 : index
    %130 = vector.load %arg15[%c2_90, %c0_91, %c0_92] : memref<30x8x32xf32, #tpu.memory_space<vmem>>, vector<12x8x32xf32>
    %131 = vector.shape_cast %130 : vector<12x8x32xf32> to vector<96x32xf32>
    %c64_93 = arith.constant 64 : index
    %c0_94 = arith.constant 0 : index
    %132 = vector.load %arg6[%c64_93, %c0_94] : memref<224x32xf32, #tpu.memory_space<vmem>>, vector<32x32xf32>
    %cst_95 = arith.constant dense<0.000000e+00> : vector<96x32xf32>
    %133 = tpu.matmul %131, %132, %cst_95 {dimension_numbers = #tpu.dot_dimension_numbers<[1], [0], [0], [1], [0, 0, 1, 1], [], []>} : vector<96x32xf32>, vector<32x32xf32>, vector<96x32xf32> -> vector<96x32xf32>
    %134 = arith.addf %129, %133 : vector<96x32xf32>
    %c3_96 = arith.constant 3 : index
    %c0_97 = arith.constant 0 : index
    %c0_98 = arith.constant 0 : index
    %135 = vector.load %arg15[%c3_96, %c0_97, %c0_98] : memref<30x8x32xf32, #tpu.memory_space<vmem>>, vector<12x8x32xf32>
    %136 = vector.shape_cast %135 : vector<12x8x32xf32> to vector<96x32xf32>
    %c96_99 = arith.constant 96 : index
    %c0_100 = arith.constant 0 : index
    %137 = vector.load %arg6[%c96_99, %c0_100] : memref<224x32xf32, #tpu.memory_space<vmem>>, vector<32x32xf32>
    %cst_101 = arith.constant dense<0.000000e+00> : vector<96x32xf32>
    %138 = tpu.matmul %136, %137, %cst_101 {dimension_numbers = #tpu.dot_dimension_numbers<[1], [0], [0], [1], [0, 0, 1, 1], [], []>} : vector<96x32xf32>, vector<32x32xf32>, vector<96x32xf32> -> vector<96x32xf32>
    %139 = arith.addf %134, %138 : vector<96x32xf32>
    %c4_102 = arith.constant 4 : index
    %c0_103 = arith.constant 0 : index
    %c0_104 = arith.constant 0 : index
    %140 = vector.load %arg15[%c4_102, %c0_103, %c0_104] : memref<30x8x32xf32, #tpu.memory_space<vmem>>, vector<12x8x32xf32>
    %141 = vector.shape_cast %140 : vector<12x8x32xf32> to vector<96x32xf32>
    %c128_105 = arith.constant 128 : index
    %c0_106 = arith.constant 0 : index
    %142 = vector.load %arg6[%c128_105, %c0_106] : memref<224x32xf32, #tpu.memory_space<vmem>>, vector<32x32xf32>
    %cst_107 = arith.constant dense<0.000000e+00> : vector<96x32xf32>
    %143 = tpu.matmul %141, %142, %cst_107 {dimension_numbers = #tpu.dot_dimension_numbers<[1], [0], [0], [1], [0, 0, 1, 1], [], []>} : vector<96x32xf32>, vector<32x32xf32>, vector<96x32xf32> -> vector<96x32xf32>
    %144 = arith.addf %139, %143 : vector<96x32xf32>
    %c5_108 = arith.constant 5 : index
    %c0_109 = arith.constant 0 : index
    %c0_110 = arith.constant 0 : index
    %145 = vector.load %arg15[%c5_108, %c0_109, %c0_110] : memref<30x8x32xf32, #tpu.memory_space<vmem>>, vector<12x8x32xf32>
    %146 = vector.shape_cast %145 : vector<12x8x32xf32> to vector<96x32xf32>
    %c160_111 = arith.constant 160 : index
    %c0_112 = arith.constant 0 : index
    %147 = vector.load %arg6[%c160_111, %c0_112] : memref<224x32xf32, #tpu.memory_space<vmem>>, vector<32x32xf32>
    %cst_113 = arith.constant dense<0.000000e+00> : vector<96x32xf32>
    %148 = tpu.matmul %146, %147, %cst_113 {dimension_numbers = #tpu.dot_dimension_numbers<[1], [0], [0], [1], [0, 0, 1, 1], [], []>} : vector<96x32xf32>, vector<32x32xf32>, vector<96x32xf32> -> vector<96x32xf32>
    %149 = arith.addf %144, %148 : vector<96x32xf32>
    %c6_114 = arith.constant 6 : index
    %c0_115 = arith.constant 0 : index
    %c0_116 = arith.constant 0 : index
    %150 = vector.load %arg15[%c6_114, %c0_115, %c0_116] : memref<30x8x32xf32, #tpu.memory_space<vmem>>, vector<12x8x32xf32>
    %151 = vector.shape_cast %150 : vector<12x8x32xf32> to vector<96x32xf32>
    %c192_117 = arith.constant 192 : index
    %c0_118 = arith.constant 0 : index
    %152 = vector.load %arg6[%c192_117, %c0_118] : memref<224x32xf32, #tpu.memory_space<vmem>>, vector<32x32xf32>
    %cst_119 = arith.constant dense<0.000000e+00> : vector<96x32xf32>
    %153 = tpu.matmul %151, %152, %cst_119 {dimension_numbers = #tpu.dot_dimension_numbers<[1], [0], [0], [1], [0, 0, 1, 1], [], []>} : vector<96x32xf32>, vector<32x32xf32>, vector<96x32xf32> -> vector<96x32xf32>
    %154 = arith.addf %149, %153 : vector<96x32xf32>
    %c0_120 = arith.constant 0 : index
    %c0_121 = arith.constant 0 : index
    %155 = vector.load %arg7[%c0_120, %c0_121] : memref<1x32xf32, #tpu.memory_space<vmem>>, vector<1x32xf32>
    %156 = vector.broadcast %155 : vector<1x32xf32> to vector<96x32xf32>
    %157 = arith.addf %154, %156 : vector<96x32xf32>
    %cst_122 = arith.constant 0.000000e+00 : f32
    %158 = vector.broadcast %cst_122 : f32 to vector<96x32xf32>
    %159 = arith.cmpf oge, %157, %158 : vector<96x32xf32>
    %cst_123 = arith.constant 2.000000e-01 : f32
    %160 = vector.broadcast %cst_123 : f32 to vector<96x32xf32>
    %161 = arith.mulf %160, %157 : vector<96x32xf32>
    %162 = arith.select %159, %157, %161 : vector<96x32xi1>, vector<96x32xf32>
    %163 = vector.shape_cast %162 : vector<96x32xf32> to vector<6x16x32xf32>
    %164 = vector.extract_strided_slice %163 {offsets = [0, 0, 0], sizes = [6, 8, 32], strides = [1, 1, 1]} : vector<6x16x32xf32> to vector<6x8x32xf32>
    %165 = vector.extract_strided_slice %163 {offsets = [0, 8, 0], sizes = [6, 8, 32], strides = [1, 1, 1]} : vector<6x16x32xf32> to vector<6x8x32xf32>
    %166 = arith.maximumf %164, %165 : vector<6x8x32xf32>
    %cst_124 = arith.constant 0.000000e+00 : f32
    %167 = vector.broadcast %cst_124 : f32 to vector<6x8x32xf32>
    %c9 = arith.constant 9 : index
    %c0_125 = arith.constant 0 : index
    %c0_126 = arith.constant 0 : index
    %168 = vector.load %arg15[%c9, %c0_125, %c0_126] : memref<30x8x32xf32, #tpu.memory_space<vmem>>, vector<6x8x32xf32>
    tpu.vector_store %arg15[%c9, %c0_125, %c0_126], %167 {strides = array<i32>} : memref<30x8x32xf32, #tpu.memory_space<vmem>>, vector<6x8x32xf32>,
    %c3_127 = arith.constant 3 : index
    %c0_128 = arith.constant 0 : index
    %c0_129 = arith.constant 0 : index
    %169 = vector.load %arg15[%c3_127, %c0_128, %c0_129] : memref<30x8x32xf32, #tpu.memory_space<vmem>>, vector<6x8x32xf32>
    tpu.vector_store %arg15[%c3_127, %c0_128, %c0_129], %166 {strides = array<i32>} : memref<30x8x32xf32, #tpu.memory_space<vmem>>, vector<6x8x32xf32>,
    %cst_130 = arith.constant 0.000000e+00 : f32
    %170 = vector.broadcast %cst_130 : f32 to vector<48x32xf32>
    %c0_131 = arith.constant 0 : index
    %c0_132 = arith.constant 0 : index
    %c0_133 = arith.constant 0 : index
    %171 = vector.load %arg15[%c0_131, %c0_132, %c0_133] : memref<30x8x32xf32, #tpu.memory_space<vmem>>, vector<6x8x32xf32>
    %172 = vector.shape_cast %171 : vector<6x8x32xf32> to vector<48x32xf32>
    %c0_134 = arith.constant 0 : index
    %c0_135 = arith.constant 0 : index
    %173 = vector.load %arg8[%c0_134, %c0_135] : memref<224x32xf32, #tpu.memory_space<vmem>>, vector<32x32xf32>
    %cst_136 = arith.constant dense<0.000000e+00> : vector<48x32xf32>
    %174 = tpu.matmul %172, %173, %cst_136 {dimension_numbers = #tpu.dot_dimension_numbers<[1], [0], [0], [1], [0, 0, 1, 1], [], []>} : vector<48x32xf32>, vector<32x32xf32>, vector<48x32xf32> -> vector<48x32xf32>
    %175 = arith.addf %170, %174 : vector<48x32xf32>
    %c1_137 = arith.constant 1 : index
    %c0_138 = arith.constant 0 : index
    %c0_139 = arith.constant 0 : index
    %176 = vector.load %arg15[%c1_137, %c0_138, %c0_139] : memref<30x8x32xf32, #tpu.memory_space<vmem>>, vector<6x8x32xf32>
    %177 = vector.shape_cast %176 : vector<6x8x32xf32> to vector<48x32xf32>
    %c32_140 = arith.constant 32 : index
    %c0_141 = arith.constant 0 : index
    %178 = vector.load %arg8[%c32_140, %c0_141] : memref<224x32xf32, #tpu.memory_space<vmem>>, vector<32x32xf32>
    %cst_142 = arith.constant dense<0.000000e+00> : vector<48x32xf32>
    %179 = tpu.matmul %177, %178, %cst_142 {dimension_numbers = #tpu.dot_dimension_numbers<[1], [0], [0], [1], [0, 0, 1, 1], [], []>} : vector<48x32xf32>, vector<32x32xf32>, vector<48x32xf32> -> vector<48x32xf32>
    %180 = arith.addf %175, %179 : vector<48x32xf32>
    %c2_143 = arith.constant 2 : index
    %c0_144 = arith.constant 0 : index
    %c0_145 = arith.constant 0 : index
    %181 = vector.load %arg15[%c2_143, %c0_144, %c0_145] : memref<30x8x32xf32, #tpu.memory_space<vmem>>, vector<6x8x32xf32>
    %182 = vector.shape_cast %181 : vector<6x8x32xf32> to vector<48x32xf32>
    %c64_146 = arith.constant 64 : index
    %c0_147 = arith.constant 0 : index
    %183 = vector.load %arg8[%c64_146, %c0_147] : memref<224x32xf32, #tpu.memory_space<vmem>>, vector<32x32xf32>
    %cst_148 = arith.constant dense<0.000000e+00> : vector<48x32xf32>
    %184 = tpu.matmul %182, %183, %cst_148 {dimension_numbers = #tpu.dot_dimension_numbers<[1], [0], [0], [1], [0, 0, 1, 1], [], []>} : vector<48x32xf32>, vector<32x32xf32>, vector<48x32xf32> -> vector<48x32xf32>
    %185 = arith.addf %180, %184 : vector<48x32xf32>
    %c3_149 = arith.constant 3 : index
    %c0_150 = arith.constant 0 : index
    %c0_151 = arith.constant 0 : index
    %186 = vector.load %arg15[%c3_149, %c0_150, %c0_151] : memref<30x8x32xf32, #tpu.memory_space<vmem>>, vector<6x8x32xf32>
    %187 = vector.shape_cast %186 : vector<6x8x32xf32> to vector<48x32xf32>
    %c96_152 = arith.constant 96 : index
    %c0_153 = arith.constant 0 : index
    %188 = vector.load %arg8[%c96_152, %c0_153] : memref<224x32xf32, #tpu.memory_space<vmem>>, vector<32x32xf32>
    %cst_154 = arith.constant dense<0.000000e+00> : vector<48x32xf32>
    %189 = tpu.matmul %187, %188, %cst_154 {dimension_numbers = #tpu.dot_dimension_numbers<[1], [0], [0], [1], [0, 0, 1, 1], [], []>} : vector<48x32xf32>, vector<32x32xf32>, vector<48x32xf32> -> vector<48x32xf32>
    %190 = arith.addf %185, %189 : vector<48x32xf32>
    %c4_155 = arith.constant 4 : index
    %c0_156 = arith.constant 0 : index
    %c0_157 = arith.constant 0 : index
    %191 = vector.load %arg15[%c4_155, %c0_156, %c0_157] : memref<30x8x32xf32, #tpu.memory_space<vmem>>, vector<6x8x32xf32>
    %192 = vector.shape_cast %191 : vector<6x8x32xf32> to vector<48x32xf32>
    %c128_158 = arith.constant 128 : index
    %c0_159 = arith.constant 0 : index
    %193 = vector.load %arg8[%c128_158, %c0_159] : memref<224x32xf32, #tpu.memory_space<vmem>>, vector<32x32xf32>
    %cst_160 = arith.constant dense<0.000000e+00> : vector<48x32xf32>
    %194 = tpu.matmul %192, %193, %cst_160 {dimension_numbers = #tpu.dot_dimension_numbers<[1], [0], [0], [1], [0, 0, 1, 1], [], []>} : vector<48x32xf32>, vector<32x32xf32>, vector<48x32xf32> -> vector<48x32xf32>
    %195 = arith.addf %190, %194 : vector<48x32xf32>
    %c5_161 = arith.constant 5 : index
    %c0_162 = arith.constant 0 : index
    %c0_163 = arith.constant 0 : index
    %196 = vector.load %arg15[%c5_161, %c0_162, %c0_163] : memref<30x8x32xf32, #tpu.memory_space<vmem>>, vector<6x8x32xf32>
    %197 = vector.shape_cast %196 : vector<6x8x32xf32> to vector<48x32xf32>
    %c160_164 = arith.constant 160 : index
    %c0_165 = arith.constant 0 : index
    %198 = vector.load %arg8[%c160_164, %c0_165] : memref<224x32xf32, #tpu.memory_space<vmem>>, vector<32x32xf32>
    %cst_166 = arith.constant dense<0.000000e+00> : vector<48x32xf32>
    %199 = tpu.matmul %197, %198, %cst_166 {dimension_numbers = #tpu.dot_dimension_numbers<[1], [0], [0], [1], [0, 0, 1, 1], [], []>} : vector<48x32xf32>, vector<32x32xf32>, vector<48x32xf32> -> vector<48x32xf32>
    %200 = arith.addf %195, %199 : vector<48x32xf32>
    %c6_167 = arith.constant 6 : index
    %c0_168 = arith.constant 0 : index
    %c0_169 = arith.constant 0 : index
    %201 = vector.load %arg15[%c6_167, %c0_168, %c0_169] : memref<30x8x32xf32, #tpu.memory_space<vmem>>, vector<6x8x32xf32>
    %202 = vector.shape_cast %201 : vector<6x8x32xf32> to vector<48x32xf32>
    %c192_170 = arith.constant 192 : index
    %c0_171 = arith.constant 0 : index
    %203 = vector.load %arg8[%c192_170, %c0_171] : memref<224x32xf32, #tpu.memory_space<vmem>>, vector<32x32xf32>
    %cst_172 = arith.constant dense<0.000000e+00> : vector<48x32xf32>
    %204 = tpu.matmul %202, %203, %cst_172 {dimension_numbers = #tpu.dot_dimension_numbers<[1], [0], [0], [1], [0, 0, 1, 1], [], []>} : vector<48x32xf32>, vector<32x32xf32>, vector<48x32xf32> -> vector<48x32xf32>
    %205 = arith.addf %200, %204 : vector<48x32xf32>
    %c0_173 = arith.constant 0 : index
    %c0_174 = arith.constant 0 : index
    %206 = vector.load %arg9[%c0_173, %c0_174] : memref<1x32xf32, #tpu.memory_space<vmem>>, vector<1x32xf32>
    %207 = vector.broadcast %206 : vector<1x32xf32> to vector<48x32xf32>
    %208 = arith.addf %205, %207 : vector<48x32xf32>
    %cst_175 = arith.constant 0.000000e+00 : f32
    %209 = vector.broadcast %cst_175 : f32 to vector<48x32xf32>
    %210 = arith.cmpf oge, %208, %209 : vector<48x32xf32>
    %cst_176 = arith.constant 2.000000e-01 : f32
    %211 = vector.broadcast %cst_176 : f32 to vector<48x32xf32>
    %212 = arith.mulf %211, %208 : vector<48x32xf32>
    %213 = arith.select %210, %208, %212 : vector<48x32xi1>, vector<48x32xf32>
    %214 = vector.shape_cast %213 : vector<48x32xf32> to vector<3x16x32xf32>
    %215 = vector.extract_strided_slice %214 {offsets = [0, 0, 0], sizes = [3, 8, 32], strides = [1, 1, 1]} : vector<3x16x32xf32> to vector<3x8x32xf32>
    %216 = vector.extract_strided_slice %214 {offsets = [0, 8, 0], sizes = [3, 8, 32], strides = [1, 1, 1]} : vector<3x16x32xf32> to vector<3x8x32xf32>
    %217 = arith.maximumf %215, %216 : vector<3x8x32xf32>
    %218 = vector.extract_strided_slice %217 {offsets = [0, 0, 0], sizes = [1, 8, 32], strides = [1, 1, 1]} : vector<3x8x32xf32> to vector<1x8x32xf32>
    %219 = vector.shape_cast %218 : vector<1x8x32xf32> to vector<8x32xf32>
    %c0_177 = arith.constant 0 : index
    %c0_178 = arith.constant 0 : index
    %220 = vector.load %arg16[%c0_177, %c0_178] : memref<8x96xf32, #tpu.memory_space<vmem>>, vector<8x32xf32>
    tpu.vector_store %arg16[%c0_177, %c0_178], %219 {strides = array<i32>} : memref<8x96xf32, #tpu.memory_space<vmem>>, vector<8x32xf32>,
    %221 = vector.extract_strided_slice %217 {offsets = [1, 0, 0], sizes = [1, 8, 32], strides = [1, 1, 1]} : vector<3x8x32xf32> to vector<1x8x32xf32>
    %222 = vector.shape_cast %221 : vector<1x8x32xf32> to vector<8x32xf32>
    %c0_179 = arith.constant 0 : index
    %c32_180 = arith.constant 32 : index
    %223 = vector.load %arg16[%c0_179, %c32_180] : memref<8x96xf32, #tpu.memory_space<vmem>>, vector<8x32xf32>
    tpu.vector_store %arg16[%c0_179, %c32_180], %222 {strides = array<i32>} : memref<8x96xf32, #tpu.memory_space<vmem>>, vector<8x32xf32>,
    %224 = vector.extract_strided_slice %217 {offsets = [2, 0, 0], sizes = [1, 8, 32], strides = [1, 1, 1]} : vector<3x8x32xf32> to vector<1x8x32xf32>
    %225 = vector.shape_cast %224 : vector<1x8x32xf32> to vector<8x32xf32>
    %c0_181 = arith.constant 0 : index
    %c64_182 = arith.constant 64 : index
    %226 = vector.load %arg16[%c0_181, %c64_182] : memref<8x96xf32, #tpu.memory_space<vmem>>, vector<8x32xf32>
    tpu.vector_store %arg16[%c0_181, %c64_182], %225 {strides = array<i32>} : memref<8x96xf32, #tpu.memory_space<vmem>>, vector<8x32xf32>,
    %c0_183 = arith.constant 0 : index
    %c0_184 = arith.constant 0 : index
    %227 = vector.load %arg16[%c0_183, %c0_184] : memref<8x96xf32, #tpu.memory_space<vmem>>, vector<8x96xf32>
    %c0_185 = arith.constant 0 : index
    %c0_186 = arith.constant 0 : index
    %228 = vector.load %arg10[%c0_185, %c0_186] : memref<96x64xf32, #tpu.memory_space<vmem>>, vector<96x64xf32>
    %cst_187 = arith.constant dense<0.000000e+00> : vector<8x64xf32>
    %229 = tpu.matmul %227, %228, %cst_187 {dimension_numbers = #tpu.dot_dimension_numbers<[1], [0], [0], [1], [0, 0, 1, 1], [], []>} : vector<8x96xf32>, vector<96x64xf32>, vector<8x64xf32> -> vector<8x64xf32>
    %c0_188 = arith.constant 0 : index
    %c0_189 = arith.constant 0 : index
    %230 = vector.load %arg11[%c0_188, %c0_189] : memref<1x64xf32, #tpu.memory_space<vmem>>, vector<1x64xf32>
    %231 = vector.broadcast %230 : vector<1x64xf32> to vector<8x64xf32>
    %232 = arith.addf %229, %231 : vector<8x64xf32>
    %cst_190 = arith.constant 0.000000e+00 : f32
    %233 = vector.broadcast %cst_190 : f32 to vector<8x64xf32>
    %234 = arith.cmpf oge, %232, %233 : vector<8x64xf32>
    %cst_191 = arith.constant 0.00999999977 : f32
    %235 = vector.broadcast %cst_191 : f32 to vector<8x64xf32>
    %236 = arith.mulf %235, %232 : vector<8x64xf32>
    %237 = arith.select %234, %232, %236 : vector<8x64xi1>, vector<8x64xf32>
    %c0_192 = arith.constant 0 : index
    %c0_193 = arith.constant 0 : index
    %238 = vector.load %arg12[%c0_192, %c0_193] : memref<1x64xf32, #tpu.memory_space<vmem>>, vector<1x64xf32>
    %239 = vector.broadcast %238 : vector<1x64xf32> to vector<8x64xf32>
    %240 = arith.mulf %237, %239 : vector<8x64xf32>
    %cst_194 = arith.constant dense<0.000000e+00> : vector<8xf32>
    %241 = vector.multi_reduction <add>, %240, %cst_194 [1] : vector<8x64xf32> to vector<8xf32>
    %242 = vector.shape_cast %241 : vector<8xf32> to vector<8x1xf32>
    %c0_195 = arith.constant 0 : index
    %c0_196 = arith.constant 0 : index
    %243 = vector.load %arg13[%c0_195, %c0_196] : memref<1x1xf32, #tpu.memory_space<vmem>>, vector<1x1xf32>
    %244 = vector.broadcast %243 : vector<1x1xf32> to vector<8x1xf32>
    %245 = arith.addf %242, %244 : vector<8x1xf32>
    %c0_197 = arith.constant 0 : index
    %c0_198 = arith.constant 0 : index
    %246 = vector.load %arg14[%c0_197, %c0_198] : memref<8x1xf32, #tpu.memory_space<vmem>>, vector<8x1xf32>
    tpu.vector_store %arg14[%c0_197, %c0_198], %245 {strides = array<i32>} : memref<8x1xf32, #tpu.memory_space<vmem>>, vector<8x1xf32>,
    return
  }
  func.func @transform_0(%arg0: i32) -> (i32, i32, i32) {
    %c0_i32 = arith.constant 0 : i32
    %c0_i32_0 = arith.constant 0 : i32
    %c0_i32_1 = arith.constant 0 : i32
    return %c0_i32, %arg0, %c0_i32_0 : i32, i32, i32
  }
  func.func @transform_1(%arg0: i32) -> (i32, i32) {
    %c0_i32 = arith.constant 0 : i32
    %c0_i32_0 = arith.constant 0 : i32
    %c0_i32_1 = arith.constant 0 : i32
    return %c0_i32, %c0_i32_0 : i32, i32
  }
  func.func @transform_2(%arg0: i32) -> (i32, i32) {
    %c0_i32 = arith.constant 0 : i32
    %c0_i32_0 = arith.constant 0 : i32
    %c0_i32_1 = arith.constant 0 : i32
    return %c0_i32, %c0_i32_0 : i32, i32
  }
  func.func @transform_3(%arg0: i32) -> (i32, i32) {
    %c0_i32 = arith.constant 0 : i32
    %c0_i32_0 = arith.constant 0 : i32
    %c0_i32_1 = arith.constant 0 : i32
    return %c0_i32, %c0_i32_0 : i32, i32
  }
  func.func @transform_4(%arg0: i32) -> (i32, i32) {
    %c0_i32 = arith.constant 0 : i32
    %c0_i32_0 = arith.constant 0 : i32
    %c0_i32_1 = arith.constant 0 : i32
    return %c0_i32, %c0_i32_0 : i32, i32
  }
  func.func @transform_5(%arg0: i32) -> (i32, i32) {
    %c0_i32 = arith.constant 0 : i32
    %c0_i32_0 = arith.constant 0 : i32
    %c0_i32_1 = arith.constant 0 : i32
    return %c0_i32, %c0_i32_0 : i32, i32
  }
  func.func @transform_6(%arg0: i32) -> (i32, i32) {
    %c0_i32 = arith.constant 0 : i32
    %c0_i32_0 = arith.constant 0 : i32
    %c0_i32_1 = arith.constant 0 : i32
    return %c0_i32, %c0_i32_0 : i32, i32
  }
  func.func @transform_7(%arg0: i32) -> (i32, i32) {
    %c0_i32 = arith.constant 0 : i32
    %c0_i32_0 = arith.constant 0 : i32
    %c0_i32_1 = arith.constant 0 : i32
    return %c0_i32, %c0_i32_0 : i32, i32
  }
  func.func @transform_8(%arg0: i32) -> (i32, i32) {
    %c0_i32 = arith.constant 0 : i32
    %c0_i32_0 = arith.constant 0 : i32
    %c0_i32_1 = arith.constant 0 : i32
    return %c0_i32, %c0_i32_0 : i32, i32
  }
  func.func @transform_9(%arg0: i32) -> (i32, i32) {
    %c0_i32 = arith.constant 0 : i32
    %c0_i32_0 = arith.constant 0 : i32
    %c0_i32_1 = arith.constant 0 : i32
    return %c0_i32, %c0_i32_0 : i32, i32
  }
  func.func @transform_10(%arg0: i32) -> (i32, i32) {
    %c0_i32 = arith.constant 0 : i32
    %c0_i32_0 = arith.constant 0 : i32
    %c0_i32_1 = arith.constant 0 : i32
    return %c0_i32, %c0_i32_0 : i32, i32
  }
  func.func @transform_11(%arg0: i32) -> (i32, i32) {
    %c0_i32 = arith.constant 0 : i32
    %c0_i32_0 = arith.constant 0 : i32
    %c0_i32_1 = arith.constant 0 : i32
    return %c0_i32, %c0_i32_0 : i32, i32
  }
  func.func @transform_12(%arg0: i32) -> (i32, i32) {
    %c0_i32 = arith.constant 0 : i32
    %c0_i32_0 = arith.constant 0 : i32
    %c0_i32_1 = arith.constant 0 : i32
    return %c0_i32, %c0_i32_0 : i32, i32
  }
  func.func @transform_13(%arg0: i32) -> (i32, i32) {
    %c0_i32 = arith.constant 0 : i32
    %c0_i32_0 = arith.constant 0 : i32
    return %arg0, %c0_i32 : i32, i32
  }
}

</mosaic_0001>

<bundles_post_ra>
// kernel: critic_forward.1
= control target key start
LH: loop header
LB: loop body
LE: loop exit
PB: predicated region body
PF: predicated region fallthrough
CT: control target
= control target key end

     0   :  { %v6638_v0 = vmov 0   ;;  %vm2968_vm0 = vcmask 261120   ;;  %s6640_s16 = smov 32   ;;  %s9786_s0 = inlined_call_operand.vmem [shape: f32[54,8,1], index: 0, kind: input, shape index: {}]   ;;  %s9787_s2 = inlined_call_operand.vmem [shape: f32[1,32], index: 2, kind: input, shape index: {}]   ;;  %s9788_s1 = inlined_call_operand.vmem [shape: f32[7,32], index: 1, kind: input, shape index: {}]   ;;  %s9789_s3 = inlined_call_operand.vmem [shape: f32[224,32], index: 3, kind: input, shape index: {}]   ;;  %s9790_s5 = inlined_call_operand.vmem [shape: f32[224,32], index: 5, kind: input, shape index: {}]   ;;  %s9791_s4 = inlined_call_operand.vmem [shape: f32[1,32], index: 4, kind: input, shape index: {}]   ;;  %s9792_s6 = inlined_call_operand.vmem [shape: f32[1,32], index: 6, kind: input, shape index: {}]   ;;  %s9793_s7 = inlined_call_operand.vmem [shape: f32[224,32], index: 7, kind: input, shape index: {}]   ;;  %s9794_s8 = inlined_call_operand.vmem [shape: f32[1,32], index: 8, kind: input, shape index: {}]   ;;  %s9795_s9 = inlined_call_operand.vmem [shape: f32[96,64], index: 9, kind: input, shape index: {}]   ;;  %s9796_s10 = inlined_call_operand.vmem [shape: f32[1,64], index: 10, kind: input, shape index: {}]   ;;  %s9797_s11 = inlined_call_operand.vmem [shape: f32[1,64], index: 11, kind: input, shape index: {}]   ;;  %s9798_s12 = inlined_call_operand.<no memory space> [shape: f32[1,1], index: 12, kind: input, shape index: {}]   ;;  %s9799_s13 = inlined_call_operand.vmem [shape: f32[8,1], index: 13, kind: output, shape index: {}]  }
   0x1   :  { %6628 = vset.pattern.permute.xlu2 %v6638_v0  ;;  %6627 = vset.pattern.permute.xlu1 %v6638_v0  ;;  %v6715_v1 = vld [vmem:[%s9786_s0 + $0x20] sm:$0xff]  ;;  %v6720_v2 = vld [vmem:[%s9786_s0 + $0x10] sm:$0xff]  ;;  %v6730_v4 = vld [vmem:[%s9786_s0 + $0x28] sm:$0xff] }
   0x2   :  { %v48_v3 = vld [vmem:[%s9786_s0] sm:$0xff]  ;;  %6626 = vset.pattern.permute.xlu0 %v6638_v0  ;;  %118 = vperm.xlu2 %6628, %v6715_v1   ;;  %v6735_v5 = vld [vmem:[%s9786_s0 + $0x18] sm:$0xff]  ;;  %v6740_v6 = vld [vmem:[%s9786_s0 + $0x8] sm:$0xff] }
   0x3   :  { %108 = vperm.xlu1 %6627, %v6720_v2   ;;  %98 = vperm.xlu0 %6626, %v48_v3   ;;  %v6748_v7 = vld [vmem:[%s9786_s0 + $0x40] sm:$0xff]  ;;  %v6753_v8 = vld [vmem:[%s9786_s0 + $0x38] sm:$0xff]  ;;  %v6758_v9 = vld [vmem:[%s9786_s0 + $0x30] sm:$0xff] }
   0x4   :  { %v6766_v10 = vld [vmem:[%s9786_s0 + $0x58] sm:$0xff]  ;;  %v6771_v11 = vld [vmem:[%s9786_s0 + $0x50] sm:$0xff]  ;;  %v6776_v12 = vld [vmem:[%s9786_s0 + $0x48] sm:$0xff] }
   0x5   :  { %v6784_v13 = vld [vmem:[%s9786_s0 + $0x70] sm:$0xff]  ;;  %v6789_v14 = vld [vmem:[%s9786_s0 + $0x68] sm:$0xff]  ;;  %v6794_v15 = vld [vmem:[%s9786_s0 + $0x60] sm:$0xff] }
   0x6   :  { %v6802_v16 = vld [vmem:[%s9786_s0 + $0x88] sm:$0xff]  ;;  %v6807_v17 = vld [vmem:[%s9786_s0 + $0x80] sm:$0xff]  ;;  %v6812_v18 = vld [vmem:[%s9786_s0 + $0x78] sm:$0xff] }
   0x7   :  { %v6820_v19 = vld [vmem:[%s9786_s0 + $0xa0] sm:$0xff]  ;;  %v6825_v20 = vld [vmem:[%s9786_s0 + $0x98] sm:$0xff]  ;;  %v6830_v21 = vld [vmem:[%s9786_s0 + $0x90] sm:$0xff] }
   0x8   :  { %v6838_v22 = vld [vmem:[%s9786_s0 + $0xb8] sm:$0xff]  ;;  %v6843_v23 = vld [vmem:[%s9786_s0 + $0xb0] sm:$0xff]  ;;  %v6848_v24 = vld [vmem:[%s9786_s0 + $0xa8] sm:$0xff] }
   0x9   :  { %v6856_v25 = vld [vmem:[%s9786_s0 + $0xd0] sm:$0xff]  ;;  %v6861_v26 = vld [vmem:[%s9786_s0 + $0xc8] sm:$0xff]  ;;  %v6866_v27 = vld [vmem:[%s9786_s0 + $0xc0] sm:$0xff] }
   0xa   :  { %123 = vperm.xlu2 %6628, %v6730_v4   ;;  %v6874_v28 = vld [vmem:[%s9786_s0 + $0xe8] sm:$0xff]  ;;  %v6879_v29 = vld [vmem:[%s9786_s0 + $0xe0] sm:$0xff]  ;;  %v6884_v30 = vld [vmem:[%s9786_s0 + $0xd8] sm:$0xff] }
   0xb   :  { %113 = vperm.xlu1 %6627, %v6735_v5   ;;  %103 = vperm.xlu0 %6626, %v6740_v6   ;;  %v6892_v31 = vld [vmem:[%s9786_s0 + $0x100] sm:$0xff]  ;;  %v6897_v32 = vld [vmem:[%s9786_s0 + $0xf8] sm:$0xff]  ;;  %v6902_v33 = vld [vmem:[%s9786_s0 + $0xf0] sm:$0xff] }
   0xc   :  { %v6910_v34 = vld [vmem:[%s9786_s0 + $0x118] sm:$0xff]  ;;  %v6915_v35 = vld [vmem:[%s9786_s0 + $0x110] sm:$0xff]  ;;  %v6920_v36 = vld [vmem:[%s9786_s0 + $0x108] sm:$0xff] }
   0xd   :  { %v6930_v38 = vld [vmem:[%s9786_s0 + $0x130] sm:$0xff]  ;;  %v6935_v39 = vld [vmem:[%s9786_s0 + $0x128] sm:$0xff]  ;;  %v6940_v40 = vld [vmem:[%s9786_s0 + $0x120] sm:$0xff] }
   0xe   :  { %v6950_v42 = vld [vmem:[%s9786_s0 + $0x148] sm:$0xff]  ;;  %v6955_v43 = vld [vmem:[%s9786_s0 + $0x140] sm:$0xff]  ;;  %v6960_v44 = vld [vmem:[%s9786_s0 + $0x138] sm:$0xff] }
   0xf   :  { %v6970_v46 = vld [vmem:[%s9786_s0 + $0x160] sm:$0xff]  ;;  %v6975_v47 = vld [vmem:[%s9786_s0 + $0x158] sm:$0xff]  ;;  %v6980_v48 = vld [vmem:[%s9786_s0 + $0x150] sm:$0xff] }
  0x10   :  { %v6994_v52 = vld [vmem:[%s9786_s0 + $0x178] sm:$0xff]  ;;  %v6999_v53 = vld [vmem:[%s9786_s0 + $0x170] sm:$0xff]  ;;  %v7004_v54 = vld [vmem:[%s9786_s0 + $0x168] sm:$0xff] }
  0x12   :  { %138 = vperm.xlu2 %6628, %v6748_v7  }
  0x13   :  { %133 = vperm.xlu1 %6627, %v6753_v8   ;;  %128 = vperm.xlu0 %6626, %v6758_v9  }
  0x1a   :  { %153 = vperm.xlu2 %6628, %v6766_v10  }
  0x1b   :  { %148 = vperm.xlu1 %6627, %v6771_v11   ;;  %143 = vperm.xlu0 %6626, %v6776_v12  }
  0x22   :  { %168 = vperm.xlu2 %6628, %v6784_v13  }
  0x23   :  { %163 = vperm.xlu1 %6627, %v6789_v14   ;;  %158 = vperm.xlu0 %6626, %v6794_v15  }
  0x2a   :  { %183 = vperm.xlu2 %6628, %v6802_v16  }
  0x2b   :  { %178 = vperm.xlu1 %6627, %v6807_v17   ;;  %173 = vperm.xlu0 %6626, %v6812_v18  }
  0x32   :  { %198 = vperm.xlu2 %6628, %v6820_v19  }
  0x33   :  { %193 = vperm.xlu1 %6627, %v6825_v20   ;;  %188 = vperm.xlu0 %6626, %v6830_v21  }
  0x3a   :  { %213 = vperm.xlu2 %6628, %v6838_v22  }
  0x3b   :  { %208 = vperm.xlu1 %6627, %v6843_v23   ;;  %203 = vperm.xlu0 %6626, %v6848_v24  }
  0x42   :  { %228 = vperm.xlu2 %6628, %v6856_v25  }
  0x43   :  { %223 = vperm.xlu1 %6627, %v6861_v26   ;;  %218 = vperm.xlu0 %6626, %v6866_v27  }
  0x4a   :  { %243 = vperm.xlu2 %6628, %v6874_v28  }
  0x4b   :  { %238 = vperm.xlu1 %6627, %v6879_v29   ;;  %233 = vperm.xlu0 %6626, %v6884_v30  }
  0x52   :  { %258 = vperm.xlu2 %6628, %v6892_v31  }
  0x53   :  { %253 = vperm.xlu1 %6627, %v6897_v32   ;;  %248 = vperm.xlu0 %6626, %v6902_v33  }
  0x5a   :  { %273 = vperm.xlu2 %6628, %v6910_v34  }
  0x5b   :  { %268 = vperm.xlu1 %6627, %v6915_v35   ;;  %263 = vperm.xlu0 %6626, %v6920_v36  }
  0x5c   :  { %v6925_v37 = vpop.permute.xlu2 %118 }
  0x62   :  { %288 = vperm.xlu2 %6628, %v6930_v38  }
  0x63   :  { %283 = vperm.xlu1 %6627, %v6935_v39   ;;  %278 = vperm.xlu0 %6626, %v6940_v40  }
  0x64   :  { %v6945_v41 = vpop.permute.xlu2 %123 }
  0x6a   :  { %303 = vperm.xlu2 %6628, %v6950_v42  }
  0x6b   :  { %298 = vperm.xlu1 %6627, %v6955_v43   ;;  %293 = vperm.xlu0 %6626, %v6960_v44  }
  0x6c   :  { %v6965_v45 = vpop.permute.xlu2 %138 }
  0x72   :  { %318 = vperm.xlu2 %6628, %v6970_v46  }
  0x73   :  { %313 = vperm.xlu1 %6627, %v6975_v47   ;;  %308 = vperm.xlu0 %6626, %v6980_v48  }
  0x74   :  { %v6985_v49 = vpop.permute.xlu2 %153 }
  0x75   :  { %9803 = vst [vmem:[#allocation5_spill] sm:$0xff] %v6985_v49  ;;  %v6987_v50 = vpop.permute.xlu1 %108  ;;  %v6989_v51 = vpop.permute.xlu0 %98 }
  0x7a   :  { %333 = vperm.xlu2 %6628, %v6994_v52  }
  0x7b   :  { %328 = vperm.xlu1 %6627, %v6999_v53   ;;  %323 = vperm.xlu0 %6626, %v7004_v54  }
  0x7c   :  { %v7009_v55 = vpop.permute.xlu2 %168 }
  0x7d   :  { %9804 = vst [vmem:[#allocation6_spill] sm:$0xff] %v7009_v55  ;;  %v7011_v56 = vpop.permute.xlu1 %113  ;;  %v7013_v57 = vpop.permute.xlu0 %103 }
  0x82   :  { %494 = vperm.xlu2 %6628, %v6735_v5  }
  0x83   :  { %489 = vperm.xlu1 %6627, %v6720_v2   ;;  %484 = vperm.xlu0 %6626, %v6740_v6  }
  0x84   :  { %v7018_v58 = vpop.permute.xlu2 %183 }
  0x85   :  { %9805 = vst [vmem:[#allocation7_spill] sm:$0xff] %v7018_v58  ;;  %v7020_v59 = vpop.permute.xlu1 %133  ;;  %v7022_v60 = vpop.permute.xlu0 %128 }
  0x8a   :  { %509 = vperm.xlu2 %6628, %v6758_v9  }
  0x8b   :  { %504 = vperm.xlu1 %6627, %v6730_v4   ;;  %499 = vperm.xlu0 %6626, %v6715_v1  }
  0x8c   :  { %v7027_v61 = vpop.permute.xlu2 %198 }
  0x8d   :  { %9806 = vst [vmem:[#allocation8_spill] sm:$0xff] %v7027_v61  ;;  %v7029_v62 = vpop.permute.xlu1 %148  ;;  %v7031_v63 = vpop.permute.xlu0 %143 }
  0x8e   :  { %9807 = vst [vmem:[#allocation9_spill] sm:$0xff] %v7029_v62 }
  0x8f   :  { %9808 = vst [vmem:[#allocation10_spill] sm:$0xff] %v7031_v63 }
  0x92   :  { %524 = vperm.xlu2 %6628, %v6776_v12  }
  0x93   :  { %519 = vperm.xlu1 %6627, %v6748_v7   ;;  %514 = vperm.xlu0 %6626, %v6753_v8  }
  0x94   :  { %v7036_v0 = vpop.permute.xlu2 %213 }
  0x95   :  { %9809 = vst [vmem:[#allocation11_spill] sm:$0xff] %v7036_v0  ;;  %v7038_v3 = vpop.permute.xlu1 %163  ;;  %v7040_v6 = vpop.permute.xlu0 %158 }
  0x96   :  { %9810 = vst [vmem:[#allocation12_spill] sm:$0xff] %v7038_v3 }
  0x97   :  { %9811 = vst [vmem:[#allocation13_spill] sm:$0xff] %v7040_v6 }
  0x9a   :  { %539 = vperm.xlu2 %6628, %v6794_v15  }
  0x9b   :  { %534 = vperm.xlu1 %6627, %v6766_v10   ;;  %529 = vperm.xlu0 %6626, %v6771_v11  }
  0x9c   :  { %v7045_v61 = vpop.permute.xlu2 %228 }
  0x9d   :  { %9812 = vst [vmem:[#allocation14_spill] sm:$0xff] %v7045_v61  ;;  %v7047_v58 = vpop.permute.xlu1 %178  ;;  %v7049_v55 = vpop.permute.xlu0 %173 }
  0x9e   :  { %9813 = vst [vmem:[#allocation15_spill] sm:$0xff] %v7047_v58 }
  0x9f   :  { %9814 = vst [vmem:[#allocation16_spill] sm:$0xff] %v7049_v55 }
  0xa2   :  { %554 = vperm.xlu2 %6628, %v6812_v18  }
  0xa3   :  { %549 = vperm.xlu1 %6627, %v6784_v13   ;;  %544 = vperm.xlu0 %6626, %v6789_v14  }
  0xa4   :  { %v7054_v0 = vpop.permute.xlu2 %243 }
  0xa5   :  { %9815 = vst [vmem:[#allocation17_spill] sm:$0xff] %v7054_v0  ;;  %v7056_v3 = vpop.permute.xlu1 %193  ;;  %v7058_v6 = vpop.permute.xlu0 %188 }
  0xa6   :  { %9816 = vst [vmem:[#allocation18_spill] sm:$0xff] %v7056_v3 }
  0xa7   :  { %9817 = vst [vmem:[#allocation19_spill] sm:$0xff] %v7058_v6 }
  0xaa   :  { %569 = vperm.xlu2 %6628, %v6830_v21  }
  0xab   :  { %564 = vperm.xlu1 %6627, %v6802_v16   ;;  %559 = vperm.xlu0 %6626, %v6807_v17  }
  0xac   :  { %v7063_v61 = vpop.permute.xlu2 %258 }
  0xad   :  { %9818 = vst [vmem:[#allocation20_spill] sm:$0xff] %v7063_v61  ;;  %v7065_v58 = vpop.permute.xlu1 %208  ;;  %v7067_v55 = vpop.permute.xlu0 %203 }
  0xae   :  { %9819 = vst [vmem:[#allocation21_spill] sm:$0xff] %v7065_v58 }
  0xaf   :  { %9820 = vst [vmem:[#allocation22_spill] sm:$0xff] %v7067_v55 }
  0xb2   :  { %584 = vperm.xlu2 %6628, %v6848_v24  }
  0xb3   :  { %579 = vperm.xlu1 %6627, %v6820_v19   ;;  %574 = vperm.xlu0 %6626, %v6825_v20  }
  0xb4   :  { %v7072_v0 = vpop.permute.xlu2 %273 }
  0xb5   :  { %9821 = vst [vmem:[#allocation23_spill] sm:$0xff] %v7072_v0  ;;  %v7074_v3 = vpop.permute.xlu1 %223  ;;  %v7076_v6 = vpop.permute.xlu0 %218 }
  0xb6   :  { %9822 = vst [vmem:[#allocation24_spill] sm:$0xff] %v7074_v3 }
  0xb7   :  { %9823 = vst [vmem:[#allocation25_spill] sm:$0xff] %v7076_v6 }
  0xba   :  { %599 = vperm.xlu2 %6628, %v6866_v27  }
  0xbb   :  { %594 = vperm.xlu1 %6627, %v6838_v22   ;;  %589 = vperm.xlu0 %6626, %v6843_v23  }
  0xbc   :  { %v7081_v61 = vpop.permute.xlu2 %288 }
  0xbd   :  { %v7083_v58 = vpop.permute.xlu1 %238  ;;  %v7085_v55 = vpop.permute.xlu0 %233 }
  0xbe   :  { %9824 = vst [vmem:[#allocation26_spill] sm:$0xff] %v7083_v58 }
  0xbf   :  { %9825 = vst [vmem:[#allocation27_spill] sm:$0xff] %v7085_v55 }
  0xc2   :  { %614 = vperm.xlu2 %6628, %v6884_v30  }
  0xc3   :  { %609 = vperm.xlu1 %6627, %v6856_v25   ;;  %604 = vperm.xlu0 %6626, %v6861_v26  }
  0xc4   :  { %v7090_v0 = vpop.permute.xlu2 %303 }
  0xc5   :  { %9826 = vst [vmem:[#allocation28_spill] sm:$0xff] %v7090_v0  ;;  %v7092_v6 = vpop.permute.xlu1 %253  ;;  %v7094_v3 = vpop.permute.xlu0 %248 }
  0xc6   :  { %9827 = vst [vmem:[#allocation29_spill] sm:$0xff] %v7092_v6 }
  0xc7   :  { %9828 = vst [vmem:[#allocation30_spill] sm:$0xff] %v7094_v3 }
  0xca   :  { %629 = vperm.xlu2 %6628, %v6902_v33  }
  0xcb   :  { %624 = vperm.xlu1 %6627, %v6874_v28   ;;  %619 = vperm.xlu0 %6626, %v6879_v29  }
  0xcc   :  { %v7099_v58 = vpop.permute.xlu2 %318 }
  0xcd   :  { %9829 = vst [vmem:[#allocation31_spill] sm:$0xff] %v7099_v58  ;;  %v7101_v55 = vpop.permute.xlu1 %268  ;;  %v7103_v30 = vpop.permute.xlu0 %263 }
  0xce   :  { %9830 = vst [vmem:[#allocation32_spill] sm:$0xff] %v7101_v55 }
  0xcf   :  { %9831 = vst [vmem:[#allocation33_spill] sm:$0xff] %v7103_v30 }
  0xd2   :  { %644 = vperm.xlu2 %6628, %v6920_v36  }
  0xd3   :  { %639 = vperm.xlu1 %6627, %v6892_v31   ;;  %634 = vperm.xlu0 %6626, %v6897_v32  }
  0xd4   :  { %v7108_v25 = vpop.permute.xlu2 %333 }
  0xd5   :  { %9832 = vst [vmem:[#allocation34_spill] sm:$0xff] %v7108_v25  ;;  %v7110_v0 = vpop.permute.xlu1 %283  ;;  %v7112_v33 = vpop.permute.xlu0 %278 }
  0xda   :  { %659 = vperm.xlu2 %6628, %v6940_v40  }
  0xdb   :  { %654 = vperm.xlu1 %6627, %v6910_v34   ;;  %649 = vperm.xlu0 %6626, %v6915_v35  }
  0xdc   :  { %v7117_v28 = vpop.permute.xlu2 %494 }
  0xdd   :  { %v7119_v29 = vpop.permute.xlu1 %298  ;;  %v7121_v36 = vpop.permute.xlu0 %293 }
  0xde   :  { %9833 = vst [vmem:[#allocation35_spill] sm:$0xff] %v7119_v29 }
  0xe2   :  { %674 = vperm.xlu2 %6628, %v6960_v44  }
  0xe3   :  { %669 = vperm.xlu1 %6627, %v6930_v38   ;;  %664 = vperm.xlu0 %6626, %v6935_v39  }
  0xe4   :  { %v7126_v31 = vpop.permute.xlu2 %509 }
  0xe5   :  { %v7128_v32 = vpop.permute.xlu1 %313  ;;  %v7130_v40 = vpop.permute.xlu0 %308 }
  0xe6   :  { %9834 = vst [vmem:[#allocation36_spill] sm:$0xff] %v7128_v32  ;;  %v6078_v32 = vld [vmem:[%s9786_s0 + $0x180] sm:$0xff] }
  0xe7   :  { %9835 = vst [vmem:[#allocation37_spill] sm:$0xff] %v7130_v40 }
  0xea   :  { %689 = vperm.xlu2 %6628, %v6980_v48  }
  0xeb   :  { %684 = vperm.xlu1 %6627, %v6950_v42   ;;  %679 = vperm.xlu0 %6626, %v6955_v43  }
  0xec   :  { %v7135_v34 = vpop.permute.xlu2 %524 }
  0xed   :  { %v7137_v35 = vpop.permute.xlu1 %328  ;;  %v7139_v25 = vpop.permute.xlu0 %323 }
  0xee   :  { %9836 = vst [vmem:[#allocation38_spill] sm:$0xff] %v7137_v35 }
  0xef   :  { %9837 = vst [vmem:[#allocation39_spill] sm:$0xff] %v7139_v25 }
  0xf2   :  { %704 = vperm.xlu2 %6628, %v7004_v54  }
  0xf3   :  { %699 = vperm.xlu1 %6627, %v6970_v46   ;;  %694 = vperm.xlu0 %6626, %v6975_v47  }
  0xf4   :  { %v7144_v39 = vpop.permute.xlu2 %539 }
  0xf5   :  { %9838 = vst [vmem:[#allocation40_spill] sm:$0xff] %v7144_v39  ;;  %v7146_v58 = vpop.permute.xlu1 %489  ;;  %v7148_v40 = vpop.permute.xlu0 %484 }
  0xfa   :  { %719 = vperm.xlu2 %6628, %v6078_v32  }
  0xfb   :  { %714 = vperm.xlu1 %6627, %v6994_v52   ;;  %709 = vperm.xlu0 %6626, %v6999_v53  }
  0xfc   :  { %v7155_v35 = vpop.permute.xlu2 %554 }
  0xfd   :  { %9839 = vst [vmem:[#allocation41_spill] sm:$0xff] %v7155_v35  ;;  %v7157_v25 = vpop.permute.xlu1 %504  ;;  %v7159_v29 = vpop.permute.xlu0 %499 }
 0x102   :  { %880 = vperm.xlu2 %6628, %v6715_v1  }
 0x103   :  { %875 = vperm.xlu1 %6627, %v6735_v5   ;;  %870 = vperm.xlu0 %6626, %v6720_v2  }
 0x104   :  { %v7164_v55 = vpop.permute.xlu2 %569 }
 0x105   :  { %9840 = vst [vmem:[#allocation42_spill] sm:$0xff] %v7164_v55  ;;  %v7166_v30 = vpop.permute.xlu1 %519  ;;  %v7168_v32 = vpop.permute.xlu0 %514  ;;  %v46_v55 = vld [vmem:[%s9788_s1] sm:$0x7f] }
 0x106   :  { %v7402_v49 = vperm.slane %v46_v55, 4 }
 0x10a   :  { %895 = vperm.xlu2 %6628, %v6753_v8  }
 0x10b   :  { %890 = vperm.xlu1 %6627, %v6758_v9   ;;  %885 = vperm.xlu0 %6626, %v6730_v4  }
 0x10c   :  { %v7173_v52 = vpop.permute.xlu2 %584 }
 0x10d   :  { %9841 = vst [vmem:[#allocation43_spill] sm:$0xff] %v7173_v52  ;;  %v7175_v53 = vpop.permute.xlu1 %534  ;;  %v7177_v1 = vpop.permute.xlu0 %529 }
 0x10e   :  { %9842 = vst [vmem:[#allocation44_spill] sm:$0xff] %v7175_v53  ;;  %v7407_v53 = vperm.slane %v46_v55, 5 }
 0x10f   :  { %9843 = vst [vmem:[#allocation45_spill] sm:$0xff] %v7177_v1 }
 0x112   :  { %910 = vperm.xlu2 %6628, %v6771_v11  }
 0x113   :  { %905 = vperm.xlu1 %6627, %v6776_v12   ;;  %900 = vperm.xlu0 %6626, %v6748_v7  }
 0x114   :  { %v7182_v2 = vpop.permute.xlu2 %599 }
 0x115   :  { %9844 = vst [vmem:[#allocation46_spill] sm:$0xff] %v7182_v2  ;;  %v7184_v5 = vpop.permute.xlu1 %549  ;;  %v7186_v8 = vpop.permute.xlu0 %544 }
 0x116   :  { %9845 = vst [vmem:[#allocation47_spill] sm:$0xff] %v7184_v5 }
 0x117   :  { %9846 = vst [vmem:[#allocation48_spill] sm:$0xff] %v7186_v8 }
 0x11a   :  { %925 = vperm.xlu2 %6628, %v6789_v14  }
 0x11b   :  { %920 = vperm.xlu1 %6627, %v6794_v15   ;;  %915 = vperm.xlu0 %6626, %v6766_v10  }
 0x11c   :  { %v7191_v4 = vpop.permute.xlu2 %614 }
 0x11d   :  { %9847 = vst [vmem:[#allocation49_spill] sm:$0xff] %v7191_v4  ;;  %v7193_v9 = vpop.permute.xlu1 %564  ;;  %v7195_v11 = vpop.permute.xlu0 %559 }
 0x11e   :  { %9848 = vst [vmem:[#allocation50_spill] sm:$0xff] %v7193_v9 }
 0x11f   :  { %9849 = vst [vmem:[#allocation51_spill] sm:$0xff] %v7195_v11  ;;  %v7377_v11 = vperm.slane %v46_v55, 2 }
 0x122   :  { %940 = vperm.xlu2 %6628, %v6807_v17  }
 0x123   :  { %935 = vperm.xlu1 %6627, %v6812_v18   ;;  %930 = vperm.xlu0 %6626, %v6784_v13  }
 0x124   :  { %v7200_v7 = vpop.permute.xlu2 %629 }
 0x125   :  { %9850 = vst [vmem:[#allocation52_spill] sm:$0xff] %v7200_v7  ;;  %v7202_v12 = vpop.permute.xlu1 %579  ;;  %v7204_v14 = vpop.permute.xlu0 %574 }
 0x126   :  { %9851 = vst [vmem:[#allocation53_spill] sm:$0xff] %v7202_v12 }
 0x127   :  { %9852 = vst [vmem:[#allocation54_spill] sm:$0xff] %v7204_v14  ;;  %v6228_v14 = vld [vmem:[%s9786_s0 + $0x50] sm:$0xff] }
 0x12a   :  { %955 = vperm.xlu2 %6628, %v6825_v20  }
 0x12b   :  { %950 = vperm.xlu1 %6627, %v6830_v21   ;;  %945 = vperm.xlu0 %6626, %v6802_v16  }
 0x12c   :  { %v7209_v10 = vpop.permute.xlu2 %644 }
 0x12d   :  { %9853 = vst [vmem:[#allocation55_spill] sm:$0xff] %v7209_v10  ;;  %v7211_v15 = vpop.permute.xlu1 %594  ;;  %v7213_v17 = vpop.permute.xlu0 %589 }
 0x12e   :  { %9854 = vst [vmem:[#allocation56_spill] sm:$0xff] %v7211_v15  ;;  %v6273_v15 = vld [vmem:[%s9786_s0 + $0x40] sm:$0xff] }
 0x12f   :  { %9855 = vst [vmem:[#allocation57_spill] sm:$0xff] %v7213_v17 }
 0x132   :  { %970 = vperm.xlu2 %6628, %v6843_v23  }
 0x133   :  { %965 = vperm.xlu1 %6627, %v6848_v24   ;;  %960 = vperm.xlu0 %6626, %v6820_v19  }
 0x134   :  { %v7218_v13 = vpop.permute.xlu2 %659 }
 0x135   :  { %9856 = vst [vmem:[#allocation58_spill] sm:$0xff] %v7218_v13  ;;  %v7220_v18 = vpop.permute.xlu1 %609  ;;  %v7222_v20 = vpop.permute.xlu0 %604 }
 0x136   :  { %9857 = vst [vmem:[#allocation59_spill] sm:$0xff] %v7220_v18 }
 0x137   :  { %9858 = vst [vmem:[#allocation60_spill] sm:$0xff] %v7222_v20 }
 0x13a   :  { %985 = vperm.xlu2 %6628, %v6861_v26  }
 0x13b   :  { %980 = vperm.xlu1 %6627, %v6866_v27   ;;  %975 = vperm.xlu0 %6626, %v6838_v22  }
 0x13c   :  { %v7227_v16 = vpop.permute.xlu2 %674 }
 0x13d   :  { %v7229_v21 = vpop.permute.xlu1 %624  ;;  %v7231_v23 = vpop.permute.xlu0 %619 }
 0x13e   :  { %9859 = vst [vmem:[#allocation61_spill] sm:$0xff] %v7229_v21 }
 0x13f   :  { %9860 = vst [vmem:[#allocation62_spill] sm:$0xff] %v7231_v23 }
 0x142   :  { %1436 = vperm.xlu2 %6628, %v6960_v44  }
 0x143   :  { %1055 = vperm.xlu1 %6627, %v6960_v44   ;;  %1050 = vperm.xlu0 %6626, %v6930_v38  }
 0x144   :  { %v7236_v19 = vpop.permute.xlu2 %689 }
 0x145   :  { %9861 = vst [vmem:[#allocation63_spill] sm:$0xff] %v7236_v19  ;;  %v7238_v24 = vpop.permute.xlu1 %639  ;;  %v7240_v26 = vpop.permute.xlu0 %634 }
 0x146   :  { %9862 = vst [vmem:[#allocation64_spill] sm:$0xff] %v7238_v24 }
 0x147   :  { %9863 = vst [vmem:[#allocation65_spill] sm:$0xff] %v7240_v26 }
 0x14a   :  { %1827 = vperm.xlu2 %6628, %v6950_v42  }
 0x14b   :  { %1822 = vperm.xlu1 %6627, %v6955_v43   ;;  %1441 = vperm.xlu0 %6626, %v6955_v43  }
 0x14c   :  { %v7245_v22 = vpop.permute.xlu2 %704 }
 0x14d   :  { %9864 = vst [vmem:[#allocation66_spill] sm:$0xff] %v7245_v22  ;;  %v7247_v27 = vpop.permute.xlu1 %654  ;;  %v7249_v13 = vpop.permute.xlu0 %649 }
 0x14e   :  { %9865 = vst [vmem:[#allocation67_spill] sm:$0xff] %v7247_v27 }
 0x14f   :  { %9866 = vst [vmem:[#allocation68_spill] sm:$0xff] %v7249_v13 }
 0x152   :  { %1060 = vperm.xlu2 %6628, %v6955_v43  }
 0x153   :  { %2213 = vperm.xlu1 %6627, %v6980_v48   ;;  %2208 = vperm.xlu0 %6626, %v6950_v42  }
 0x154   :  { %v7254_v38 = vpop.permute.xlu2 %719 }
 0x155   :  { %9867 = vst [vmem:[#allocation69_spill] sm:$0xff] %v7254_v38  ;;  %v7256_v44 = vpop.permute.xlu1 %669  ;;  %v7258_v19 = vpop.permute.xlu0 %664 }
 0x15a   :  { %2599 = vperm.xlu2 %6628, %v6975_v47  }
 0x15b   :  { %2594 = vperm.xlu1 %6627, %v6980_v48   ;;  %1065 = vperm.xlu0 %6626, %v6950_v42  }
 0x15c   :  { %v7263_v22 = vpop.permute.xlu2 %880 }
 0x15d   :  { %v7265_v27 = vpop.permute.xlu1 %684  ;;  %v7267_v43 = vpop.permute.xlu0 %679 }
 0x15e   :  { %9868 = vst [vmem:[#allocation70_spill] sm:$0xff] %v7265_v27 }
 0x162   :  { %1832 = vperm.xlu2 %6628, %v6980_v48  }
 0x163   :  { %1451 = vperm.xlu1 %6627, %v6980_v48   ;;  %1446 = vperm.xlu0 %6626, %v6950_v42   ;;  %v6127_v42 = vld [vmem:[%s9786_s0 + $0x18] sm:$0xff] }
 0x164   :  { %v7272_v38 = vpop.permute.xlu2 %895 }
 0x165   :  { %v7274_v10 = vpop.permute.xlu1 %699  ;;  %v7276_v13 = vpop.permute.xlu0 %694 }
 0x166   :  { %9869 = vst [vmem:[#allocation71_spill] sm:$0xff] %v7274_v10  ;;  %v6271_v10 = vld [vmem:[%s9786_s0 + $0x30] sm:$0xff] }
 0x167   :  { %9870 = vst [vmem:[#allocation72_spill] sm:$0xff] %v7276_v13 }
 0x16a   :  { %2223 = vperm.xlu2 %6628, %v6970_v46  }
 0x16b   :  { %2218 = vperm.xlu1 %6627, %v6975_v47   ;;  %1837 = vperm.xlu0 %6626, %v6975_v47  }
 0x16c   :  { %v7281_v27 = vpop.permute.xlu2 %910 }
 0x16d   :  { %9871 = vst [vmem:[#allocation73_spill] sm:$0xff] %v7281_v27  ;;  %v7283_v3 = vpop.permute.xlu1 %714  ;;  %v7285_v6 = vpop.permute.xlu0 %709 }
 0x16e   :  { %9872 = vst [vmem:[#allocation74_spill] sm:$0xff] %v7283_v3  ;;  %v6176_v3 = vld [vmem:[%s9786_s0 + $0x28] sm:$0xff] }
 0x16f   :  { %9873 = vst [vmem:[#allocation75_spill] sm:$0xff] %v7285_v6  ;;  %v6175_v6 = vld [vmem:[%s9786_s0 + $0x20] sm:$0xff] }
 0x172   :  { %1256 = vperm.xlu2 %6628, %v6127_v42  }
 0x173   :  { %2609 = vperm.xlu1 %6627, %v7004_v54   ;;  %2604 = vperm.xlu0 %6626, %v6970_v46  }
 0x174   :  { %v7292_v48 = vpop.permute.xlu2 %925 }
 0x175   :  { %9874 = vst [vmem:[#allocation76_spill] sm:$0xff] %v7292_v48  ;;  %v7294_v13 = vpop.permute.xlu1 %875  ;;  %v7296_v47 = vpop.permute.xlu0 %870 }
 0x17a   :  { %1647 = vperm.xlu2 %6628, %v6176_v3  }
 0x17b   :  { %1642 = vperm.xlu1 %6627, %v6175_v6   ;;  %1261 = vperm.xlu0 %6626, %v6175_v6   ;;  %v6272_v6 = vld [vmem:[%s9786_s0 + $0x38] sm:$0xff] }
 0x17c   :  { %v7304_v54 = vpop.permute.xlu2 %940 }
 0x17d   :  { %9875 = vst [vmem:[#allocation77_spill] sm:$0xff] %v7304_v54  ;;  %v7306_v46 = vpop.permute.xlu1 %890  ;;  %v7308_v42 = vpop.permute.xlu0 %885  ;;  %v3056_v54 = vld [vmem:[%s9789_s3 + $0x30] sm:$0xff] }
 0x182   :  { %2414 = vperm.xlu2 %6628, %v6271_v10  }
 0x183   :  { %2033 = vperm.xlu1 %6627, %v6271_v10   ;;  %2028 = vperm.xlu0 %6626, %v6176_v3  }
 0x184   :  { %v7313_v26 = vpop.permute.xlu2 %955 }
 0x185   :  { %9876 = vst [vmem:[#allocation78_spill] sm:$0xff] %v7313_v26  ;;  %v7315_v24 = vpop.permute.xlu1 %905  ;;  %v7317_v7 = vpop.permute.xlu0 %900 }
 0x18a   :  { %1271 = vperm.xlu2 %6628, %v6271_v10  }
 0x18b   :  { %1266 = vperm.xlu1 %6627, %v6176_v3   ;;  %2419 = vperm.xlu0 %6626, %v6272_v6   ;;  %v6274_v3 = vld [vmem:[%s9786_s0 + $0x48] sm:$0xff] }
 0x18c   :  { %v7322_v21 = vpop.permute.xlu2 %970 }
 0x18d   :  { %9877 = vst [vmem:[#allocation79_spill] sm:$0xff] %v7322_v21  ;;  %v7324_v4 = vpop.permute.xlu1 %920  ;;  %v7326_v23 = vpop.permute.xlu0 %915 }
 0x18e   :  { %9878 = vst [vmem:[#allocation80_spill] sm:$0xff] %v7324_v4 }
 0x18f   :  { %9879 = vst [vmem:[#allocation81_spill] sm:$0xff] %v7326_v23 }
 0x192   :  { %2038 = vperm.xlu2 %6628, %v6272_v6  }
 0x193   :  { %1657 = vperm.xlu1 %6627, %v6272_v6   ;;  %1652 = vperm.xlu0 %6626, %v6271_v10  }
 0x194   :  { %v7328_v20 = vpop.permute.xlu2 %985 }
 0x195   :  { %9880 = vst [vmem:[#allocation82_spill] sm:$0xff] %v7328_v20  ;;  %v7330_v18 = vpop.permute.xlu1 %935  ;;  %v7332_v2 = vpop.permute.xlu0 %930 }
 0x196   :  { %9881 = vst [vmem:[#allocation83_spill] sm:$0xff] %v7330_v18  ;;  %v7385_v18 = vperm.slane %v46_v55, 3 }
 0x197   :  { %9882 = vst [vmem:[#allocation84_spill] sm:$0xff] %v7332_v2 }
 0x19a   :  { %2429 = vperm.xlu2 %6628, %v6274_v3  }
 0x19b   :  { %2424 = vperm.xlu1 %6627, %v6273_v15   ;;  %2043 = vperm.xlu0 %6626, %v6273_v15  }
 0x19c   :  { %v7340_v17 = vpop.permute.xlu2 %1436 }
 0x19d   :  { %v7342_v10 = vpop.permute.xlu1 %950  ;;  %v7344_v20 = vpop.permute.xlu0 %945 }
 0x19e   :  { %9883 = vst [vmem:[#allocation85_spill] sm:$0xff] %v7342_v10 }
 0x19f   :  { %9884 = vst [vmem:[#allocation86_spill] sm:$0xff] %v7344_v20  ;;  %v7368_v20 = vperm.slane %v46_v55, 1 }
 0x1a1   :  { %v759_v62 = vmul.f32 %v7368_v20, %v7258_v19 }
 0x1a2   :  { %1662 = vperm.xlu2 %6628, %v6273_v15  }
 0x1a3   :  { %1281 = vperm.xlu1 %6627, %v6273_v15   ;;  %1276 = vperm.xlu0 %6626, %v6272_v6   ;;  %v7362_v15 = vld [vmem:[%s9786_s0 + $0x58] sm:$0xff] }
 0x1a4   :  { %v1828_v21 = vpop.permute.xlu2 %1827 }
 0x1a5   :  { %v7346_v52 = vpop.permute.xlu1 %965  ;;  %v7348_v12 = vpop.permute.xlu0 %960 }
 0x1a6   :  { %9885 = vst [vmem:[#allocation87_spill] sm:$0xff] %v7346_v52 }
 0x1a7   :  { %9886 = vst [vmem:[#allocation88_spill] sm:$0xff] %v7348_v12 }
 0x1aa   :  { %2053 = vperm.xlu2 %6628, %v6228_v14  }
 0x1ab   :  { %2048 = vperm.xlu1 %6627, %v6274_v3   ;;  %1667 = vperm.xlu0 %6626, %v6274_v3  }
 0x1ac   :  { %v7353_v26 = vpop.permute.xlu2 %1060 }
 0x1ad   :  { %v7355_v10 = vpop.permute.xlu1 %980  ;;  %v7357_v9 = vpop.permute.xlu0 %975 }
 0x1ae   :  { %9887 = vst [vmem:[#allocation89_spill] sm:$0xff] %v7355_v10  ;;  %v3057_v10 = vld [vmem:[%s9789_s3 + $0x38] sm:$0xff] }
 0x1af   :  { %9888 = vst [vmem:[#allocation90_spill] sm:$0xff] %v7357_v9  ;;  %v7373_v9 = vperm.slane %v46_v55, 0  ;;  %6614 = vmatpush.msra.mxu2 %v3057_v10  ;;  %3142 = vmatpush.msra.mxu0 %v3057_v10 }
 0x1b0   :  { %6615 = vmatpush.msra.mxu3 %v3057_v10 }
 0x1b1   :  { %v374_v35 = vmul.f32 %v7373_v9, %v7110_v0  ;;  %6616 = vmatpush.msra.mxu2 %v3056_v54  ;;  %3143 = vmatpush.msra.mxu0 %v3056_v54  ;;  %v6277_v0 = vld [vmem:[%s9786_s0 + $0x60] sm:$0xff] }
 0x1b2   :  { %1286 = vperm.xlu2 %6628, %v6274_v3   ;;  %v760_v3 = vmul.f32 %v7368_v20, %v7256_v44  ;;  %6617 = vmatpush.msra.mxu3 %v3056_v54  ;;  %v1918_v54 = vmul.f32 %v7402_v49, %v1828_v21 }
 0x1b3   :  { %2439 = vperm.xlu1 %6627, %v7362_v15   ;;  %2434 = vperm.xlu0 %6626, %v6228_v14  }
 0x1b4   :  { %v2600_v6 = vpop.permute.xlu2 %2599  ;;  %v808_v4 = vadd.f32 %v760_v3, %v374_v35  ;;  %v373_v35 = vmul.f32 %v7373_v9, %v7112_v33 }
 0x1b5   :  { %v1056_v52 = vpop.permute.xlu1 %1055  ;;  %v1051_v12 = vpop.permute.xlu0 %1050 }
 0x1b6   :  { %v1146_v5 = vmul.f32 %v7377_v11, %v1056_v52  ;;  %v3054_v52 = vld [vmem:[%s9789_s3 + $0x20] sm:$0xff]  ;;  %v807_v19 = vadd.f32 %v759_v62, %v373_v35 }
 0x1b8   :  { %v1194_v10 = vadd.f32 %v1146_v5, %v808_v4  ;;  %v7411_v5 = vperm.slane %v46_v55, 6  ;;  %v7423_v55 = vld [vmem:[%s9786_s0 + $0x68] sm:$0xff] }
 0x1ba   :  { %1677 = vperm.xlu2 %6628, %v7362_v15   ;;  %v2690_v23 = vmul.f32 %v7411_v5, %v2600_v6 }
 0x1bb   :  { %1672 = vperm.xlu1 %6627, %v6228_v14   ;;  %1291 = vperm.xlu0 %6626, %v6228_v14   ;;  %v3055_v14 = vld [vmem:[%s9789_s3 + $0x28] sm:$0xff] }
 0x1bc   :  { %v7388_v2 = vpop.permute.xlu2 %1832  ;;  %6618 = vmatpush.msra.mxu2 %v3055_v14  ;;  %3144 = vmatpush.msra.mxu0 %v3055_v14 }
 0x1bd   :  { %v1823_v44 = vpop.permute.xlu1 %1822  ;;  %v1442_v8 = vpop.permute.xlu0 %1441  ;;  %6619 = vmatpush.msra.mxu3 %v3055_v14 }
 0x1be   :  { %v1532_v48 = vmul.f32 %v7385_v18, %v1442_v8  ;;  %6620 = vmatpush.msra.mxu2 %v3054_v52  ;;  %v1145_v8 = vmul.f32 %v7377_v11, %v1051_v12  ;;  %3145 = vmatpush.msra.mxu0 %v3054_v52  ;;  %v1917_v62 = vmul.f32 %v7402_v49, %v1823_v44 }
 0x1bf   :  { %6621 = vmatpush.msra.mxu3 %v3054_v52  ;;  %v7428_v52 = vld [vmem:[%s9787_s2] ss:$0 sm:$0xff] }
 0x1c0   :  { %v1580_v3 = vadd.f32 %v1532_v48, %v1194_v10  ;;  %v1193_v39 = vadd.f32 %v1145_v8, %v807_v19  ;;  %v1531_v10 = vmul.f32 %v7385_v18, %v7340_v17 }
 0x1c2   :  { %2444 = vperm.xlu2 %6628, %v6277_v0   ;;  %v1966_v12 = vadd.f32 %v1918_v54, %v1580_v3  ;;  %v1579_v21 = vadd.f32 %v1531_v10, %v1193_v39  ;;  %v3027_v10 = vld [vmem:[%s9789_s3 + $0x10] sm:$0xff] }
 0x1c3   :  { %2063 = vperm.xlu1 %6627, %v6277_v0   ;;  %2058 = vperm.xlu0 %6626, %v7362_v15  }
 0x1c4   :  { %v7413_v4 = vpop.permute.xlu2 %2223  ;;  %v1965_v17 = vadd.f32 %v1917_v62, %v1579_v21 }
 0x1c5   :  { %v2214_v14 = vpop.permute.xlu1 %2213  ;;  %v2209_v33 = vpop.permute.xlu0 %2208 }
 0x1c6   :  { %v2304_v48 = vmul.f32 %v7407_v53, %v2214_v14  ;;  %v2303_v3 = vmul.f32 %v7407_v53, %v2209_v33  ;;  %v9800_v33 = vmov 0.0  }
 0x1c7   :  { %2969 = vst.msk [vmem:[#allocation2] sm:$0xff] %vm2968_vm0, %v9800_v33 }
 0x1c8   :  { %v2352_v35 = vadd.f32 %v2304_v48, %v1966_v12  ;;  %v2351_v54 = vadd.f32 %v2303_v3, %v1965_v17  ;;  %2970 = vst.msk [vmem:[#allocation2 + $0x8] sm:$0xff] %vm2968_vm0, %v9800_v33 }
 0x1c9   :  { %2971 = vst.msk [vmem:[#allocation2 + $0x10] sm:$0xff] %vm2968_vm0, %v9800_v33 }
 0x1ca   :  { %v2738_v8 = vadd.f32 %v2690_v23, %v2352_v35  ;;  %1301 = vperm.xlu2 %6628, %v6277_v0   ;;  %v3028_v23 = vld [vmem:[%s9789_s3 + $0x18] sm:$0xff]  ;;  %2973 = vst.msk [vmem:[#allocation2 + $0xd8] sm:$0xff] %vm2968_vm0, %v9800_v33 }
 0x1cb   :  { %1296 = vperm.xlu1 %6627, %v7362_v15   ;;  %2449 = vperm.xlu0 %6626, %v7423_v55   ;;  %2974 = vst.msk [vmem:[#allocation2 + $0xe0] sm:$0xff] %vm2968_vm0, %v9800_v33 }
 0x1cc   :  { %v7433_v6 = vpop.permute.xlu2 %1256  ;;  %v2789_v39 = vadd.f32 %v7428_v52, %v2738_v8  ;;  %3303 = vmatpush.msra.mxu1 %v3028_v23  ;;  %2975 = vst.msk [vmem:[#allocation2 + $0xe8] sm:$0xff] %vm2968_vm0, %v9800_v33  ;;  %v6279_v23 = vld [vmem:[%s9786_s0 + $0x70] sm:$0xff] }
 0x1cd   :  { %v2595_v44 = vpop.permute.xlu1 %2594  ;;  %v1066_v19 = vpop.permute.xlu0 %1065 }
 0x1ce   :  { %v2689_v14 = vmul.f32 %v7411_v5, %v2595_v44  ;;  %v2885_v15 = vmul.f32 0.2, %v2789_v39  ;;  %vm2837_vm1 = vcmp.ge.f32.partialorder %v2789_v39, 0.0  ;;  %3304 = vmatpush.msra.mxu1 %v3027_v10  ;;  %v376_v10 = vmul.f32 %v7373_v9, %v7121_v36 }
 0x1cf   :  { %v3030_v1 = vld [vmem:[#allocation2 + $0x8] sm:$0xff] }
 0x1d0   :  { %v2737_v12 = vadd.f32 %v2689_v14, %v2351_v54  ;;  %v2933_v17 = vsel %vm2837_vm1, %v2789_v39, %v2885_v15  ;;  %v7466_v54 = vld [vmem:[%s9786_s0 + $0x78] sm:$0xff]  ;;  %v3025_v14 = vld [vmem:[%s9789_s3] sm:$0xff]  ;;  %v762_v39 = vmul.f32 %v7368_v20, %v7267_v43  ;;  %v1148_v43 = vmul.f32 %v7377_v11, %v1066_v19  ;;  %6319 = vmatmul.msk.f32.vlgmr.msra.gmra.mxu0 %vm2968_vm0, %v3030_v1 }
 0x1d1   :  { %v3001_v15 = vld [vmem:[#allocation2] sm:$0xff] }
 0x1d2   :  { %v2788_v48 = vadd.f32 %v7428_v52, %v2737_v12  ;;  %2068 = vperm.xlu2 %6628, %v7423_v55   ;;  %v761_v12 = vmul.f32 %v7368_v20, %v7227_v16  ;;  %v1147_v16 = vmul.f32 %v7377_v11, %v7353_v26 }
 0x1d3   :  { %1687 = vperm.xlu1 %6627, %v7423_v55   ;;  %1682 = vperm.xlu0 %6626, %v6277_v0   ;;  %v3026_v0 = vld [vmem:[%s9789_s3 + $0x8] sm:$0xff] }
 0x1d4   :  { %vm2836_vm2 = vcmp.ge.f32.partialorder %v2788_v48, 0.0  ;;  %v2884_v62 = vmul.f32 0.2, %v2788_v48  ;;  %v7452_v35 = vpop.permute.xlu2 %1647  ;;  %3305 = vmatpush.msra.mxu1 %v3026_v0  ;;  %v810_v0 = vadd.f32 %v762_v39, %v376_v10  ;;  %v2306_v10 = vmul.f32 %v7407_v53, %v7413_v4  ;;  %v6234_v4 = vld [vmem:[%s9786_s0 + $0x80] sm:$0xff] }
 0x1d5   :  { %v1452_v21 = vpop.permute.xlu1 %1451  ;;  %v1447_v8 = vpop.permute.xlu0 %1446 }
 0x1d6   :  { %v2932_v3 = vsel %vm2836_vm2, %v2788_v48, %v2884_v62  ;;  %3306 = vmatpush.msra.mxu1 %v3025_v14  ;;  %v375_v48 = vmul.f32 %v7373_v9, %v7081_v61 }
 0x1d7   :  { %v2962_v44 = vmax.f32 %v2932_v3, %v2933_v17  ;;  %6343 = vmatmul.msk.f32.vlgmr.msra.gmra.mxu1 %vm2968_vm0, %v3001_v15  ;;  %v1534_v3 = vmul.f32 %v7385_v18, %v1452_v21  ;;  %v1533_v17 = vmul.f32 %v7385_v18, %v1447_v8  ;;  %v1196_v15 = vadd.f32 %v1148_v43, %v810_v0  ;;  %v3408_v21 = vld [vmem:[%s9789_s3 + $0x58] sm:$0xff] }
 0x1d8   :  { %v809_v62 = vadd.f32 %v761_v12, %v375_v48  ;;  %v9889_v8 = vmov 0.0   ;;  %v1919_v12 = vmul.f32 %v7402_v49, %v7388_v2  ;;  %3493 = vmatpush.msrb.mxu2 %v3408_v21 }
 0x1d9   :  { %2995 = vst.msk [vmem:[#allocation2 + $0xa8] sm:$0xff] %vm2968_vm0, %v2962_v44  ;;  %v1582_v33 = vadd.f32 %v1534_v3, %v1196_v15  ;;  %v3405_v3 = vld [vmem:[%s9789_s3 + $0x40] sm:$0xff] }
 0x1da   :  { %2459 = vperm.xlu2 %6628, %v7466_v54   ;;  %v1195_v36 = vadd.f32 %v1147_v16, %v809_v62 }
 0x1db   :  { %2454 = vperm.xlu1 %6627, %v6279_v23   ;;  %2073 = vperm.xlu0 %6626, %v6279_v23  }
 0x1dc   :  { %v7490_v44 = vpop.permute.xlu2 %2414  ;;  %v1581_v19 = vadd.f32 %v1533_v17, %v1195_v36 }
 0x1dd   :  { %v2219_v61 = vpop.permute.xlu1 %2218  ;;  %v1838_v14 = vpop.permute.xlu0 %1837 }
 0x1de   :  { %v1920_v26 = vmul.f32 %v7402_v49, %v1838_v14  ;;  %v2305_v39 = vmul.f32 %v7407_v53, %v2219_v61  ;;  %v1967_v16 = vadd.f32 %v1919_v12, %v1581_v19  ;;  %v7525_v14 = vld [vmem:[#allocation2 + $0x10] sm:$0xff] }
 0x1df   :  { %6344 = vmatmul.msk.f32.gmra.mxu1 %vm2968_vm0, %v3030_v1  ;;  %v3406_v1 = vld [vmem:[%s9789_s3 + $0x48] sm:$0xff]  ;;  %6320 = vmatmul.msk.f32.gmra.mxu0 %vm2968_vm0, %v7525_v14 }
 0x1e0   :  { %v3050_v63 = vld [vmem:[#allocation2 + $0xa8] sm:$0xff]  ;;  %v1968_v48 = vadd.f32 %v1920_v26, %v1582_v33  ;;  %v2353_v33 = vadd.f32 %v2305_v39, %v1967_v16  ;;  %v723_v26 = vmul.f32 %v7368_v20, %v7148_v40  ;;  %v1109_v40 = vmul.f32 %v7377_v11, %v7296_v47 }
 0x1e1   :  { %v7493_v27 = vld [vmem:[#allocation2 + $0xa8] sm:$0xff]  ;;  %6339 = vmatmul.msk.f32.vlgmr.msra.gmra.mxu2 %vm2968_vm0, %v3050_v63  ;;  %v3407_v63 = vld [vmem:[%s9789_s3 + $0x50] sm:$0xff]  ;;  %v1110_v47 = vmul.f32 %v7377_v11, %v7294_v13 }
 0x1e2   :  { %4568 = vst.msk [vmem:[#allocation2 + $0xa8] sm:$0xff] %vm2968_vm0, %v9889_v8  ;;  %1692 = vperm.xlu2 %6628, %v6279_v23   ;;  %3494 = vmatpush.msrb.mxu2 %v3407_v63  ;;  %v337_v63 = vmul.f32 %v7373_v9, %v6989_v51  ;;  %v338_v51 = vmul.f32 %v7373_v9, %v7013_v57 }
 0x1e3   :  { %1311 = vperm.xlu1 %6627, %v6279_v23   ;;  %1306 = vperm.xlu0 %6626, %v7423_v55   ;;  %v2354_v23 = vadd.f32 %v2306_v10, %v1968_v48 }
 0x1e4   :  { %v7512_v43 = vpop.permute.xlu2 %1271  ;;  %3495 = vmatpush.msrb.mxu2 %v3406_v1  ;;  %v771_v1 = vadd.f32 %v723_v26, %v337_v63  ;;  %v2653_v26 = vmul.f32 %v7411_v5, %v7490_v44 }
 0x1e5   :  { %v2610_v2 = vpop.permute.xlu1 %2609  ;;  %v2605_v62 = vpop.permute.xlu0 %2604 }
 0x1e6   :  { %v2692_v55 = vmul.f32 %v7411_v5, %v2610_v2  ;;  %v2691_v0 = vmul.f32 %v7411_v5, %v2605_v62  ;;  %3496 = vmatpush.msrb.mxu2 %v3405_v3  ;;  %v724_v62 = vmul.f32 %v7368_v20, %v7146_v58 }
 0x1e7   :  { %6345 = vmatmul.msk.f32.gmra.mxu1 %vm2968_vm0, %v7525_v14 }
 0x1e8   :  { %v2740_v17 = vadd.f32 %v2692_v55, %v2354_v23  ;;  %v2739_v61 = vadd.f32 %v2691_v0, %v2353_v33  ;;  %v1495_v33 = vmul.f32 %v7385_v18, %v7433_v6  ;;  %v7550_v23 = vld [vmem:[%s9786_s0 + $0x88] sm:$0xff]  ;;  %v1157_v55 = vadd.f32 %v1109_v40, %v771_v1 }
 0x1e9   :  { %v772_v6 = vadd.f32 %v724_v62, %v338_v51  ;;  %v6283_v51 = vld [vmem:[%s9786_s0 + $0x90] sm:$0xff] }
 0x1ea   :  { %v2791_v36 = vadd.f32 %v7428_v52, %v2740_v17  ;;  %v2790_v15 = vadd.f32 %v7428_v52, %v2739_v61  ;;  %2083 = vperm.xlu2 %6628, %v6234_v4   ;;  %v1543_v0 = vadd.f32 %v1495_v33, %v1157_v55  ;;  %v1111_v55 = vmul.f32 %v7377_v11, %v7263_v22 }
 0x1eb   :  { %2078 = vperm.xlu1 %6627, %v7466_v54   ;;  %1697 = vperm.xlu0 %6626, %v7466_v54   ;;  %v1158_v57 = vadd.f32 %v1110_v47, %v772_v6 }
 0x1ec   :  { %vm2839_vm3 = vcmp.ge.f32.partialorder %v2791_v36, 0.0  ;;  %v2887_v19 = vmul.f32 0.2, %v2791_v36  ;;  %vm2838_vm4 = vcmp.ge.f32.partialorder %v2790_v15, 0.0  ;;  %v2886_v21 = vmul.f32 0.2, %v2790_v15  ;;  %v7535_v12 = vpop.permute.xlu2 %2038 }
 0x1ed   :  { %v1643_v39 = vpop.permute.xlu1 %1642  ;;  %v1262_v48 = vpop.permute.xlu0 %1261 }
 0x1ee   :  { %v2935_v10 = vsel %vm2839_vm3, %v2791_v36, %v2887_v19  ;;  %v2934_v16 = vsel %vm2838_vm4, %v2790_v15, %v2886_v21  ;;  %v1881_v58 = vmul.f32 %v7402_v49, %v1643_v39  ;;  %v1496_v3 = vmul.f32 %v7385_v18, %v1262_v48 }
 0x1ef   :  { %v2963_v2 = vmax.f32 %v2934_v16, %v2935_v10  ;;  %v1882_v48 = vmul.f32 %v7402_v49, %v7452_v35  ;;  %v725_v35 = vmul.f32 %v7368_v20, %v7117_v28  ;;  %v726_v28 = vmul.f32 %v7368_v20, %v7159_v29 }
 0x1f0   :  { %v1929_v15 = vadd.f32 %v1881_v58, %v1543_v0  ;;  %v1544_v19 = vadd.f32 %v1496_v3, %v1158_v57 }
 0x1f1   :  { %2996 = vst.msk [vmem:[#allocation2 + $0xb0] sm:$0xff] %vm2968_vm0, %v2963_v2 }
 0x1f2   :  { %1316 = vperm.xlu2 %6628, %v7466_v54   ;;  %v1930_v44 = vadd.f32 %v1882_v48, %v1544_v19 }
 0x1f3   :  { %2469 = vperm.xlu1 %6627, %v7550_v23   ;;  %2464 = vperm.xlu0 %6626, %v6234_v4  }
 0x1f4   :  { %v7561_v17 = vpop.permute.xlu2 %2429 }
 0x1f5   :  { %v2034_v61 = vpop.permute.xlu1 %2033  ;;  %v2029_v36 = vpop.permute.xlu0 %2028 }
 0x1f6   :  { %v2267_v13 = vmul.f32 %v7407_v53, %v2029_v36  ;;  %v2268_v63 = vmul.f32 %v7407_v53, %v2034_v61 }
 0x1f8   :  { %v2315_v54 = vadd.f32 %v2267_v13, %v1929_v15  ;;  %v3051_v21 = vld [vmem:[#allocation2 + $0xb0] sm:$0xff]  ;;  %v2316_v62 = vadd.f32 %v2268_v63, %v1930_v44  ;;  %v1112_v15 = vmul.f32 %v7377_v11, %v7308_v42 }
 0x1f9   :  { %v7566_v39 = vld [vmem:[#allocation2 + $0xb0] sm:$0xff]  ;;  %6340 = vmatmul.msk.f32.gmra.mxu2 %vm2968_vm0, %v3051_v21  ;;  %v1498_v21 = vmul.f32 %v7385_v18, %v7512_v43  ;;  %v2269_v43 = vmul.f32 %v7407_v53, %v7535_v12 }
 0x1fa   :  { %4569 = vst.msk [vmem:[#allocation2 + $0xb0] sm:$0xff] %vm2968_vm0, %v9889_v8  ;;  %v2701_v40 = vadd.f32 %v2653_v26, %v2315_v54  ;;  %1707 = vperm.xlu2 %6628, %v7550_v23  }
 0x1fb   :  { %1702 = vperm.xlu1 %6627, %v6234_v4   ;;  %1321 = vperm.xlu0 %6626, %v6234_v4   ;;  %v339_v4 = vmul.f32 %v7373_v9, %v6987_v50 }
 0x1fc   :  { %v7575_v10 = vpop.permute.xlu2 %1662  ;;  %v2752_v1 = vadd.f32 %v7428_v52, %v2701_v40 }
 0x1fd   :  { %v1267_v16 = vpop.permute.xlu1 %1266  ;;  %v2420_v2 = vpop.permute.xlu0 %2419  ;;  %v773_v0 = vadd.f32 %v725_v35, %v339_v4  ;;  %v2656_v4 = vmul.f32 %v7411_v5, %v7561_v17 }
 0x1fe   :  { %v2654_v33 = vmul.f32 %v7411_v5, %v2420_v2  ;;  %v2848_v58 = vmul.f32 0.2, %v2752_v1  ;;  %vm2800_vm5 = vcmp.ge.f32.partialorder %v2752_v1, 0.0  ;;  %v1497_v50 = vmul.f32 %v7385_v18, %v1267_v16 }
 0x1ff   :  { %v1159_v61 = vadd.f32 %v1111_v55, %v773_v0 }
 0x200   :  { %v2702_v47 = vadd.f32 %v2654_v33, %v2316_v62  ;;  %v2896_v13 = vsel %vm2800_vm5, %v2752_v1, %v2848_v58 }
 0x201   :  { %6367 = vmatmul.msk.f32.vlgmr.msrb.gmra.mxu2 %vm2968_vm0, %v7525_v14  ;;  %v340_v14 = vmul.f32 %v7373_v9, %v7011_v56  ;;  %v1545_v48 = vadd.f32 %v1497_v50, %v1159_v61  ;;  %v7607_v56 = vld [vmem:[%s9786_s0 + $0x98] sm:$0xff]  ;;  %v7633_v61 = vld [vmem:[%s9786_s0 + $0xa8] sm:$0xff] }
 0x202   :  { %v2753_v6 = vadd.f32 %v7428_v52, %v2702_v47  ;;  %2474 = vperm.xlu2 %6628, %v6283_v51  }
 0x203   :  { %2093 = vperm.xlu1 %6627, %v6283_v51   ;;  %2088 = vperm.xlu0 %6626, %v7550_v23   ;;  %v774_v54 = vadd.f32 %v726_v28, %v340_v14 }
 0x204   :  { %vm2801_vm6 = vcmp.ge.f32.partialorder %v2753_v6, 0.0  ;;  %v2849_v3 = vmul.f32 0.2, %v2753_v6  ;;  %v7595_v22 = vpop.permute.xlu2 %2053 }
 0x205   :  { %v1658_v36 = vpop.permute.xlu1 %1657  ;;  %v1653_v57 = vpop.permute.xlu0 %1652  ;;  %v1160_v63 = vadd.f32 %v1112_v15, %v774_v54  ;;  %v1114_v54 = vmul.f32 %v7377_v11, %v7272_v38 }
 0x206   :  { %v2897_v26 = vsel %vm2801_vm6, %v2753_v6, %v2849_v3  ;;  %v1883_v19 = vmul.f32 %v7402_v49, %v1653_v57  ;;  %v1884_v42 = vmul.f32 %v7402_v49, %v1658_v36  ;;  %v728_v36 = vmul.f32 %v7368_v20, %v7126_v31 }
 0x207   :  { %v2944_v29 = vmax.f32 %v2896_v13, %v2897_v26  ;;  %v1546_v44 = vadd.f32 %v1498_v21, %v1160_v63  ;;  %v6285_v13 = vld [vmem:[%s9786_s0 + $0xa0] sm:$0xff]  ;;  %v1113_v31 = vmul.f32 %v7377_v11, %v7306_v46 }
 0x208   :  { %v1931_v40 = vadd.f32 %v1883_v19, %v1545_v48  ;;  %v341_v19 = vmul.f32 %v7373_v9, %v6925_v37 }
 0x209   :  { %2977 = vst.msk [vmem:[#allocation2 + $0x18] sm:$0xff] %vm2968_vm0, %v2944_v29  ;;  %v1932_v1 = vadd.f32 %v1884_v42, %v1546_v44  ;;  %v342_v29 = vmul.f32 %v7373_v9, %v6945_v41 }
 0x20a   :  { %1331 = vperm.xlu2 %6628, %v6283_v51   ;;  %v2317_v33 = vadd.f32 %v2269_v43, %v1931_v40 }
 0x20b   :  { %1326 = vperm.xlu1 %6627, %v7550_v23   ;;  %2479 = vperm.xlu0 %6626, %v7607_v56  }
 0x20c   :  { %v7615_v16 = vpop.permute.xlu2 %1286 }
 0x20d   :  { %v2425_v2 = vpop.permute.xlu1 %2424  ;;  %v2044_v62 = vpop.permute.xlu0 %2043 }
 0x20e   :  { %v2655_v35 = vmul.f32 %v7411_v5, %v2425_v2  ;;  %v2270_v47 = vmul.f32 %v7407_v53, %v2044_v62  ;;  %v1885_v2 = vmul.f32 %v7402_v49, %v7575_v10 }
 0x210   :  { %v2703_v23 = vadd.f32 %v2655_v35, %v2317_v33  ;;  %v2318_v55 = vadd.f32 %v2270_v47, %v1932_v1  ;;  %v3032_v58 = vld [vmem:[#allocation2 + $0x18] sm:$0xff]  ;;  %v2272_v35 = vmul.f32 %v7407_v53, %v7595_v22  ;;  %v6240_v22 = vld [vmem:[%s9786_s0 + $0xb0] sm:$0xff] }
 0x211   :  { %6321 = vmatmul.msk.f32.gmra.mxu0 %vm2968_vm0, %v3032_v58  ;;  %6346 = vmatmul.msk.f32.gmra.mxu1 %vm2968_vm0, %v3032_v58 }
 0x212   :  { %v2754_v12 = vadd.f32 %v7428_v52, %v2703_v23  ;;  %v2704_v6 = vadd.f32 %v2656_v4, %v2318_v55  ;;  %6368 = vmatmul.msk.f32.gmra.mxu2 %vm2968_vm0, %v3032_v58  ;;  %2098 = vperm.xlu2 %6628, %v7607_v56  }
 0x213   :  { %1717 = vperm.xlu1 %6627, %v7607_v56   ;;  %1712 = vperm.xlu0 %6626, %v6283_v51   ;;  %v727_v51 = vmul.f32 %v7368_v20, %v7157_v25  ;;  %v776_v25 = vadd.f32 %v728_v36, %v342_v29 }
 0x214   :  { %v2850_v0 = vmul.f32 0.2, %v2754_v12  ;;  %v2755_v17 = vadd.f32 %v7428_v52, %v2704_v6  ;;  %v7628_v28 = vpop.permute.xlu2 %1677  ;;  %vm2802_vm7 = vcmp.ge.f32.partialorder %v2754_v12, 0.0 }
 0x215   :  { %v1282_v50 = vpop.permute.xlu1 %1281  ;;  %v1277_v3 = vpop.permute.xlu0 %1276  ;;  %v775_v21 = vadd.f32 %v727_v51, %v341_v19  ;;  %v1162_v38 = vadd.f32 %v1114_v54, %v776_v25  ;;  %v730_v54 = vmul.f32 %v7368_v20, %v7166_v30  ;;  %v1501_v25 = vmul.f32 %v7385_v18, %v7615_v16 }
 0x216   :  { %vm2803_vm8 = vcmp.ge.f32.partialorder %v2755_v17, 0.0  ;;  %v2851_v14 = vmul.f32 0.2, %v2755_v17  ;;  %v2898_v57 = vsel %vm2802_vm7, %v2754_v12, %v2850_v0  ;;  %v1500_v48 = vmul.f32 %v7385_v18, %v1282_v50 }
 0x217   :  { %v1499_v37 = vmul.f32 %v7385_v18, %v1277_v3  ;;  %v1161_v40 = vadd.f32 %v1113_v31, %v775_v21  ;;  %v729_v3 = vmul.f32 %v7368_v20, %v7168_v32  ;;  %v7692_v21 = vld [vmem:[%s9786_s0 + $0xb8] sm:$0xff] }
 0x218   :  { %v2899_v15 = vsel %vm2803_vm8, %v2755_v17, %v2851_v14  ;;  %v1548_v44 = vadd.f32 %v1500_v48, %v1162_v38 }
 0x219   :  { %v2945_v26 = vmax.f32 %v2898_v57, %v2899_v15  ;;  %v1547_v43 = vadd.f32 %v1499_v37, %v1161_v40 }
 0x21a   :  { %2489 = vperm.xlu2 %6628, %v7633_v61  }
 0x21b   :  { %2978 = vst.msk [vmem:[#allocation2 + $0x20] sm:$0xff] %vm2968_vm0, %v2945_v26  ;;  %2484 = vperm.xlu1 %6627, %v6285_v13   ;;  %2103 = vperm.xlu0 %6626, %v6285_v13   ;;  %v1933_v47 = vadd.f32 %v1885_v2, %v1547_v43  ;;  %v1115_v26 = vmul.f32 %v7377_v11, %v7317_v7 }
 0x21c   :  { %v7654_v63 = vpop.permute.xlu2 %2444  ;;  %v1116_v7 = vmul.f32 %v7377_v11, %v7315_v24 }
 0x21d   :  { %v2049_v41 = vpop.permute.xlu1 %2048  ;;  %v1668_v42 = vpop.permute.xlu0 %1667 }
 0x21e   :  { %v1886_v46 = vmul.f32 %v7402_v49, %v1668_v42  ;;  %v2271_v62 = vmul.f32 %v7407_v53, %v2049_v41 }
 0x220   :  { %v1934_v1 = vadd.f32 %v1886_v46, %v1548_v44  ;;  %v2319_v55 = vadd.f32 %v2271_v62, %v1933_v47  ;;  %v2659_v44 = vmul.f32 %v7411_v5, %v7654_v63  ;;  %v1888_v62 = vmul.f32 %v7402_v49, %v7628_v28 }
 0x221   :  { %v731_v28 = vmul.f32 %v7368_v20, %v7135_v34  ;;  %v9891_v34 = vld [vmem:[#allocation45_spill] sm:$0xff] }
 0x222   :  { %1722 = vperm.xlu2 %6628, %v6285_v13   ;;  %v3033_v33 = vld [vmem:[#allocation2 + $0x20] sm:$0xff]  ;;  %v2320_v58 = vadd.f32 %v2272_v35, %v1934_v1 }
 0x223   :  { %1341 = vperm.xlu1 %6627, %v6285_v13   ;;  %1336 = vperm.xlu0 %6626, %v7607_v56   ;;  %v343_v13 = vmul.f32 %v7373_v9, %v7022_v60  ;;  %v344_v60 = vmul.f32 %v7373_v9, %v7020_v59 }
 0x224   :  { %6322 = vmatmul.msk.f32.gmra.mxu0 %vm2968_vm0, %v3033_v33  ;;  %6347 = vmatmul.msk.f32.gmra.mxu1 %vm2968_vm0, %v3033_v33  ;;  %v7665_v4 = vpop.permute.xlu2 %1301 }
 0x225   :  { %6369 = vmatmul.msk.f32.gmra.mxu2 %vm2968_vm0, %v3033_v33  ;;  %v2440_v10 = vpop.permute.xlu1 %2439  ;;  %v2435_v23 = vpop.permute.xlu0 %2434  ;;  %v777_v31 = vadd.f32 %v729_v3, %v343_v13  ;;  %v778_v16 = vadd.f32 %v730_v54, %v344_v60 }
 0x226   :  { %v2658_v12 = vmul.f32 %v7411_v5, %v2440_v10  ;;  %v2657_v56 = vmul.f32 %v7411_v5, %v2435_v23 }
 0x227   :  { %v1163_v48 = vadd.f32 %v1115_v26, %v777_v31  ;;  %v1164_v59 = vadd.f32 %v1116_v7, %v778_v16 }
 0x228   :  { %v2706_v6 = vadd.f32 %v2658_v12, %v2320_v58  ;;  %v2705_v0 = vadd.f32 %v2657_v56, %v2319_v55  ;;  %v6289_v12 = vld [vmem:[%s9786_s0 + $0xc0] sm:$0xff] }
 0x229   :  { %v1549_v37 = vadd.f32 %v1501_v25, %v1163_v48 }
 0x22a   :  { %v2757_v17 = vadd.f32 %v7428_v52, %v2706_v6  ;;  %v2756_v50 = vadd.f32 %v7428_v52, %v2705_v0  ;;  %2113 = vperm.xlu2 %6628, %v6240_v22   ;;  %v9890_v6 = vld [vmem:[#allocation73_spill] sm:$0xff] }
 0x22b   :  { %2108 = vperm.xlu1 %6627, %v7633_v61   ;;  %1727 = vperm.xlu0 %6626, %v7633_v61   ;;  %v1117_v0 = vmul.f32 %v7377_v11, %v9890_v6 }
 0x22c   :  { %vm2805_vm9 = vcmp.ge.f32.partialorder %v2757_v17, 0.0  ;;  %v2853_v14 = vmul.f32 0.2, %v2757_v17  ;;  %vm2804_vm10 = vcmp.ge.f32.partialorder %v2756_v50, 0.0  ;;  %v2852_v36 = vmul.f32 0.2, %v2756_v50  ;;  %v7679_v51 = vpop.permute.xlu2 %2068 }
 0x22d   :  { %v1673_v57 = vpop.permute.xlu1 %1672  ;;  %v1292_v15 = vpop.permute.xlu0 %1291 }
 0x22e   :  { %v2901_v19 = vsel %vm2805_vm9, %v2757_v17, %v2853_v14  ;;  %v2900_v32 = vsel %vm2804_vm10, %v2756_v50, %v2852_v36  ;;  %v1887_v30 = vmul.f32 %v7402_v49, %v1673_v57  ;;  %v1502_v41 = vmul.f32 %v7385_v18, %v1292_v15  ;;  %v9892_v15 = vld [vmem:[#allocation10_spill] sm:$0xff] }
 0x22f   :  { %v2946_v29 = vmax.f32 %v2900_v32, %v2901_v19  ;;  %v732_v14 = vmul.f32 %v7368_v20, %v9891_v34  ;;  %v346_v13 = vmul.f32 %v7373_v9, %v9892_v15 }
 0x230   :  { %v1935_v46 = vadd.f32 %v1887_v30, %v1549_v37  ;;  %v1550_v43 = vadd.f32 %v1502_v41, %v1164_v59  ;;  %v1504_v30 = vmul.f32 %v7385_v18, %v7665_v4  ;;  %v7745_v37 = vld [vmem:[%s9786_s0 + $0xc8] sm:$0xff]  ;;  %v2275_v4 = vmul.f32 %v7407_v53, %v7679_v51 }
 0x231   :  { %2979 = vst.msk [vmem:[#allocation2 + $0x28] sm:$0xff] %vm2968_vm0, %v2946_v29  ;;  %v9893_v29 = vld [vmem:[#allocation81_spill] sm:$0xff]  ;;  %v780_v48 = vadd.f32 %v732_v14, %v346_v13  ;;  %v9898_v13 = vld [vmem:[#allocation76_spill] sm:$0xff] }
 0x232   :  { %1346 = vperm.xlu2 %6628, %v7633_v61   ;;  %v1936_v63 = vadd.f32 %v1888_v62, %v1550_v43  ;;  %v1118_v54 = vmul.f32 %v7377_v11, %v9893_v29  ;;  %v9896_v14 = vld [vmem:[#allocation5_spill] sm:$0xff] }
 0x233   :  { %2499 = vperm.xlu1 %6627, %v7692_v21   ;;  %2494 = vperm.xlu0 %6626, %v6240_v22  }
 0x234   :  { %v7703_v42 = vpop.permute.xlu2 %2459  ;;  %v1166_v41 = vadd.f32 %v1118_v54, %v780_v48 }
 0x235   :  { %v2064_v38 = vpop.permute.xlu1 %2063  ;;  %v2059_v40 = vpop.permute.xlu0 %2058 }
 0x236   :  { %v2273_v24 = vmul.f32 %v7407_v53, %v2059_v40  ;;  %v2274_v1 = vmul.f32 %v7407_v53, %v2064_v38  ;;  %v1552_v59 = vadd.f32 %v1504_v30, %v1166_v41 }
 0x238   :  { %v2321_v61 = vadd.f32 %v2273_v24, %v1935_v46  ;;  %v3034_v2 = vld [vmem:[#allocation2 + $0x28] sm:$0xff]  ;;  %v2322_v23 = vadd.f32 %v2274_v1, %v1936_v63  ;;  %v2662_v1 = vmul.f32 %v7411_v5, %v7703_v42 }
 0x239   :  { %6323 = vmatmul.msk.f32.gmra.mxu0 %vm2968_vm0, %v3034_v2  ;;  %6348 = vmatmul.msk.f32.gmra.mxu1 %vm2968_vm0, %v3034_v2 }
 0x23a   :  { %v2707_v33 = vadd.f32 %v2659_v44, %v2321_v61  ;;  %6370 = vmatmul.msk.f32.gmra.mxu2 %vm2968_vm0, %v3034_v2  ;;  %1737 = vperm.xlu2 %6628, %v7692_v21  }
 0x23b   :  { %1732 = vperm.xlu1 %6627, %v6240_v22   ;;  %1351 = vperm.xlu0 %6626, %v6240_v22   ;;  %v345_v22 = vmul.f32 %v7373_v9, %v6965_v45 }
 0x23c   :  { %v7715_v35 = vpop.permute.xlu2 %1692  ;;  %v2758_v55 = vadd.f32 %v7428_v52, %v2707_v33 }
 0x23d   :  { %v1297_v47 = vpop.permute.xlu1 %1296  ;;  %v2450_v10 = vpop.permute.xlu0 %2449  ;;  %v779_v3 = vadd.f32 %v731_v28, %v345_v22  ;;  %v9894_v22 = vld [vmem:[#allocation40_spill] sm:$0xff] }
 0x23e   :  { %v2660_v58 = vmul.f32 %v7411_v5, %v2450_v10  ;;  %v2854_v17 = vmul.f32 0.2, %v2758_v55  ;;  %vm2806_vm11 = vcmp.ge.f32.partialorder %v2758_v55, 0.0  ;;  %v1503_v36 = vmul.f32 %v7385_v18, %v1297_v47 }
 0x23f   :  { %v1165_v26 = vadd.f32 %v1117_v0, %v779_v3  ;;  %v734_v6 = vmul.f32 %v7368_v20, %v9894_v22  ;;  %v9895_v0 = vld [vmem:[#allocation44_spill] sm:$0xff] }
 0x240   :  { %v2708_v56 = vadd.f32 %v2660_v58, %v2322_v23  ;;  %v2902_v31 = vsel %vm2806_vm11, %v2758_v55, %v2854_v17  ;;  %v7780_v3 = vld [vmem:[%s9786_s0 + $0xd0] sm:$0xff] }
 0x241   :  { %v1551_v16 = vadd.f32 %v1503_v36, %v1165_v26  ;;  %v348_v36 = vmul.f32 %v7373_v9, %v9896_v14  ;;  %v1120_v26 = vmul.f32 %v7377_v11, %v9898_v13 }
 0x242   :  { %v2759_v50 = vadd.f32 %v7428_v52, %v2708_v56  ;;  %2504 = vperm.xlu2 %6628, %v6289_v12   ;;  %v7771_v56 = vld [vmem:[%s9786_s0 + $0xd8] sm:$0xff] }
 0x243   :  { %2123 = vperm.xlu1 %6627, %v6289_v12   ;;  %2118 = vperm.xlu0 %6626, %v7692_v21   ;;  %v782_v29 = vadd.f32 %v734_v6, %v348_v36 }
 0x244   :  { %vm2807_vm12 = vcmp.ge.f32.partialorder %v2759_v50, 0.0  ;;  %v2855_v57 = vmul.f32 0.2, %v2759_v50  ;;  %v7733_v45 = vpop.permute.xlu2 %2083 }
 0x245   :  { %v1688_v19 = vpop.permute.xlu1 %1687  ;;  %v1683_v32 = vpop.permute.xlu0 %1682  ;;  %v1168_v30 = vadd.f32 %v1120_v26, %v782_v29  ;;  %v9905_v29 = vld [vmem:[#allocation83_spill] sm:$0xff] }
 0x246   :  { %v2903_v25 = vsel %vm2807_vm12, %v2759_v50, %v2855_v57  ;;  %v1889_v60 = vmul.f32 %v7402_v49, %v1683_v32  ;;  %v1890_v38 = vmul.f32 %v7402_v49, %v1688_v19  ;;  %v9897_v57 = vld [vmem:[#allocation9_spill] sm:$0xff]  ;;  %v9899_v19 = vld [vmem:[#allocation80_spill] sm:$0xff] }
 0x247   :  { %v2947_v7 = vmax.f32 %v2902_v31, %v2903_v25  ;;  %v347_v15 = vmul.f32 %v7373_v9, %v9897_v57  ;;  %v1119_v32 = vmul.f32 %v7377_v11, %v9899_v19  ;;  %v9903_v57 = vld [vmem:[#allocation47_spill] sm:$0xff]  ;;  %v9904_v19 = vld [vmem:[#allocation12_spill] sm:$0xff] }
 0x248   :  { %v1937_v40 = vadd.f32 %v1889_v60, %v1551_v16  ;;  %v1938_v43 = vadd.f32 %v1890_v38, %v1552_v59  ;;  %v1891_v59 = vmul.f32 %v7402_v49, %v7715_v35 }
 0x249   :  { %2980 = vst.msk [vmem:[#allocation2 + $0x30] sm:$0xff] %vm2968_vm0, %v2947_v7 }
 0x24a   :  { %1361 = vperm.xlu2 %6628, %v6289_v12   ;;  %v2323_v61 = vadd.f32 %v2275_v4, %v1937_v40 }
 0x24b   :  { %1356 = vperm.xlu1 %6627, %v7692_v21   ;;  %2509 = vperm.xlu0 %6626, %v7745_v37  }
 0x24c   :  { %v7753_v46 = vpop.permute.xlu2 %1316 }
 0x24d   :  { %v2455_v24 = vpop.permute.xlu1 %2454  ;;  %v2074_v44 = vpop.permute.xlu0 %2073  ;;  %v1507_v26 = vmul.f32 %v7385_v18, %v7753_v46 }
 0x24e   :  { %v2661_v2 = vmul.f32 %v7411_v5, %v2455_v24  ;;  %v2276_v62 = vmul.f32 %v7407_v53, %v2074_v44 }
 0x250   :  { %v2709_v21 = vadd.f32 %v2661_v2, %v2323_v61  ;;  %v2324_v33 = vadd.f32 %v2276_v62, %v1938_v43  ;;  %v3035_v63 = vld [vmem:[#allocation2 + $0x30] sm:$0xff]  ;;  %v2278_v43 = vmul.f32 %v7407_v53, %v7733_v45  ;;  %v7817_v45 = vld [vmem:[%s9786_s0 + $0xe0] sm:$0xff] }
 0x251   :  { %6324 = vmatmul.msk.f32.gmra.mxu0 %vm2968_vm0, %v3035_v63  ;;  %6349 = vmatmul.msk.f32.gmra.mxu1 %vm2968_vm0, %v3035_v63 }
 0x252   :  { %v2760_v51 = vadd.f32 %v7428_v52, %v2709_v21  ;;  %v2710_v47 = vadd.f32 %v2662_v1, %v2324_v33  ;;  %6371 = vmatmul.msk.f32.gmra.mxu2 %vm2968_vm0, %v3035_v63  ;;  %2128 = vperm.xlu2 %6628, %v7745_v37  }
 0x253   :  { %1747 = vperm.xlu1 %6627, %v7745_v37   ;;  %1742 = vperm.xlu0 %6626, %v6289_v12   ;;  %v733_v12 = vmul.f32 %v7368_v20, %v9895_v0 }
 0x254   :  { %v2856_v10 = vmul.f32 0.2, %v2760_v51  ;;  %v2761_v42 = vadd.f32 %v7428_v52, %v2710_v47  ;;  %v7766_v23 = vpop.permute.xlu2 %1707  ;;  %vm2808_vm13 = vcmp.ge.f32.partialorder %v2760_v51, 0.0 }
 0x255   :  { %v1312_v55 = vpop.permute.xlu1 %1311  ;;  %v1307_v58 = vpop.permute.xlu0 %1306  ;;  %v781_v54 = vadd.f32 %v733_v12, %v347_v15  ;;  %v9901_v12 = vld [vmem:[#allocation13_spill] sm:$0xff]  ;;  %v736_v15 = vmul.f32 %v7368_v20, %v9903_v57 }
 0x256   :  { %vm2809_vm14 = vcmp.ge.f32.partialorder %v2761_v42, 0.0  ;;  %v2857_v28 = vmul.f32 0.2, %v2761_v42  ;;  %v2904_v17 = vsel %vm2808_vm13, %v2760_v51, %v2856_v10  ;;  %v1506_v31 = vmul.f32 %v7385_v18, %v1312_v55 }
 0x257   :  { %v1505_v25 = vmul.f32 %v7385_v18, %v1307_v58  ;;  %v1167_v16 = vadd.f32 %v1119_v32, %v781_v54  ;;  %v350_v32 = vmul.f32 %v7373_v9, %v9904_v19  ;;  %v1122_v54 = vmul.f32 %v7377_v11, %v9905_v29  ;;  %v9911_v19 = vld [vmem:[#allocation86_spill] sm:$0xff] }
 0x258   :  { %v2905_v50 = vsel %vm2809_vm14, %v2761_v42, %v2857_v28  ;;  %v1554_v38 = vadd.f32 %v1506_v31, %v1168_v30  ;;  %v9900_v42 = vld [vmem:[#allocation48_spill] sm:$0xff] }
 0x259   :  { %v2948_v34 = vmax.f32 %v2904_v17, %v2905_v50  ;;  %v1553_v40 = vadd.f32 %v1505_v25, %v1167_v16  ;;  %v735_v55 = vmul.f32 %v7368_v20, %v9900_v42  ;;  %v9902_v17 = vld [vmem:[#allocation84_spill] sm:$0xff]  ;;  %v9907_v42 = vld [vmem:[#allocation6_spill] sm:$0xff] }
 0x25a   :  { %2519 = vperm.xlu2 %6628, %v7771_v56   ;;  %v1121_v50 = vmul.f32 %v7377_v11, %v9902_v17 }
 0x25b   :  { %2981 = vst.msk [vmem:[#allocation2 + $0x38] sm:$0xff] %vm2968_vm0, %v2948_v34  ;;  %2514 = vperm.xlu1 %6627, %v7780_v3   ;;  %2133 = vperm.xlu0 %6626, %v7780_v3   ;;  %v1939_v61 = vadd.f32 %v1891_v59, %v1553_v40 }
 0x25c   :  { %v7796_v60 = vpop.permute.xlu2 %2474 }
 0x25d   :  { %v2079_v7 = vpop.permute.xlu1 %2078  ;;  %v1698_v48 = vpop.permute.xlu0 %1697 }
 0x25e   :  { %v1892_v41 = vmul.f32 %v7402_v49, %v1698_v48  ;;  %v2277_v4 = vmul.f32 %v7407_v53, %v2079_v7  ;;  %v784_v7 = vadd.f32 %v736_v15, %v350_v32  ;;  %v1124_v32 = vmul.f32 %v7377_v11, %v9911_v19 }
 0x260   :  { %v1940_v24 = vadd.f32 %v1892_v41, %v1554_v38  ;;  %v2325_v1 = vadd.f32 %v2277_v4, %v1939_v61  ;;  %v1170_v38 = vadd.f32 %v1122_v54, %v784_v7  ;;  %v2665_v4 = vmul.f32 %v7411_v5, %v7796_v60 }
 0x261   :  { %v1894_v61 = vmul.f32 %v7402_v49, %v7766_v23  ;;  %v7870_v23 = vld [vmem:[%s9787_s2] ss:$0 sm:$0xff] }
 0x262   :  { %1752 = vperm.xlu2 %6628, %v7780_v3   ;;  %v3036_v44 = vld [vmem:[#allocation2 + $0x38] sm:$0xff]  ;;  %v2326_v21 = vadd.f32 %v2278_v43, %v1940_v24 }
 0x263   :  { %1371 = vperm.xlu1 %6627, %v7780_v3   ;;  %1366 = vperm.xlu0 %6626, %v7745_v37  }
 0x264   :  { %6325 = vmatmul.msk.f32.gmra.mxu0 %vm2968_vm0, %v3036_v44  ;;  %6350 = vmatmul.msk.f32.gmra.mxu1 %vm2968_vm0, %v3036_v44  ;;  %v7809_v2 = vpop.permute.xlu2 %1331 }
 0x265   :  { %6372 = vmatmul.msk.f32.gmra.mxu2 %vm2968_vm0, %v3036_v44  ;;  %v2470_v35 = vpop.permute.xlu1 %2469  ;;  %v2465_v62 = vpop.permute.xlu0 %2464 }
 0x266   :  { %v2664_v33 = vmul.f32 %v7411_v5, %v2470_v35  ;;  %v2663_v37 = vmul.f32 %v7411_v5, %v2465_v62 }
 0x268   :  { %v2712_v63 = vadd.f32 %v2664_v33, %v2326_v21  ;;  %v2711_v51 = vadd.f32 %v2663_v37, %v2325_v1 }
 0x26a   :  { %v2763_v47 = vadd.f32 %v7428_v52, %v2712_v63  ;;  %v2762_v10 = vadd.f32 %v7428_v52, %v2711_v51  ;;  %2143 = vperm.xlu2 %6628, %v7817_v45   ;;  %v349_v52 = vmul.f32 %v7373_v9, %v9901_v12 }
 0x26b   :  { %2138 = vperm.xlu1 %6627, %v7771_v56   ;;  %1757 = vperm.xlu0 %6626, %v7771_v56  }
 0x26c   :  { %vm2811_vm15 = vcmp.ge.f32.partialorder %v2763_v47, 0.0  ;;  %v2859_v58 = vmul.f32 0.2, %v2763_v47  ;;  %vm2810_vm1 = vcmp.ge.f32.partialorder %v2762_v10, 0.0  ;;  %v2858_v28 = vmul.f32 0.2, %v2762_v10  ;;  %v7826_v22 = vpop.permute.xlu2 %2098 }
 0x26d   :  { %v1703_v6 = vpop.permute.xlu1 %1702  ;;  %v1322_v0 = vpop.permute.xlu0 %1321  ;;  %v783_v13 = vadd.f32 %v735_v55, %v349_v52  ;;  %v351_v55 = vmul.f32 %v7373_v9, %v9907_v42  ;;  %v9909_v52 = vld [vmem:[#allocation51_spill] sm:$0xff] }
 0x26e   :  { %v2907_v34 = vsel %vm2811_vm15, %v2763_v47, %v2859_v58  ;;  %v2906_v14 = vsel %vm2810_vm1, %v2762_v10, %v2858_v28  ;;  %v1893_v25 = vmul.f32 %v7402_v49, %v1703_v6  ;;  %v1508_v46 = vmul.f32 %v7385_v18, %v1322_v0  ;;  %v9906_v47 = vld [vmem:[#allocation41_spill] sm:$0xff] }
 0x26f   :  { %v2949_v36 = vmax.f32 %v2906_v14, %v2907_v34  ;;  %v1169_v31 = vadd.f32 %v1121_v50, %v783_v13  ;;  %v9908_v58 = vld [vmem:[#allocation77_spill] sm:$0xff]  ;;  %v738_v17 = vmul.f32 %v7368_v20, %v9909_v52  ;;  %v9914_v52 = vld [vmem:[#allocation7_spill] sm:$0xff] }
 0x270   :  { %v1556_v24 = vadd.f32 %v1508_v46, %v1170_v38  ;;  %v1123_v28 = vmul.f32 %v7377_v11, %v9908_v58 }
 0x271   :  { %2982 = vst.msk [vmem:[#allocation2 + $0x40] sm:$0xff] %vm2968_vm0, %v2949_v36  ;;  %v1555_v48 = vadd.f32 %v1507_v26, %v1169_v31  ;;  %v9910_v36 = vld [vmem:[#allocation16_spill] sm:$0xff] }
 0x272   :  { %2524 = vperm.xlu2 %6628, %v7817_v45   ;;  %v1942_v60 = vadd.f32 %v1894_v61, %v1556_v24  ;;  %v352_v57 = vmul.f32 %v7373_v9, %v9910_v36  ;;  %v9916_v36 = vld [vmem:[#allocation15_spill] sm:$0xff] }
 0x273   :  { %995 = vperm.xlu1 %6627, %v7771_v56   ;;  %990 = vperm.xlu0 %6626, %v7780_v3   ;;  %v1941_v40 = vadd.f32 %v1893_v25, %v1555_v48  ;;  %v7854_v3 = vld [vmem:[%s9786_s0 + $0xe8] sm:$0xff]  ;;  %v1510_v48 = vmul.f32 %v7385_v18, %v7809_v2  ;;  %v2281_v2 = vmul.f32 %v7407_v53, %v7826_v22  ;;  %v7917_v22 = vld [vmem:[%s9786_s0 + $0xf8] sm:$0xff] }
 0x274   :  { %v7846_v30 = vpop.permute.xlu2 %2489  ;;  %v786_v7 = vadd.f32 %v738_v17, %v352_v57  ;;  %v354_v17 = vmul.f32 %v7373_v9, %v9914_v52  ;;  %v353_v57 = vmul.f32 %v7373_v9, %v9916_v36 }
 0x275   :  { %v2094_v16 = vpop.permute.xlu1 %2093  ;;  %v2089_v41 = vpop.permute.xlu0 %2088 }
 0x276   :  { %v2279_v59 = vmul.f32 %v7407_v53, %v2089_v41  ;;  %v2280_v35 = vmul.f32 %v7407_v53, %v2094_v16  ;;  %v7899_v16 = vld [vmem:[%s9786_s0 + $0xf0] sm:$0xff]  ;;  %v1172_v41 = vadd.f32 %v1124_v32, %v786_v7 }
 0x278   :  { %v2327_v44 = vadd.f32 %v2279_v59, %v1941_v40  ;;  %v3037_v43 = vld [vmem:[#allocation2 + $0x40] sm:$0xff]  ;;  %v2328_v37 = vadd.f32 %v2280_v35, %v1942_v60  ;;  %v1558_v59 = vadd.f32 %v1510_v48, %v1172_v41  ;;  %v2668_v60 = vmul.f32 %v7411_v5, %v7846_v30 }
 0x279   :  { %6326 = vmatmul.msk.f32.gmra.mxu0 %vm2968_vm0, %v3037_v43  ;;  %6351 = vmatmul.msk.f32.gmra.mxu1 %vm2968_vm0, %v3037_v43 }
 0x27a   :  { %v2713_v62 = vadd.f32 %v2665_v4, %v2327_v44  ;;  %6373 = vmatmul.msk.f32.gmra.mxu2 %vm2968_vm0, %v3037_v43  ;;  %1381 = vperm.xlu2 %6628, %v7817_v45  }
 0x27b   :  { %1376 = vperm.xlu1 %6627, %v7771_v56   ;;  %2529 = vperm.xlu0 %6626, %v7854_v3   ;;  %v737_v56 = vmul.f32 %v7368_v20, %v9906_v47 }
 0x27c   :  { %v7865_v1 = vpop.permute.xlu2 %1722  ;;  %v2764_v63 = vadd.f32 %v7870_v23, %v2713_v62 }
 0x27d   :  { %v1327_v21 = vpop.permute.xlu1 %1326  ;;  %v2480_v33 = vpop.permute.xlu0 %2479  ;;  %v785_v12 = vadd.f32 %v737_v56, %v351_v55  ;;  %v9912_v55 = vld [vmem:[#allocation42_spill] sm:$0xff] }
 0x27e   :  { %v2666_v51 = vmul.f32 %v7411_v5, %v2480_v33  ;;  %v2860_v6 = vmul.f32 0.2, %v2764_v63  ;;  %vm2812_vm2 = vcmp.ge.f32.partialorder %v2764_v63, 0.0  ;;  %v1509_v50 = vmul.f32 %v7385_v18, %v1327_v21 }
 0x27f   :  { %v1171_v15 = vadd.f32 %v1123_v28, %v785_v12  ;;  %v740_v58 = vmul.f32 %v7368_v20, %v9912_v55 }
 0x280   :  { %v2714_v10 = vadd.f32 %v2666_v51, %v2328_v37  ;;  %v2908_v29 = vsel %vm2812_vm2, %v2764_v63, %v2860_v6 }
 0x281   :  { %v1557_v46 = vadd.f32 %v1509_v50, %v1171_v15  ;;  %v9915_v50 = vld [vmem:[#allocation78_spill] sm:$0xff]  ;;  %v9917_v15 = vld [vmem:[#allocation85_spill] sm:$0xff] }
 0x282   :  { %v2765_v0 = vadd.f32 %v7870_v23, %v2714_v10  ;;  %2148 = vperm.xlu2 %6628, %v7854_v3  }
 0x283   :  { %1767 = vperm.xlu1 %6627, %v7854_v3   ;;  %1762 = vperm.xlu0 %6626, %v7817_v45  }
 0x284   :  { %vm2813_vm3 = vcmp.ge.f32.partialorder %v2765_v0, 0.0  ;;  %v2861_v34 = vmul.f32 0.2, %v2765_v0  ;;  %v7887_v14 = vpop.permute.xlu2 %2113 }
 0x285   :  { %v1718_v13 = vpop.permute.xlu1 %1717  ;;  %v1713_v26 = vpop.permute.xlu0 %1712 }
 0x286   :  { %v2909_v54 = vsel %vm2813_vm3, %v2765_v0, %v2861_v34  ;;  %v1895_v31 = vmul.f32 %v7402_v49, %v1713_v26  ;;  %v1896_v38 = vmul.f32 %v7402_v49, %v1718_v13  ;;  %v1126_v34 = vmul.f32 %v7377_v11, %v9915_v50 }
 0x287   :  { %v2950_v25 = vmax.f32 %v2908_v29, %v2909_v54  ;;  %v1125_v13 = vmul.f32 %v7377_v11, %v9917_v15  ;;  %v788_v26 = vadd.f32 %v740_v58, %v354_v17 }
 0x288   :  { %v1943_v40 = vadd.f32 %v1895_v31, %v1557_v46  ;;  %v1944_v43 = vadd.f32 %v1896_v38, %v1558_v59  ;;  %v7953_v38 = vld [vmem:[%s9786_s0 + $0x100] sm:$0xff] }
 0x289   :  { %2983 = vst.msk [vmem:[#allocation2 + $0x48] sm:$0xff] %vm2968_vm0, %v2950_v25  ;;  %v1174_v25 = vadd.f32 %v1126_v34, %v788_v26  ;;  %v9921_v34 = vld [vmem:[#allocation53_spill] sm:$0xff] }
 0x28a   :  { %1005 = vperm.xlu2 %6628, %v7854_v3   ;;  %v2329_v61 = vadd.f32 %v2281_v2, %v1943_v40  ;;  %v742_v36 = vmul.f32 %v7368_v20, %v9921_v34 }
 0x28b   :  { %1000 = vperm.xlu1 %6627, %v7817_v45   ;;  %2153 = vperm.xlu0 %6626, %v7899_v16  }
 0x28c   :  { %v7908_v4 = vpop.permute.xlu2 %1346 }
 0x28d   :  { %v2485_v24 = vpop.permute.xlu1 %2484  ;;  %v2104_v44 = vpop.permute.xlu0 %2103  ;;  %v1513_v15 = vmul.f32 %v7385_v18, %v7908_v4 }
 0x28e   :  { %v2667_v35 = vmul.f32 %v7411_v5, %v2485_v24  ;;  %v2282_v62 = vmul.f32 %v7407_v53, %v2104_v44  ;;  %v1897_v24 = vmul.f32 %v7402_v49, %v7865_v1 }
 0x290   :  { %v2715_v45 = vadd.f32 %v2667_v35, %v2329_v61  ;;  %v2330_v21 = vadd.f32 %v2282_v62, %v1944_v43  ;;  %v3038_v33 = vld [vmem:[#allocation2 + $0x48] sm:$0xff]  ;;  %v2284_v43 = vmul.f32 %v7407_v53, %v7887_v14 }
 0x291   :  { %6327 = vmatmul.msk.f32.gmra.mxu0 %vm2968_vm0, %v3038_v33  ;;  %6352 = vmatmul.msk.f32.gmra.mxu1 %vm2968_vm0, %v3038_v33  ;;  %v7973_v14 = vld [vmem:[%s9786_s0 + $0x108] sm:$0xff] }
 0x292   :  { %v2766_v37 = vadd.f32 %v7870_v23, %v2715_v45  ;;  %v2716_v63 = vadd.f32 %v2668_v60, %v2330_v21  ;;  %6374 = vmatmul.msk.f32.gmra.mxu2 %vm2968_vm0, %v3038_v33  ;;  %1386 = vperm.xlu2 %6628, %v7854_v3   ;;  %v9913_v3 = vld [vmem:[#allocation50_spill] sm:$0xff] }
 0x293   :  { %2539 = vperm.xlu1 %6627, %v7917_v22   ;;  %2534 = vperm.xlu0 %6626, %v7899_v16   ;;  %v739_v0 = vmul.f32 %v7368_v20, %v9913_v3  ;;  %v9919_v3 = vld [vmem:[#allocation19_spill] sm:$0xff] }
 0x294   :  { %v2862_v30 = vmul.f32 0.2, %v2766_v37  ;;  %v2767_v51 = vadd.f32 %v7870_v23, %v2716_v63  ;;  %v7927_v47 = vpop.permute.xlu2 %1737  ;;  %vm2814_vm4 = vcmp.ge.f32.partialorder %v2766_v37, 0.0 }
 0x295   :  { %v1342_v56 = vpop.permute.xlu1 %1341  ;;  %v1337_v42 = vpop.permute.xlu0 %1336  ;;  %v787_v29 = vadd.f32 %v739_v0, %v353_v57  ;;  %v355_v0 = vmul.f32 %v7373_v9, %v9919_v3 }
 0x296   :  { %vm2815_vm5 = vcmp.ge.f32.partialorder %v2767_v51, 0.0  ;;  %v2863_v10 = vmul.f32 0.2, %v2767_v51  ;;  %v2910_v28 = vsel %vm2814_vm4, %v2766_v37, %v2862_v30  ;;  %v1512_v19 = vmul.f32 %v7385_v18, %v1342_v56 }
 0x297   :  { %v1511_v54 = vmul.f32 %v7385_v18, %v1337_v42  ;;  %v1173_v48 = vadd.f32 %v1125_v13, %v787_v29  ;;  %v9922_v13 = vld [vmem:[#allocation18_spill] sm:$0xff] }
 0x298   :  { %v2911_v6 = vsel %vm2815_vm5, %v2767_v51, %v2863_v10  ;;  %v1560_v41 = vadd.f32 %v1512_v19, %v1174_v25  ;;  %v9918_v10 = vld [vmem:[#allocation54_spill] sm:$0xff]  ;;  %v356_v26 = vmul.f32 %v7373_v9, %v9922_v13  ;;  %v9923_v19 = vld [vmem:[#allocation87_spill] sm:$0xff] }
 0x299   :  { %v2951_v12 = vmax.f32 %v2910_v28, %v2911_v6  ;;  %v1559_v40 = vadd.f32 %v1511_v54, %v1173_v48  ;;  %v741_v42 = vmul.f32 %v7368_v20, %v9918_v10  ;;  %v1128_v29 = vmul.f32 %v7377_v11, %v9923_v19  ;;  %v9925_v10 = vld [vmem:[#allocation8_spill] sm:$0xff] }
 0x29a   :  { %1777 = vperm.xlu2 %6628, %v7917_v22   ;;  %v790_v4 = vadd.f32 %v742_v36, %v356_v26  ;;  %v9928_v36 = vld [vmem:[#allocation22_spill] sm:$0xff] }
 0x29b   :  { %2984 = vst.msk [vmem:[#allocation2 + $0x50] sm:$0xff] %vm2968_vm0, %v2951_v12  ;;  %1772 = vperm.xlu1 %6627, %v7899_v16   ;;  %1391 = vperm.xlu0 %6626, %v7899_v16   ;;  %v9920_v12 = vld [vmem:[#allocation88_spill] sm:$0xff]  ;;  %v789_v57 = vadd.f32 %v741_v42, %v355_v0  ;;  %v357_v42 = vmul.f32 %v7373_v9, %v9925_v10  ;;  %v9929_v26 = vld [vmem:[#allocation90_spill] sm:$0xff] }
 0x29c   :  { %v7946_v32 = vpop.permute.xlu2 %2504  ;;  %v1127_v52 = vmul.f32 %v7377_v11, %v9920_v12  ;;  %v1130_v19 = vmul.f32 %v7377_v11, %v9929_v26  ;;  %v9930_v10 = vld [vmem:[#allocation56_spill] sm:$0xff]  ;;  %v9933_v26 = vld [vmem:[#allocation46_spill] sm:$0xff] }
 0x29d   :  { %v2109_v31 = vpop.permute.xlu1 %2108  ;;  %v1728_v7 = vpop.permute.xlu0 %1727 }
 0x29e   :  { %v1898_v46 = vmul.f32 %v7402_v49, %v1728_v7  ;;  %v2283_v44 = vmul.f32 %v7407_v53, %v2109_v31  ;;  %v1175_v54 = vadd.f32 %v1127_v52, %v789_v57  ;;  %v9927_v52 = vld [vmem:[#allocation57_spill] sm:$0xff]  ;;  %v358_v57 = vmul.f32 %v7373_v9, %v9928_v36 }
 0x2a0   :  { %v1946_v59 = vadd.f32 %v1898_v46, %v1560_v41  ;;  %v1561_v7 = vadd.f32 %v1513_v15, %v1175_v54 }
 0x2a2   :  { %1010 = vperm.xlu2 %6628, %v7899_v16   ;;  %v3039_v2 = vld [vmem:[#allocation2 + $0x50] sm:$0xff]  ;;  %v1945_v16 = vadd.f32 %v1897_v24, %v1559_v40  ;;  %v2332_v1 = vadd.f32 %v2284_v43, %v1946_v59  ;;  %v1176_v40 = vadd.f32 %v1128_v29, %v790_v4 }
 0x2a3   :  { %2163 = vperm.xlu1 %6627, %v7953_v38   ;;  %2158 = vperm.xlu0 %6626, %v7917_v22   ;;  %v8008_v24 = vld [vmem:[%s9786_s0 + $0x110] sm:$0xff] }
 0x2a4   :  { %6328 = vmatmul.msk.f32.gmra.mxu0 %vm2968_vm0, %v3039_v2  ;;  %6353 = vmatmul.msk.f32.gmra.mxu1 %vm2968_vm0, %v3039_v2  ;;  %v7965_v61 = vpop.permute.xlu2 %1361  ;;  %v2331_v45 = vadd.f32 %v2283_v44, %v1945_v16 }
 0x2a5   :  { %6375 = vmatmul.msk.f32.gmra.mxu2 %vm2968_vm0, %v3039_v2  ;;  %v2500_v35 = vpop.permute.xlu1 %2499  ;;  %v2495_v60 = vpop.permute.xlu0 %2494 }
 0x2a6   :  { %v2670_v62 = vmul.f32 %v7411_v5, %v2500_v35  ;;  %v2669_v21 = vmul.f32 %v7411_v5, %v2495_v60  ;;  %v1900_v35 = vmul.f32 %v7402_v49, %v7927_v47 }
 0x2a8   :  { %v2718_v33 = vadd.f32 %v2670_v62, %v2332_v1  ;;  %v2717_v37 = vadd.f32 %v2669_v21, %v2331_v45 }
 0x2aa   :  { %v2769_v63 = vadd.f32 %v7870_v23, %v2718_v33  ;;  %2549 = vperm.xlu2 %6628, %v7973_v14   ;;  %v2768_v30 = vadd.f32 %v7870_v23, %v2717_v37 }
 0x2ab   :  { %2544 = vperm.xlu1 %6627, %v7953_v38   ;;  %1015 = vperm.xlu0 %6626, %v7917_v22  }
 0x2ac   :  { %vm2817_vm6 = vcmp.ge.f32.partialorder %v2769_v63, 0.0  ;;  %v2865_v51 = vmul.f32 0.2, %v2769_v63  ;;  %v7980_v56 = vpop.permute.xlu2 %2128  ;;  %vm2816_vm7 = vcmp.ge.f32.partialorder %v2768_v30, 0.0  ;;  %v2864_v55 = vmul.f32 0.2, %v2768_v30 }
 0x2ad   :  { %v1733_v58 = vpop.permute.xlu1 %1732  ;;  %v1352_v6 = vpop.permute.xlu0 %1351 }
 0x2ae   :  { %v2913_v28 = vsel %vm2817_vm6, %v2769_v63, %v2865_v51  ;;  %v2912_v17 = vsel %vm2816_vm7, %v2768_v30, %v2864_v55  ;;  %v1899_v31 = vmul.f32 %v7402_v49, %v1733_v58  ;;  %v1514_v48 = vmul.f32 %v7385_v18, %v1352_v6  ;;  %v9924_v63 = vld [vmem:[#allocation43_spill] sm:$0xff] }
 0x2af   :  { %v2952_v50 = vmax.f32 %v2912_v17, %v2913_v28  ;;  %v743_v30 = vmul.f32 %v7368_v20, %v9924_v63  ;;  %v9926_v55 = vld [vmem:[#allocation79_spill] sm:$0xff]  ;;  %v744_v17 = vmul.f32 %v7368_v20, %v9927_v52  ;;  %v9932_v52 = vld [vmem:[#allocation89_spill] sm:$0xff] }
 0x2b0   :  { %v1947_v59 = vadd.f32 %v1899_v31, %v1561_v7  ;;  %v1562_v44 = vadd.f32 %v1514_v48, %v1176_v40  ;;  %v1129_v58 = vmul.f32 %v7377_v11, %v9926_v55  ;;  %v1516_v48 = vmul.f32 %v7385_v18, %v7965_v61 }
 0x2b1   :  { %2985 = vst.msk [vmem:[#allocation2 + $0x58] sm:$0xff] %vm2968_vm0, %v2952_v50  ;;  %v791_v3 = vadd.f32 %v743_v30, %v357_v42  ;;  %v792_v7 = vadd.f32 %v744_v17, %v358_v57  ;;  %v745_v42 = vmul.f32 %v7368_v20, %v9930_v10  ;;  %v1131_v17 = vmul.f32 %v7377_v11, %v9932_v52 }
 0x2b2   :  { %1782 = vperm.xlu2 %6628, %v7953_v38   ;;  %v1948_v60 = vadd.f32 %v1900_v35, %v1562_v44 }
 0x2b3   :  { %1401 = vperm.xlu1 %6627, %v7953_v38   ;;  %1396 = vperm.xlu0 %6626, %v7917_v22   ;;  %v2671_v22 = vmul.f32 %v7411_v5, %v7946_v32  ;;  %v1177_v15 = vadd.f32 %v1129_v58, %v791_v3  ;;  %v1178_v40 = vadd.f32 %v1130_v19, %v792_v7  ;;  %v9931_v3 = vld [vmem:[#allocation21_spill] sm:$0xff] }
 0x2b4   :  { %v8001_v25 = vpop.permute.xlu2 %2519  ;;  %v746_v19 = vmul.f32 %v7368_v20, %v9933_v26 }
 0x2b5   :  { %v2124_v46 = vpop.permute.xlu1 %2123  ;;  %v2119_v41 = vpop.permute.xlu0 %2118  ;;  %v1564_v61 = vadd.f32 %v1516_v48, %v1178_v40 }
 0x2b6   :  { %v2285_v2 = vmul.f32 %v7407_v53, %v2119_v41  ;;  %v2286_v1 = vmul.f32 %v7407_v53, %v2124_v46  ;;  %v6300_v46 = vld [vmem:[%s9786_s0 + $0x118] sm:$0xff] }
 0x2b8   :  { %v2333_v43 = vadd.f32 %v2285_v2, %v1947_v59  ;;  %v3040_v16 = vld [vmem:[#allocation2 + $0x58] sm:$0xff]  ;;  %v2334_v33 = vadd.f32 %v2286_v1, %v1948_v60  ;;  %v2287_v2 = vmul.f32 %v7407_v53, %v7980_v56 }
 0x2b9   :  { %6329 = vmatmul.msk.f32.gmra.mxu0 %vm2968_vm0, %v3040_v16  ;;  %6354 = vmatmul.msk.f32.gmra.mxu1 %vm2968_vm0, %v3040_v16 }
 0x2ba   :  { %v2719_v62 = vadd.f32 %v2671_v22, %v2333_v43  ;;  %6376 = vmatmul.msk.f32.gmra.mxu2 %vm2968_vm0, %v3040_v16  ;;  %2173 = vperm.xlu2 %6628, %v8008_v24  }
 0x2bb   :  { %2168 = vperm.xlu1 %6627, %v7973_v14   ;;  %1787 = vperm.xlu0 %6626, %v7973_v14  }
 0x2bc   :  { %v8021_v32 = vpop.permute.xlu2 %1752  ;;  %v2770_v37 = vadd.f32 %v7870_v23, %v2719_v62 }
 0x2bd   :  { %v1357_v45 = vpop.permute.xlu1 %1356  ;;  %v2510_v21 = vpop.permute.xlu0 %2509  ;;  %v1903_v7 = vmul.f32 %v7402_v49, %v8021_v32 }
 0x2be   :  { %v2672_v47 = vmul.f32 %v7411_v5, %v2510_v21  ;;  %v2866_v28 = vmul.f32 0.2, %v2770_v37  ;;  %vm2818_vm8 = vcmp.ge.f32.partialorder %v2770_v37, 0.0  ;;  %v1515_v0 = vmul.f32 %v7385_v18, %v1357_v45 }
 0x2bf   :  { %v2674_v45 = vmul.f32 %v7411_v5, %v8001_v25 }
 0x2c0   :  { %v2720_v51 = vadd.f32 %v2672_v47, %v2334_v33  ;;  %v2914_v29 = vsel %vm2818_vm8, %v2770_v37, %v2866_v28  ;;  %v1563_v31 = vadd.f32 %v1515_v0, %v1177_v15  ;;  %v6254_v28 = vld [vmem:[%s9786_s0 + $0x120] sm:$0xff]  ;;  %v359_v0 = vmul.f32 %v7373_v9, %v9931_v3  ;;  %v9936_v3 = vld [vmem:[#allocation59_spill] sm:$0xff] }
 0x2c2   :  { %v2771_v6 = vadd.f32 %v7870_v23, %v2720_v51  ;;  %2554 = vperm.xlu2 %6628, %v8008_v24  }
 0x2c3   :  { %1025 = vperm.xlu1 %6627, %v7973_v14   ;;  %1020 = vperm.xlu0 %6626, %v7953_v38  }
 0x2c4   :  { %v8036_v12 = vpop.permute.xlu2 %2143  ;;  %vm2819_vm9 = vcmp.ge.f32.partialorder %v2771_v6, 0.0  ;;  %v2867_v50 = vmul.f32 0.2, %v2771_v6 }
 0x2c5   :  { %v1748_v34 = vpop.permute.xlu1 %1747  ;;  %v1743_v13 = vpop.permute.xlu0 %1742 }
 0x2c6   :  { %v2915_v54 = vsel %vm2819_vm9, %v2771_v6, %v2867_v50  ;;  %v1901_v38 = vmul.f32 %v7402_v49, %v1743_v13  ;;  %v1902_v59 = vmul.f32 %v7402_v49, %v1748_v34  ;;  %v793_v34 = vadd.f32 %v745_v42, %v359_v0 }
 0x2c7   :  { %v2953_v4 = vmax.f32 %v2914_v29, %v2915_v54  ;;  %v8089_v54 = vld [vmem:[%s9786_s0 + $0x128] sm:$0xff]  ;;  %v748_v0 = vmul.f32 %v7368_v20, %v9936_v3 }
 0x2c8   :  { %v1949_v41 = vadd.f32 %v1901_v38, %v1563_v31  ;;  %v1950_v1 = vadd.f32 %v1902_v59, %v1564_v61  ;;  %v1179_v13 = vadd.f32 %v1131_v17, %v793_v34  ;;  %v9934_v38 = vld [vmem:[#allocation11_spill] sm:$0xff]  ;;  %v9935_v31 = vld [vmem:[#allocation82_spill] sm:$0xff]  ;;  %v9937_v17 = vld [vmem:[#allocation60_spill] sm:$0xff] }
 0x2c9   :  { %2986 = vst.msk [vmem:[#allocation2 + $0x60] sm:$0xff] %vm2968_vm0, %v2953_v4  ;;  %v1132_v4 = vmul.f32 %v7377_v11, %v9935_v31  ;;  %v747_v34 = vmul.f32 %v7368_v20, %v9937_v17 }
 0x2ca   :  { %1411 = vperm.xlu2 %6628, %v8008_v24   ;;  %v2335_v43 = vadd.f32 %v2287_v2, %v1949_v41 }
 0x2cb   :  { %1406 = vperm.xlu1 %6627, %v7973_v14   ;;  %2559 = vperm.xlu0 %6626, %v6300_v46  }
 0x2cc   :  { %v8056_v22 = vpop.permute.xlu2 %2524 }
 0x2cd   :  { %v2515_v44 = vpop.permute.xlu1 %2514  ;;  %v2134_v35 = vpop.permute.xlu0 %2133 }
 0x2ce   :  { %v2673_v16 = vmul.f32 %v7411_v5, %v2515_v44  ;;  %v2288_v62 = vmul.f32 %v7407_v53, %v2134_v35  ;;  %v2675_v35 = vmul.f32 %v7411_v5, %v8056_v22 }
 0x2d0   :  { %v2721_v60 = vadd.f32 %v2673_v16, %v2335_v43  ;;  %v2336_v21 = vadd.f32 %v2288_v62, %v1950_v1  ;;  %v3041_v56 = vld [vmem:[#allocation2 + $0x60] sm:$0xff] }
 0x2d1   :  { %6330 = vmatmul.msk.f32.gmra.mxu0 %vm2968_vm0, %v3041_v56  ;;  %6355 = vmatmul.msk.f32.gmra.mxu1 %vm2968_vm0, %v3041_v56 }
 0x2d2   :  { %v2772_v14 = vadd.f32 %v7870_v23, %v2721_v60  ;;  %v2722_v33 = vadd.f32 %v2674_v45, %v2336_v21  ;;  %6377 = vmatmul.msk.f32.gmra.mxu2 %vm2968_vm0, %v3041_v56  ;;  %2178 = vperm.xlu2 %6628, %v6300_v46   ;;  %v2290_v21 = vmul.f32 %v7407_v53, %v8036_v12 }
 0x2d3   :  { %1797 = vperm.xlu1 %6627, %v6300_v46   ;;  %1792 = vperm.xlu0 %6626, %v8008_v24  }
 0x2d4   :  { %v8067_v37 = vpop.permute.xlu2 %1381  ;;  %v2868_v47 = vmul.f32 0.2, %v2772_v14  ;;  %v2773_v25 = vadd.f32 %v7870_v23, %v2722_v33  ;;  %vm2820_vm10 = vcmp.ge.f32.partialorder %v2772_v14, 0.0 }
 0x2d5   :  { %v1372_v63 = vpop.permute.xlu1 %1371  ;;  %v1367_v30 = vpop.permute.xlu0 %1366 }
 0x2d6   :  { %vm2821_vm11 = vcmp.ge.f32.partialorder %v2773_v25, 0.0  ;;  %v2869_v51 = vmul.f32 0.2, %v2773_v25  ;;  %v2916_v55 = vsel %vm2820_vm10, %v2772_v14, %v2868_v47  ;;  %v1517_v36 = vmul.f32 %v7385_v18, %v1367_v30 }
 0x2d7   :  { %v1518_v2 = vmul.f32 %v7385_v18, %v1372_v63  ;;  %v6256_v63 = vld [vmem:[%s9786_s0 + $0x130] sm:$0xff] }
 0x2d8   :  { %v2917_v58 = vsel %vm2821_vm11, %v2773_v25, %v2869_v51  ;;  %v1565_v29 = vadd.f32 %v1517_v36, %v1179_v13  ;;  %v9938_v36 = vld [vmem:[#allocation24_spill] sm:$0xff]  ;;  %v9939_v13 = vld [vmem:[#allocation25_spill] sm:$0xff] }
 0x2d9   :  { %v2954_v6 = vmax.f32 %v2916_v55, %v2917_v58  ;;  %v361_v26 = vmul.f32 %v7373_v9, %v9939_v13 }
 0x2da   :  { %1035 = vperm.xlu2 %6628, %v6300_v46   ;;  %v1951_v61 = vadd.f32 %v1903_v7, %v1565_v29 }
 0x2db   :  { %2987 = vst.msk [vmem:[#allocation2 + $0x68] sm:$0xff] %vm2968_vm0, %v2954_v6  ;;  %1030 = vperm.xlu1 %6627, %v8008_v24   ;;  %2183 = vperm.xlu0 %6626, %v6254_v28   ;;  %v360_v24 = vmul.f32 %v7373_v9, %v9934_v38 }
 0x2dc   :  { %v8081_v50 = vpop.permute.xlu2 %2148 }
 0x2dd   :  { %v2139_v57 = vpop.permute.xlu1 %2138  ;;  %v1758_v15 = vpop.permute.xlu0 %1757  ;;  %v794_v59 = vadd.f32 %v746_v19, %v360_v24  ;;  %v795_v24 = vadd.f32 %v747_v34, %v361_v26 }
 0x2de   :  { %v2289_v48 = vmul.f32 %v7407_v53, %v2139_v57  ;;  %v1904_v16 = vmul.f32 %v7402_v49, %v1758_v15  ;;  %v362_v57 = vmul.f32 %v7373_v9, %v9938_v36 }
 0x2df   :  { %v1180_v43 = vadd.f32 %v1132_v4, %v794_v59 }
 0x2e0   :  { %v796_v29 = vadd.f32 %v748_v0, %v362_v57 }
 0x2e1   :  { %v1566_v1 = vadd.f32 %v1518_v2, %v1180_v43  ;;  %v1520_v2 = vmul.f32 %v7385_v18, %v8067_v37 }
 0x2e2   :  { %1416 = vperm.xlu2 %6628, %v6300_v46   ;;  %v3042_v41 = vld [vmem:[#allocation2 + $0x68] sm:$0xff]  ;;  %v2337_v46 = vadd.f32 %v2289_v48, %v1951_v61 }
 0x2e3   :  { %2569 = vperm.xlu1 %6627, %v8089_v54   ;;  %2564 = vperm.xlu0 %6626, %v6254_v28   ;;  %v1952_v60 = vadd.f32 %v1904_v16, %v1566_v1  ;;  %v2291_v1 = vmul.f32 %v7407_v53, %v8081_v50 }
 0x2e4   :  { %v8099_v40 = vpop.permute.xlu2 %1005  ;;  %6331 = vmatmul.msk.f32.gmra.mxu0 %vm2968_vm0, %v3042_v41  ;;  %6356 = vmatmul.msk.f32.gmra.mxu1 %vm2968_vm0, %v3042_v41  ;;  %v2723_v62 = vadd.f32 %v2675_v35, %v2337_v46 }
 0x2e5   :  { %v996_v44 = vpop.permute.xlu1 %995  ;;  %6378 = vmatmul.msk.f32.gmra.mxu2 %vm2968_vm0, %v3042_v41  ;;  %v991_v32 = vpop.permute.xlu0 %990  ;;  %v2338_v47 = vadd.f32 %v2290_v21, %v1952_v60 }
 0x2e6   :  { %v2774_v33 = vadd.f32 %v7870_v23, %v2723_v62  ;;  %v1134_v15 = vmul.f32 %v7377_v11, %v996_v44  ;;  %v1133_v19 = vmul.f32 %v7377_v11, %v991_v32 }
 0x2e8   :  { %v2870_v30 = vmul.f32 0.2, %v2774_v33  ;;  %vm2822_vm12 = vcmp.ge.f32.partialorder %v2774_v33, 0.0  ;;  %v1182_v7 = vadd.f32 %v1134_v15, %v796_v29  ;;  %v1181_v41 = vadd.f32 %v1133_v19, %v795_v24  ;;  %v9942_v15 = vld [vmem:[#allocation49_spill] sm:$0xff]  ;;  %v9943_v19 = vld [vmem:[#allocation14_spill] sm:$0xff] }
 0x2e9   :  { %v749_v13 = vmul.f32 %v7368_v20, %v9942_v15  ;;  %v363_v29 = vmul.f32 %v7373_v9, %v9943_v19 }
 0x2ea   :  { %1807 = vperm.xlu2 %6628, %v8089_v54   ;;  %v2918_v58 = vsel %vm2822_vm12, %v2774_v33, %v2870_v30  ;;  %v1568_v43 = vadd.f32 %v1520_v2, %v1182_v7 }
 0x2eb   :  { %1802 = vperm.xlu1 %6627, %v6254_v28   ;;  %1421 = vperm.xlu0 %6626, %v6254_v28   ;;  %v797_v7 = vadd.f32 %v749_v13, %v363_v29 }
 0x2ec   :  { %v8109_v45 = vpop.permute.xlu2 %1386 }
 0x2ed   :  { %v1377_v56 = vpop.permute.xlu1 %1376  ;;  %v2530_v14 = vpop.permute.xlu0 %2529 }
 0x2ee   :  { %v2676_v25 = vmul.f32 %v7411_v5, %v2530_v14  ;;  %v1519_v31 = vmul.f32 %v7385_v18, %v1377_v56 }
 0x2f0   :  { %v2724_v22 = vadd.f32 %v2676_v25, %v2338_v47  ;;  %v1567_v44 = vadd.f32 %v1519_v31, %v1181_v41  ;;  %v6258_v25 = vld [vmem:[%s9786_s0 + $0x140] sm:$0xff] }
 0x2f2   :  { %v2775_v51 = vadd.f32 %v7870_v23, %v2724_v22  ;;  %1040 = vperm.xlu2 %6628, %v6254_v28   ;;  %v6304_v28 = vld [vmem:[%s9786_s0 + $0x138] sm:$0xff] }
 0x2f3   :  { %2193 = vperm.xlu1 %6627, %v6256_v63   ;;  %2188 = vperm.xlu0 %6626, %v8089_v54  }
 0x2f4   :  { %v8120_v12 = vpop.permute.xlu2 %1777  ;;  %vm2823_vm13 = vcmp.ge.f32.partialorder %v2775_v51, 0.0  ;;  %v2871_v10 = vmul.f32 0.2, %v2775_v51 }
 0x2f5   :  { %v1768_v42 = vpop.permute.xlu1 %1767  ;;  %v1763_v55 = vpop.permute.xlu0 %1762 }
 0x2f6   :  { %v2919_v6 = vsel %vm2823_vm13, %v2775_v51, %v2871_v10  ;;  %v1905_v59 = vmul.f32 %v7402_v49, %v1763_v55  ;;  %v1906_v61 = vmul.f32 %v7402_v49, %v1768_v42  ;;  %v9941_v42 = vld [vmem:[#allocation27_spill] sm:$0xff] }
 0x2f7   :  { %v2955_v52 = vmax.f32 %v2918_v58, %v2919_v6  ;;  %v364_v55 = vmul.f32 %v7373_v9, %v9941_v42  ;;  %v1136_v58 = vmul.f32 %v7377_v11, %v8099_v40  ;;  %v6306_v40 = vld [vmem:[%s9786_s0 + $0x148] sm:$0xff] }
 0x2f8   :  { %v1953_v16 = vadd.f32 %v1905_v59, %v1567_v44  ;;  %v1954_v35 = vadd.f32 %v1906_v61, %v1568_v43  ;;  %v4049_v43 = vld [vmem:[%s9789_s3 + $0xb8] sm:$0xff] }
 0x2f9   :  { %2988 = vst.msk [vmem:[#allocation2 + $0x70] sm:$0xff] %vm2968_vm0, %v2955_v52  ;;  %4134 = vmatpush.msrb.mxu1 %v4049_v43 }
 0x2fa   :  { %2579 = vperm.xlu2 %6628, %v6304_v28   ;;  %v2339_v14 = vadd.f32 %v2291_v1, %v1953_v16 }
 0x2fb   :  { %2574 = vperm.xlu1 %6627, %v6256_v63   ;;  %1045 = vperm.xlu0 %6626, %v8089_v54  }
 0x2fc   :  { %v8137_v38 = vpop.permute.xlu2 %1010 }
 0x2fd   :  { %v1001_v4 = vpop.permute.xlu1 %1000  ;;  %v2154_v48 = vpop.permute.xlu0 %2153  ;;  %v1137_v13 = vmul.f32 %v7377_v11, %v8137_v38 }
 0x2fe   :  { %v2292_v46 = vmul.f32 %v7407_v53, %v2154_v48  ;;  %v1135_v24 = vmul.f32 %v7377_v11, %v1001_v4  ;;  %v1908_v48 = vmul.f32 %v7402_v49, %v8120_v12  ;;  %v4263_v4 = vld [vmem:[%s9789_s3 + $0xd8] sm:$0xff]  ;;  %v6168_v12 = vld [vmem:[%s9786_s0 + $0x160] sm:$0xff] }
 0x2ff   :  { %4348 = vmatpush.msra.mxu2 %v4263_v4 }
 0x300   :  { %v3043_v32 = vld [vmem:[#allocation2 + $0x70] sm:$0xff]  ;;  %v2340_v60 = vadd.f32 %v2292_v46, %v1954_v35  ;;  %v1183_v61 = vadd.f32 %v1135_v24, %v797_v7  ;;  %v1521_v46 = vmul.f32 %v7385_v18, %v8109_v45 }
 0x301   :  { %6332 = vmatmul.msk.f32.gmra.mxu0 %vm2968_vm0, %v3043_v32  ;;  %6357 = vmatmul.msk.f32.gmra.mxu1 %vm2968_vm0, %v3043_v32 }
 0x302   :  { %6379 = vmatmul.msk.f32.gmra.mxu2 %vm2968_vm0, %v3043_v32  ;;  %1812 = vperm.xlu2 %6628, %v6256_v63   ;;  %v1569_v45 = vadd.f32 %v1521_v46, %v1183_v61  ;;  %v3835_v46 = vld [vmem:[%s9789_s3 + $0x98] sm:$0xff] }
 0x303   :  { %1431 = vperm.xlu1 %6627, %v6256_v63   ;;  %1426 = vperm.xlu0 %6626, %v8089_v54   ;;  %v9940_v63 = vld [vmem:[#allocation62_spill] sm:$0xff] }
 0x304   :  { %v2550_v37 = vpop.permute.xlu2 %2549  ;;  %v750_v30 = vmul.f32 %v7368_v20, %v9940_v63  ;;  %3920 = vmatpush.msrb.mxu0 %v3835_v46 }
 0x305   :  { %v2540_v62 = vpop.permute.xlu1 %2539  ;;  %v2535_v56 = vpop.permute.xlu0 %2534  ;;  %v2680_v16 = vmul.f32 %v7411_v5, %v2550_v37 }
 0x306   :  { %v2678_v21 = vmul.f32 %v7411_v5, %v2540_v62  ;;  %v2677_v33 = vmul.f32 %v7411_v5, %v2535_v56  ;;  %v798_v17 = vadd.f32 %v750_v30, %v364_v55  ;;  %v6263_v30 = vld [vmem:[%s9786_s0 + $0x168] sm:$0xff] }
 0x308   :  { %v2726_v47 = vadd.f32 %v2678_v21, %v2340_v60  ;;  %v2725_v22 = vadd.f32 %v2677_v33, %v2339_v14  ;;  %v1184_v26 = vadd.f32 %v1136_v58, %v798_v17  ;;  %v6167_v60 = vld [vmem:[%s9786_s0 + $0x158] sm:$0xff] }
 0x30a   :  { %v2777_v54 = vadd.f32 %v7870_v23, %v2726_v47  ;;  %v2776_v50 = vadd.f32 %v7870_v23, %v2725_v22  ;;  %2203 = vperm.xlu2 %6628, %v6258_v25  }
 0x30b   :  { %2198 = vperm.xlu1 %6627, %v6304_v28   ;;  %1817 = vperm.xlu0 %6626, %v6304_v28   ;;  %v6119_v28 = vld [vmem:[%s9786_s0 + $0x150] sm:$0xff] }
 0x30c   :  { %vm2825_vm14 = vcmp.ge.f32.partialorder %v2777_v54, 0.0  ;;  %v2873_v51 = vmul.f32 0.2, %v2777_v54  ;;  %v8160_v10 = vpop.permute.xlu2 %1782  ;;  %vm2824_vm15 = vcmp.ge.f32.partialorder %v2776_v50, 0.0  ;;  %v2872_v6 = vmul.f32 0.2, %v2776_v50 }
 0x30d   :  { %v1773_v3 = vpop.permute.xlu1 %1772  ;;  %v1392_v52 = vpop.permute.xlu0 %1391  ;;  %v1909_v4 = vmul.f32 %v7402_v49, %v8160_v10 }
 0x30e   :  { %v2921_v0 = vsel %vm2825_vm14, %v2777_v54, %v2873_v51  ;;  %v2920_v34 = vsel %vm2824_vm15, %v2776_v50, %v2872_v6  ;;  %v1522_v36 = vmul.f32 %v7385_v18, %v1392_v52  ;;  %v1907_v35 = vmul.f32 %v7402_v49, %v1773_v3 }
 0x30f   :  { %v2956_v57 = vmax.f32 %v2920_v34, %v2921_v0  ;;  %v6264_v34 = vld [vmem:[%s9786_s0 + $0x170] sm:$0xff] }
 0x310   :  { %v1570_v31 = vadd.f32 %v1522_v36, %v1184_v26  ;;  %v1955_v14 = vadd.f32 %v1907_v35, %v1569_v45  ;;  %v9944_v36 = vld [vmem:[#allocation61_spill] sm:$0xff] }
 0x311   :  { %2989 = vst.msk [vmem:[#allocation2 + $0x78] sm:$0xff] %vm2968_vm0, %v2956_v57  ;;  %v751_v57 = vmul.f32 %v7368_v20, %v9944_v36 }
 0x312   :  { %1070 = vperm.xlu2 %6628, %v6119_v28   ;;  %v1956_v44 = vadd.f32 %v1908_v48, %v1570_v31  ;;  %v9945_v28 = vld [vmem:[#allocation26_spill] sm:$0xff]  ;;  %v8234_v48 = vld [vmem:[%s9786_s0 + $0x178] sm:$0xff] }
 0x313   :  { %2589 = vperm.xlu1 %6627, %v6306_v40   ;;  %2584 = vperm.xlu0 %6626, %v6258_v25   ;;  %v365_v15 = vmul.f32 %v7373_v9, %v9945_v28 }
 0x314   :  { %v8181_v41 = vpop.permute.xlu2 %2173 }
 0x315   :  { %v2164_v59 = vpop.permute.xlu1 %2163  ;;  %v2159_v2 = vpop.permute.xlu0 %2158  ;;  %v799_v40 = vadd.f32 %v751_v57, %v365_v15 }
 0x316   :  { %v2294_v32 = vmul.f32 %v7407_v53, %v2164_v59  ;;  %v2293_v37 = vmul.f32 %v7407_v53, %v2159_v2  ;;  %v9946_v2 = vld [vmem:[#allocation52_spill] sm:$0xff] }
 0x317   :  { %v1185_v31 = vadd.f32 %v1137_v13, %v799_v40  ;;  %v752_v38 = vmul.f32 %v7368_v20, %v9946_v2  ;;  %v9948_v13 = vld [vmem:[#allocation64_spill] sm:$0xff] }
 0x318   :  { %v2342_v1 = vadd.f32 %v2294_v32, %v1956_v44  ;;  %v3044_v62 = vld [vmem:[#allocation2 + $0x78] sm:$0xff]  ;;  %v2341_v54 = vadd.f32 %v2293_v37, %v1955_v14  ;;  %v754_v40 = vmul.f32 %v7368_v20, %v9948_v13 }
 0x319   :  { %v8200_v21 = vld [vmem:[#allocation2 + $0x78] sm:$0xff]  ;;  %6333 = vmatmul.msk.f32.gmra.mxu0 %vm2968_vm0, %v3044_v62  ;;  %6358 = vmatmul.msk.f32.gmra.mxu1 %vm2968_vm0, %v3044_v62 }
 0x31a   :  { %4562 = vst.msk [vmem:[#allocation2 + $0x78] sm:$0xff] %vm2968_vm0, %v9889_v8  ;;  %v2728_v56 = vadd.f32 %v2680_v16, %v2342_v1  ;;  %6380 = vmatmul.msk.f32.gmra.mxu2 %vm2968_vm0, %v3044_v62  ;;  %1461 = vperm.xlu2 %6628, %v6168_v12   ;;  %v9947_v44 = vld [vmem:[#allocation17_spill] sm:$0xff] }
 0x31b   :  { %1456 = vperm.xlu1 %6627, %v6167_v60   ;;  %1075 = vperm.xlu0 %6626, %v6167_v60   ;;  %v366_v32 = vmul.f32 %v7373_v9, %v9947_v44 }
 0x31c   :  { %v8208_v33 = vpop.permute.xlu2 %2554  ;;  %v2779_v22 = vadd.f32 %v7870_v23, %v2728_v56 }
 0x31d   :  { %v2545_v47 = vpop.permute.xlu1 %2544  ;;  %v1016_v25 = vpop.permute.xlu0 %1015  ;;  %v800_v35 = vadd.f32 %v752_v38, %v366_v32  ;;  %v2681_v14 = vmul.f32 %v7411_v5, %v8208_v33  ;;  %v8271_v33 = vld [vmem:[%s9786_s0 + $0x180] sm:$0xff] }
 0x31e   :  { %v2679_v63 = vmul.f32 %v7411_v5, %v2545_v47  ;;  %v2875_v51 = vmul.f32 0.2, %v2779_v22  ;;  %vm2827_vm1 = vcmp.ge.f32.partialorder %v2779_v22, 0.0  ;;  %v1138_v43 = vmul.f32 %v7377_v11, %v1016_v25  ;;  %v9951_v38 = vld [vmem:[#allocation30_spill] sm:$0xff] }
 0x320   :  { %v2727_v50 = vadd.f32 %v2679_v63, %v2341_v54  ;;  %v2923_v52 = vsel %vm2827_vm1, %v2779_v22, %v2875_v51  ;;  %v1186_v45 = vadd.f32 %v1138_v43, %v800_v35  ;;  %v2296_v63 = vmul.f32 %v7407_v53, %v8181_v41 }
 0x322   :  { %v2778_v42 = vadd.f32 %v7870_v23, %v2727_v50  ;;  %2228 = vperm.xlu2 %6628, %v6263_v30  }
 0x323   :  { %1847 = vperm.xlu1 %6627, %v6263_v30   ;;  %1842 = vperm.xlu0 %6626, %v6168_v12  }
 0x324   :  { %vm2826_vm2 = vcmp.ge.f32.partialorder %v2778_v42, 0.0  ;;  %v2874_v55 = vmul.f32 0.2, %v2778_v42  ;;  %v8216_v58 = vpop.permute.xlu2 %1411 }
 0x325   :  { %v1402_v6 = vpop.permute.xlu1 %1401  ;;  %v1397_v3 = vpop.permute.xlu0 %1396 }
 0x326   :  { %v2922_v0 = vsel %vm2826_vm2, %v2778_v42, %v2874_v55  ;;  %v1523_v19 = vmul.f32 %v7385_v18, %v1397_v3  ;;  %v1524_v1 = vmul.f32 %v7385_v18, %v1402_v6  ;;  %v4262_v3 = vld [vmem:[%s9789_s3 + $0xd0] sm:$0xff] }
 0x327   :  { %v2957_v17 = vmax.f32 %v2922_v0, %v2923_v52  ;;  %4349 = vmatpush.msra.mxu2 %v4262_v3 }
 0x328   :  { %v1571_v61 = vadd.f32 %v1523_v19, %v1185_v31  ;;  %v1572_v47 = vadd.f32 %v1524_v1, %v1186_v45  ;;  %v9950_v31 = vld [vmem:[#allocation29_spill] sm:$0xff]  ;;  %v1526_v45 = vmul.f32 %v7385_v18, %v8216_v58 }
 0x329   :  { %2990 = vst.msk [vmem:[#allocation2 + $0x80] sm:$0xff] %vm2968_vm0, %v2957_v17  ;;  %v4048_v17 = vld [vmem:[%s9789_s3 + $0xb0] sm:$0xff] }
 0x32a   :  { %1085 = vperm.xlu2 %6628, %v6263_v30   ;;  %v1957_v62 = vadd.f32 %v1909_v4, %v1571_v61  ;;  %4135 = vmatpush.msrb.mxu1 %v4048_v17  ;;  %v367_v61 = vmul.f32 %v7373_v9, %v9951_v38 }
 0x32b   :  { %1080 = vperm.xlu1 %6627, %v6168_v12   ;;  %2233 = vperm.xlu0 %6626, %v6264_v34  }
 0x32c   :  { %v8228_v26 = vpop.permute.xlu2 %2178 }
 0x32d   :  { %v2169_v29 = vpop.permute.xlu1 %2168  ;;  %v1788_v24 = vpop.permute.xlu0 %1787 }
 0x32e   :  { %v2295_v12 = vmul.f32 %v7407_v53, %v2169_v29  ;;  %v1910_v37 = vmul.f32 %v7402_v49, %v1788_v24  ;;  %v9949_v29 = vld [vmem:[#allocation65_spill] sm:$0xff] }
 0x32f   :  { %v753_v24 = vmul.f32 %v7368_v20, %v9949_v29 }
 0x330   :  { %v3045_v7 = vld [vmem:[#allocation2 + $0x80] sm:$0xff]  ;;  %v2343_v56 = vadd.f32 %v2295_v12, %v1957_v62  ;;  %v1958_v22 = vadd.f32 %v1910_v37, %v1572_v47 }
 0x331   :  { %v8236_v59 = vld [vmem:[#allocation2 + $0x80] sm:$0xff]  ;;  %6334 = vmatmul.msk.f32.gmra.mxu0 %vm2968_vm0, %v3045_v7  ;;  %6359 = vmatmul.msk.f32.gmra.mxu1 %vm2968_vm0, %v3045_v7  ;;  %v801_v43 = vadd.f32 %v753_v24, %v367_v61 }
 0x332   :  { %4563 = vst.msk [vmem:[#allocation2 + $0x80] sm:$0xff] %vm2968_vm0, %v9889_v8  ;;  %6381 = vmatmul.msk.f32.gmra.mxu2 %vm2968_vm0, %v3045_v7  ;;  %1466 = vperm.xlu2 %6628, %v6263_v30   ;;  %v2729_v25 = vadd.f32 %v2681_v14, %v2343_v56  ;;  %v2344_v42 = vadd.f32 %v2296_v63, %v1958_v22 }
 0x333   :  { %2619 = vperm.xlu1 %6627, %v8234_v48   ;;  %2614 = vperm.xlu0 %6626, %v6264_v34   ;;  %v368_v7 = vmul.f32 %v7373_v9, %v9950_v31 }
 0x334   :  { %v8255_v16 = vpop.permute.xlu2 %1035  ;;  %v2780_v51 = vadd.f32 %v7870_v23, %v2729_v25 }
 0x335   :  { %v1026_v60 = vpop.permute.xlu1 %1025  ;;  %v1021_v10 = vpop.permute.xlu0 %1020  ;;  %v802_v32 = vadd.f32 %v754_v40, %v368_v7  ;;  %v1142_v40 = vmul.f32 %v7377_v11, %v8255_v16 }
 0x336   :  { %v2876_v0 = vmul.f32 0.2, %v2780_v51  ;;  %vm2828_vm3 = vcmp.ge.f32.partialorder %v2780_v51, 0.0  ;;  %v1140_v2 = vmul.f32 %v7377_v11, %v1026_v60  ;;  %v1139_v44 = vmul.f32 %v7377_v11, %v1021_v10 }
 0x338   :  { %v2924_v28 = vsel %vm2828_vm3, %v2780_v51, %v2876_v0  ;;  %v1188_v35 = vadd.f32 %v1140_v2, %v802_v32  ;;  %v1187_v62 = vadd.f32 %v1139_v44, %v801_v43  ;;  %v9954_v32 = vld [vmem:[#allocation55_spill] sm:$0xff] }
 0x339   :  { %v755_v16 = vmul.f32 %v7368_v20, %v9954_v32  ;;  %v6318_v32 = vld [vmem:[%s9786_s0 + $0x1a8] sm:$0xff] }
 0x33a   :  { %1857 = vperm.xlu2 %6628, %v8234_v48   ;;  %v1574_v47 = vadd.f32 %v1526_v45, %v1188_v35  ;;  %v6316_v35 = vld [vmem:[%s9786_s0 + $0x198] sm:$0xff] }
 0x33b   :  { %1852 = vperm.xlu1 %6627, %v6264_v34   ;;  %1471 = vperm.xlu0 %6626, %v6264_v34  }
 0x33c   :  { %v8262_v54 = vpop.permute.xlu2 %1416 }
 0x33d   :  { %v1407_v30 = vpop.permute.xlu1 %1406  ;;  %v2560_v50 = vpop.permute.xlu0 %2559 }
 0x33e   :  { %v2682_v55 = vmul.f32 %v7411_v5, %v2560_v50  ;;  %v1525_v12 = vmul.f32 %v7385_v18, %v1407_v30  ;;  %v2297_v30 = vmul.f32 %v7407_v53, %v8228_v26  ;;  %v9952_v26 = vld [vmem:[#allocation68_spill] sm:$0xff] }
 0x340   :  { %v2730_v6 = vadd.f32 %v2682_v55, %v2344_v42  ;;  %v1573_v56 = vadd.f32 %v1525_v12, %v1187_v62 }
 0x342   :  { %1090 = vperm.xlu2 %6628, %v6264_v34   ;;  %v2781_v41 = vadd.f32 %v7870_v23, %v2730_v6  ;;  %v8287_v23 = vld [vmem:[%s9786_s0 + $0x188] sm:$0xff] }
 0x343   :  { %2243 = vperm.xlu1 %6627, %v8271_v33   ;;  %2238 = vperm.xlu0 %6626, %v8234_v48  }
 0x344   :  { %v8279_v52 = vpop.permute.xlu2 %1807  ;;  %vm2829_vm4 = vcmp.ge.f32.partialorder %v2781_v41, 0.0  ;;  %v2877_v34 = vmul.f32 0.2, %v2781_v41 }
 0x345   :  { %v1798_v36 = vpop.permute.xlu1 %1797  ;;  %v1793_v57 = vpop.permute.xlu0 %1792 }
 0x346   :  { %v2925_v15 = vsel %vm2829_vm4, %v2781_v41, %v2877_v34  ;;  %v1911_v60 = vmul.f32 %v7402_v49, %v1793_v57  ;;  %v1912_v10 = vmul.f32 %v7402_v49, %v1798_v36  ;;  %v8333_v41 = vld [vmem:[%s9786_s0 + $0x190] sm:$0xff]  ;;  %v756_v34 = vmul.f32 %v7368_v20, %v9952_v26  ;;  %v8343_v36 = vld [vmem:[%s9787_s2] ss:$0 sm:$0xff] }
 0x347   :  { %v2958_v19 = vmax.f32 %v2924_v28, %v2925_v15  ;;  %v9953_v15 = vld [vmem:[#allocation33_spill] sm:$0xff] }
 0x348   :  { %v1959_v58 = vadd.f32 %v1911_v60, %v1573_v56  ;;  %v1960_v22 = vadd.f32 %v1912_v10, %v1574_v47  ;;  %v370_v13 = vmul.f32 %v7373_v9, %v9953_v15  ;;  %v1914_v56 = vmul.f32 %v7402_v49, %v8279_v52 }
 0x349   :  { %2991 = vst.msk [vmem:[#allocation2 + $0x88] sm:$0xff] %vm2968_vm0, %v2958_v19 }
 0x34a   :  { %2629 = vperm.xlu2 %6628, %v8287_v23   ;;  %v2345_v6 = vadd.f32 %v2297_v30, %v1959_v58  ;;  %v804_v7 = vadd.f32 %v756_v34, %v370_v13  ;;  %v4261_v13 = vld [vmem:[%s9789_s3 + $0xc8] sm:$0xff] }
 0x34b   :  { %2624 = vperm.xlu1 %6627, %v8271_v33   ;;  %1095 = vperm.xlu0 %6626, %v8234_v48  }
 0x34c   :  { %v8303_v4 = vpop.permute.xlu2 %1040  ;;  %v1190_v43 = vadd.f32 %v1142_v40, %v804_v7  ;;  %4350 = vmatpush.msra.mxu2 %v4261_v13 }
 0x34d   :  { %v1031_v46 = vpop.permute.xlu1 %1030  ;;  %v2184_v1 = vpop.permute.xlu0 %2183 }
 0x34e   :  { %v2298_v25 = vmul.f32 %v7407_v53, %v2184_v1  ;;  %v9955_v1 = vld [vmem:[#allocation20_spill] sm:$0xff]  ;;  %v1141_v60 = vmul.f32 %v7377_v11, %v1031_v46 }
 0x34f   :  { %v369_v62 = vmul.f32 %v7373_v9, %v9955_v1 }
 0x350   :  { %v8310_v37 = vld [vmem:[#allocation2 + $0x88] sm:$0xff]  ;;  %v2346_v51 = vadd.f32 %v2298_v25, %v1960_v22 }
 0x351   :  { %v8312_v14 = vld [vmem:[#allocation2 + $0x88] sm:$0xff]  ;;  %6335 = vmatmul.msk.f32.gmra.mxu0 %vm2968_vm0, %v8310_v37  ;;  %6360 = vmatmul.msk.f32.gmra.mxu1 %vm2968_vm0, %v8310_v37  ;;  %v803_v10 = vadd.f32 %v755_v16, %v369_v62  ;;  %v9959_v62 = vld [vmem:[#allocation32_spill] sm:$0xff] }
 0x352   :  { %4564 = vst.msk [vmem:[#allocation2 + $0x88] sm:$0xff] %vm2968_vm0, %v9889_v8  ;;  %6382 = vmatmul.msk.f32.gmra.mxu2 %vm2968_vm0, %v8310_v37  ;;  %1862 = vperm.xlu2 %6628, %v8271_v33   ;;  %v9957_v16 = vld [vmem:[#allocation67_spill] sm:$0xff] }
 0x353   :  { %1481 = vperm.xlu1 %6627, %v8271_v33   ;;  %1476 = vperm.xlu0 %6626, %v8234_v48   ;;  %v3834_v48 = vld [vmem:[%s9789_s3 + $0x90] sm:$0xff]  ;;  %v1189_v58 = vadd.f32 %v1141_v60, %v803_v10  ;;  %v371_v60 = vmul.f32 %v7373_v9, %v9959_v62 }
 0x354   :  { %v2580_v63 = vpop.permute.xlu2 %2579  ;;  %3921 = vmatpush.msrb.mxu0 %v3834_v48 }
 0x355   :  { %v2570_v50 = vpop.permute.xlu1 %2569  ;;  %v2565_v55 = vpop.permute.xlu0 %2564 }
 0x356   :  { %v2684_v42 = vmul.f32 %v7411_v5, %v2570_v50  ;;  %v2683_v3 = vmul.f32 %v7411_v5, %v2565_v55  ;;  %v1527_v50 = vmul.f32 %v7385_v18, %v8262_v54 }
 0x358   :  { %v2732_v0 = vadd.f32 %v2684_v42, %v2346_v51  ;;  %v2731_v17 = vadd.f32 %v2683_v3, %v2345_v6  ;;  %v1575_v55 = vadd.f32 %v1527_v50, %v1189_v58 }
 0x35a   :  { %v2783_v57 = vadd.f32 %v8343_v36, %v2732_v0  ;;  %v2782_v28 = vadd.f32 %v8343_v36, %v2731_v17  ;;  %2253 = vperm.xlu2 %6628, %v8333_v41  }
 0x35b   :  { %2248 = vperm.xlu1 %6627, %v8287_v23   ;;  %1867 = vperm.xlu0 %6626, %v8287_v23  }
 0x35c   :  { %vm2831_vm5 = vcmp.ge.f32.partialorder %v2783_v57, 0.0  ;;  %v2879_v19 = vmul.f32 0.2, %v2783_v57  ;;  %v8354_v29 = vpop.permute.xlu2 %1812  ;;  %vm2830_vm6 = vcmp.ge.f32.partialorder %v2782_v28, 0.0  ;;  %v2878_v24 = vmul.f32 0.2, %v2782_v28 }
 0x35d   :  { %v1803_v31 = vpop.permute.xlu1 %1802  ;;  %v1422_v38 = vpop.permute.xlu0 %1421 }
 0x35e   :  { %v2927_v2 = vsel %vm2831_vm5, %v2783_v57, %v2879_v19  ;;  %v2926_v61 = vsel %vm2830_vm6, %v2782_v28, %v2878_v24  ;;  %v1528_v44 = vmul.f32 %v7385_v18, %v1422_v38  ;;  %v1913_v51 = vmul.f32 %v7402_v49, %v1803_v31 }
 0x35f   :  { %v2959_v12 = vmax.f32 %v2926_v61, %v2927_v2  ;;  %v9956_v61 = vld [vmem:[#allocation58_spill] sm:$0xff] }
 0x360   :  { %v1576_v45 = vadd.f32 %v1528_v44, %v1190_v43  ;;  %v1961_v54 = vadd.f32 %v1913_v51, %v1575_v55  ;;  %v758_v44 = vmul.f32 %v7368_v20, %v9956_v61  ;;  %v757_v43 = vmul.f32 %v7368_v20, %v9957_v16 }
 0x361   :  { %2992 = vst.msk [vmem:[#allocation2 + $0x90] sm:$0xff] %vm2968_vm0, %v2959_v12  ;;  %v9958_v12 = vld [vmem:[#allocation23_spill] sm:$0xff] }
 0x362   :  { %1100 = vperm.xlu2 %6628, %v8271_v33   ;;  %v1962_v22 = vadd.f32 %v1914_v56, %v1576_v45  ;;  %v2686_v33 = vmul.f32 %v7411_v5, %v2580_v63  ;;  %v1143_v45 = vmul.f32 %v7377_v11, %v8303_v4  ;;  %v8423_v56 = vpop.f32.mrf.mxu1  ;;  %v805_v58 = vadd.f32 %v757_v43, %v371_v60  ;;  %v3833_v4 = vld [vmem:[%s9789_s3 + $0x88] sm:$0xff] }
 0x363   :  { %2639 = vperm.xlu1 %6627, %v6316_v35   ;;  %2634 = vperm.xlu0 %6626, %v8333_v41   ;;  %v9960_v60 = vld [vmem:[#allocation63_spill] sm:$0xff] }
 0x364   :  { %v8370_v47 = vpop.permute.xlu2 %2203  ;;  %3922 = vmatpush.msrb.mxu0 %v3833_v4 }
 0x365   :  { %v2194_v25 = vpop.permute.xlu1 %2193  ;;  %v2189_v46 = vpop.permute.xlu0 %2188 }
 0x366   :  { %v2300_v30 = vmul.f32 %v7407_v53, %v2194_v25  ;;  %v2299_v3 = vmul.f32 %v7407_v53, %v2189_v46 }
 0x368   :  { %v2348_v42 = vadd.f32 %v2300_v30, %v1962_v22  ;;  %v8377_v52 = vld [vmem:[#allocation2 + $0x90] sm:$0xff]  ;;  %v2347_v48 = vadd.f32 %v2299_v3, %v1961_v54  ;;  %v3832_v54 = vld [vmem:[%s9789_s3 + $0x80] sm:$0xff] }
 0x369   :  { %6336 = vmatmul.msk.f32.gmra.mxu0 %vm2968_vm0, %v8377_v52  ;;  %6361 = vmatmul.msk.f32.gmra.mxu1 %vm2968_vm0, %v8377_v52  ;;  %4565 = vst.msk [vmem:[#allocation2 + $0x90] sm:$0xff] %vm2968_vm0, %v9889_v8 }
 0x36a   :  { %v2734_v6 = vadd.f32 %v2686_v33, %v2348_v42  ;;  %6383 = vmatmul.msk.f32.gmra.mxu2 %vm2968_vm0, %v8377_v52  ;;  %1491 = vperm.xlu2 %6628, %v8333_v41   ;;  %v1191_v33 = vadd.f32 %v1143_v45, %v805_v58  ;;  %v764_v45 = vmul.f32 %v7368_v20, %v9960_v60 }
 0x36b   :  { %1486 = vperm.xlu1 %6627, %v8287_v23   ;;  %1105 = vperm.xlu0 %6626, %v8287_v23   ;;  %v4047_v23 = vld [vmem:[%s9789_s3 + $0xa8] sm:$0xff] }
 0x36c   :  { %v8391_v63 = vpop.permute.xlu2 %1070  ;;  %v2785_v17 = vadd.f32 %v8343_v36, %v2734_v6  ;;  %4136 = vmatpush.msrb.mxu1 %v4047_v23  ;;  %3923 = vmatpush.msrb.mxu0 %v3832_v54 }
 0x36d   :  { %v2575_v0 = vpop.permute.xlu1 %2574  ;;  %v1046_v34 = vpop.permute.xlu0 %1045  ;;  %v1149_v4 = vmul.f32 %v7377_v11, %v8391_v63 }
 0x36e   :  { %v2685_v26 = vmul.f32 %v7411_v5, %v2575_v0  ;;  %v2881_v28 = vmul.f32 0.2, %v2785_v17  ;;  %vm2833_vm7 = vcmp.ge.f32.partialorder %v2785_v17, 0.0  ;;  %v1144_v1 = vmul.f32 %v7377_v11, %v1046_v34 }
 0x370   :  { %v2733_v57 = vadd.f32 %v2685_v26, %v2347_v48  ;;  %v2929_v31 = vsel %vm2833_vm7, %v2785_v17, %v2881_v28  ;;  %v1915_v17 = vmul.f32 %v7402_v49, %v8354_v29  ;;  %v2302_v26 = vmul.f32 %v7407_v53, %v8370_v47  ;;  %v8451_v28 = vpop.f32.mrf.mxu1 }
 0x372   :  { %v2784_v15 = vadd.f32 %v8343_v36, %v2733_v57  ;;  %2258 = vperm.xlu2 %6628, %v6316_v35  }
 0x373   :  { %1877 = vperm.xlu1 %6627, %v6316_v35   ;;  %1872 = vperm.xlu0 %6626, %v8333_v41   ;;  %v6317_v41 = vld [vmem:[%s9786_s0 + $0x1a0] sm:$0xff]  ;;  %v372_v35 = vmul.f32 %v7373_v9, %v9958_v12 }
 0x374   :  { %vm2832_vm8 = vcmp.ge.f32.partialorder %v2784_v15, 0.0  ;;  %v2880_v40 = vmul.f32 0.2, %v2784_v15  ;;  %v8403_v38 = vpop.permute.xlu2 %1461 }
 0x375   :  { %v1432_v19 = vpop.permute.xlu1 %1431  ;;  %v1427_v7 = vpop.permute.xlu0 %1426  ;;  %v806_v10 = vadd.f32 %v758_v44, %v372_v35 }
 0x376   :  { %v2928_v24 = vsel %vm2832_vm8, %v2784_v15, %v2880_v40  ;;  %v1530_v25 = vmul.f32 %v7385_v18, %v1432_v19  ;;  %v1529_v22 = vmul.f32 %v7385_v18, %v1427_v7 }
 0x377   :  { %v2960_v2 = vmax.f32 %v2928_v24, %v2929_v31  ;;  %v1192_v46 = vadd.f32 %v1144_v1, %v806_v10  ;;  %v9961_v10 = vld [vmem:[#allocation70_spill] sm:$0xff] }
 0x378   :  { %v1577_v6 = vadd.f32 %v1529_v22, %v1191_v33  ;;  %v9962_v22 = vld [vmem:[#allocation28_spill] sm:$0xff]  ;;  %v9963_v33 = vld [vmem:[#allocation35_spill] sm:$0xff] }
 0x379   :  { %2993 = vst.msk [vmem:[#allocation2 + $0x98] sm:$0xff] %vm2968_vm0, %v2960_v2  ;;  %v1578_v42 = vadd.f32 %v1530_v25, %v1192_v46  ;;  %v763_v25 = vmul.f32 %v7368_v20, %v9961_v10 }
 0x37a   :  { %2649 = vperm.xlu2 %6628, %v6318_v32   ;;  %v1963_v34 = vadd.f32 %v1915_v17, %v1577_v6  ;;  %v8490_v17 = vpop.f32.mrf.mxu0 }
 0x37b   :  { %2644 = vperm.xlu1 %6627, %v6317_v41   ;;  %2263 = vperm.xlu0 %6626, %v6317_v41   ;;  %v8459_v41 = vpop.f32.mrf.mxu1 }
 0x37c   :  { %v8433_v3 = vpop.permute.xlu2 %2228 }
 0x37d   :  { %v2199_v30 = vpop.permute.xlu1 %2198  ;;  %v1818_v50 = vpop.permute.xlu0 %1817 }
 0x37e   :  { %v1916_v51 = vmul.f32 %v7402_v49, %v1818_v50  ;;  %v2301_v48 = vmul.f32 %v7407_v53, %v2199_v30  ;;  %v378_v30 = vmul.f32 %v7373_v9, %v9962_v22  ;;  %v8524_v22 = vld [vmem:[#allocation2 + $0x28] sm:$0xff] }
 0x380   :  { %v8431_v55 = vld [vmem:[#allocation2 + $0x98] sm:$0xff]  ;;  %v1964_v0 = vadd.f32 %v1916_v51, %v1578_v42  ;;  %v2349_v40 = vadd.f32 %v2301_v48, %v1963_v34  ;;  %v377_v51 = vmul.f32 %v7373_v9, %v9963_v33  ;;  %v812_v42 = vadd.f32 %v764_v45, %v378_v30  ;;  %v8492_v34 = vpop.f32.mrf.mxu2  ;;  %v9967_v33 = vld [vmem:[#allocation71_spill] sm:$0xff] }
 0x381   :  { %6337 = vmatmul.msk.f32.gmra.mxu0 %vm2968_vm0, %v8431_v55  ;;  %6362 = vmatmul.msk.f32.gmra.mxu1 %vm2968_vm0, %v8431_v55  ;;  %4566 = vst.msk [vmem:[#allocation2 + $0x98] sm:$0xff] %vm2968_vm0, %v9889_v8 }
 0x382   :  { %6384 = vmatmul.msk.f32.gmra.mxu2 %vm2968_vm0, %v8431_v55  ;;  %v2350_v15 = vadd.f32 %v2302_v26, %v1964_v0  ;;  %v811_v6 = vadd.f32 %v763_v25, %v377_v51  ;;  %9964 = vst [vmem:[#allocation73_spill] sm:$0xff] %v8492_v34  ;;  %v8520_v60 = vpop.f32.mrf.mxu0  ;;  %v766_v51 = vmul.f32 %v7368_v20, %v9967_v33  ;;  %v3620_v33 = vld [vmem:[%s9789_s3 + $0x70] sm:$0xff] }
 0x383   :  { %v8472_v46 = vpop.f32.mrf.mxu1 }
 0x384   :  { %v8456_v7 = vpop.permute.xlu2 %1085 }
 0x385   :  { %v2590_v57 = vpop.permute.xlu1 %2589  ;;  %v2585_v23 = vpop.permute.xlu0 %2584 }
 0x386   :  { %v2688_v13 = vmul.f32 %v7411_v5, %v2590_v57  ;;  %v2687_v19 = vmul.f32 %v7411_v5, %v2585_v23  ;;  %v1197_v57 = vadd.f32 %v1149_v4, %v811_v6  ;;  %v9968_v6 = vld [vmem:[#allocation36_spill] sm:$0xff] }
 0x388   :  { %v2736_v24 = vadd.f32 %v2688_v13, %v2350_v15  ;;  %v2735_v31 = vadd.f32 %v2687_v19, %v2349_v40  ;;  %v1536_v13 = vmul.f32 %v7385_v18, %v8403_v38  ;;  %v8500_v19 = vld [vmem:[#allocation2 + $0x20] sm:$0xff] }
 0x38a   :  { %v2787_v29 = vadd.f32 %v8343_v36, %v2736_v24  ;;  %v2786_v2 = vadd.f32 %v8343_v36, %v2735_v31  ;;  %v4046_v24 = vld [vmem:[%s9789_s3 + $0xa0] sm:$0xff] }
 0x38b   :  { %v8505_v31 = vpop.f32.mrf.mxu1  ;;  %4137 = vmatpush.msrb.mxu1 %v4046_v24 }
 0x38c   :  { %vm2835_vm9 = vcmp.ge.f32.partialorder %v2787_v29, 0.0  ;;  %v2883_v47 = vmul.f32 0.2, %v2787_v29  ;;  %vm2834_vm10 = vcmp.ge.f32.partialorder %v2786_v2, 0.0  ;;  %v2882_v61 = vmul.f32 0.2, %v2786_v2  ;;  %v8462_v35 = vpop.permute.xlu2 %1466 }
 0x38d   :  { %v1457_v44 = vpop.permute.xlu1 %1456  ;;  %v1076_v16 = vpop.permute.xlu0 %1075 }
 0x38e   :  { %v2931_v32 = vsel %vm2835_vm9, %v2787_v29, %v2883_v47  ;;  %v2930_v43 = vsel %vm2834_vm10, %v2786_v2, %v2882_v61  ;;  %v1150_v50 = vmul.f32 %v7377_v11, %v1076_v16  ;;  %v1535_v54 = vmul.f32 %v7385_v18, %v1457_v44 }
 0x38f   :  { %v2961_v12 = vmax.f32 %v2930_v43, %v2931_v32  ;;  %v2307_v61 = vmul.f32 %v7407_v53, %v8433_v3 }
 0x390   :  { %v1198_v48 = vadd.f32 %v1150_v50, %v812_v42  ;;  %v1583_v40 = vadd.f32 %v1535_v54, %v1197_v57  ;;  %v4260_v50 = vld [vmem:[%s9789_s3 + $0xc0] sm:$0xff]  ;;  %v380_v54 = vmul.f32 %v7373_v9, %v9968_v6 }
 0x391   :  { %2994 = vst.msk [vmem:[#allocation2 + $0xa0] sm:$0xff] %vm2968_vm0, %v2961_v12  ;;  %v8517_v12 = vpop.f32.mrf.mxu2  ;;  %4351 = vmatpush.msra.mxu2 %v4260_v50 }
 0x392   :  { %v1584_v29 = vadd.f32 %v1536_v13, %v1198_v48  ;;  %9965 = vst [vmem:[#allocation45_spill] sm:$0xff] %v8517_v12  ;;  %v1152_v48 = vmul.f32 %v7377_v11, %v8456_v7 }
 0x393   :  { %v8526_v30 = vpop.f32.mrf.mxu1 }
 0x394   :  { %v8494_v15 = vpop.permute.xlu2 %1857  ;;  %9966 = vst [vmem:[#allocation10_spill] sm:$0xff] %v8526_v30 }
 0x395   :  { %v1848_v1 = vpop.permute.xlu1 %1847  ;;  %v1843_v62 = vpop.permute.xlu0 %1842  ;;  %v1924_v50 = vmul.f32 %v7402_v49, %v8494_v15  ;;  %v1537_v15 = vmul.f32 %v7385_v18, %v8462_v35  ;;  %v8594_v35 = vld [vmem:[#allocation2 + $0x38] sm:$0xff] }
 0x396   :  { %v1921_v63 = vmul.f32 %v7402_v49, %v1843_v62  ;;  %v1922_v23 = vmul.f32 %v7402_v49, %v1848_v1 }
 0x398   :  { %v8468_v58 = vld [vmem:[#allocation2 + $0xa0] sm:$0xff]  ;;  %v1969_v38 = vadd.f32 %v1921_v63, %v1583_v40  ;;  %v1970_v47 = vadd.f32 %v1922_v23, %v1584_v29  ;;  %v814_v23 = vadd.f32 %v766_v51, %v380_v54  ;;  %v3619_v54 = vld [vmem:[%s9789_s3 + $0x68] sm:$0xff] }
 0x399   :  { %6338 = vmatmul.msk.f32.gmra.mxu0 %vm2968_vm0, %v8468_v58  ;;  %6363 = vmatmul.msk.f32.gmra.mxu1 %vm2968_vm0, %v8468_v58  ;;  %4567 = vst.msk [vmem:[#allocation2 + $0xa0] sm:$0xff] %vm2968_vm0, %v9889_v8  ;;  %v8545_v40 = vpop.f32.mrf.mxu2 }
 0x39a   :  { %6385 = vmatmul.msk.f32.gmra.mxu2 %vm2968_vm0, %v8468_v58  ;;  %v2355_v1 = vadd.f32 %v2307_v61, %v1969_v38  ;;  %v9969_v38 = vld [vmem:[#allocation72_spill] sm:$0xff]  ;;  %v1200_v61 = vadd.f32 %v1152_v48, %v814_v23 }
 0x39b   :  { %v8554_v7 = vpop.f32.mrf.mxu1 }
 0x39c   :  { %v8522_v10 = vpop.permute.xlu2 %1090  ;;  %9970 = vst [vmem:[#allocation81_spill] sm:$0xff] %v8554_v7 }
 0x39d   :  { %v8488_v0 = vpop.permute.xlu1 %1080  ;;  %v2234_v26 = vpop.permute.xlu0 %2233 }
 0x39e   :  { %v2308_v2 = vmul.f32 %v7407_v53, %v2234_v26 }
 0x3a0   :  { %v2356_v32 = vadd.f32 %v2308_v2, %v1970_v47  ;;  %v765_v47 = vmul.f32 %v7368_v20, %v9969_v38 }
 0x3a1   :  { %6364 = vmatmul.msk.f32.gmra.mxu1 %vm2968_vm0, %v7493_v27  ;;  %6415 = vmatmul.msk.f32.vlgmr.msrb.gmra.mxu0 %vm2968_vm0, %v8500_v19  ;;  %v8575_v48 = vpop.f32.mrf.mxu2 }
 0x3a2   :  { %6386 = vmatmul.msk.f32.gmra.mxu2 %vm2968_vm0, %v7493_v27 }
 0x3a5   :  { %v2620_v44 = vpop.permute.xlu1 %2619  ;;  %v2615_v43 = vpop.permute.xlu0 %2614 }
 0x3a6   :  { %v2694_v16 = vmul.f32 %v7411_v5, %v2620_v44  ;;  %v2693_v62 = vmul.f32 %v7411_v5, %v2615_v43  ;;  %v8550_v44 = vld [vmem:[#allocation2 + $0x30] sm:$0xff] }
 0x3a8   :  { %v2742_v45 = vadd.f32 %v2694_v16, %v2356_v32  ;;  %v2741_v25 = vadd.f32 %v2693_v62, %v2355_v1  ;;  %v8552_v32 = vpop.f32.mrf.mxu0  ;;  %v9971_v16 = vld [vmem:[#allocation37_spill] sm:$0xff]  ;;  %v1151_v1 = vmul.f32 %v7377_v11, %v8488_v0  ;;  %v2630_v62 = vpop.permute.xlu2 %2629 }
 0x3a9   :  { %6365 = vmatmul.msk.f32.gmra.mxu1 %vm2968_vm0, %v7566_v39  ;;  %6416 = vmatmul.msk.f32.gmra.mxu0 %vm2968_vm0, %v8524_v22  ;;  %v379_v43 = vmul.f32 %v7373_v9, %v9971_v16 }
 0x3aa   :  { %v2793_v3 = vadd.f32 %v8343_v36, %v2742_v45  ;;  %v2792_v4 = vadd.f32 %v8343_v36, %v2741_v25  ;;  %6387 = vmatmul.msk.f32.gmra.mxu2 %vm2968_vm0, %v7566_v39  ;;  %v3621_v25 = vld [vmem:[%s9789_s3 + $0x78] sm:$0xff] }
 0x3ab   :  { %3706 = vmatpush.msrb.mxu3 %v3621_v25 }
 0x3ac   :  { %vm2841_vm11 = vcmp.ge.f32.partialorder %v2793_v3, 0.0  ;;  %v2889_v42 = vmul.f32 0.2, %v2793_v3  ;;  %vm2840_vm12 = vcmp.ge.f32.partialorder %v2792_v4, 0.0  ;;  %v2888_v26 = vmul.f32 0.2, %v2792_v4 }
 0x3ad   :  { %v1853_v57 = vpop.permute.xlu1 %1852  ;;  %v1472_v13 = vpop.permute.xlu0 %1471  ;;  %3707 = vmatpush.msrb.mxu3 %v3620_v33 }
 0x3ae   :  { %v2937_v63 = vsel %vm2841_vm11, %v2793_v3, %v2889_v42  ;;  %v2936_v24 = vsel %vm2840_vm12, %v2792_v4, %v2888_v26  ;;  %v1538_v29 = vmul.f32 %v7385_v18, %v1472_v13  ;;  %v813_v3 = vadd.f32 %v765_v47, %v379_v43 }
 0x3af   :  { %v2964_v2 = vmax.f32 %v2936_v24, %v2937_v63  ;;  %3708 = vmatpush.msrb.mxu3 %v3619_v54  ;;  %v2696_v26 = vmul.f32 %v7411_v5, %v2630_v62  ;;  %v1923_v63 = vmul.f32 %v7402_v49, %v1853_v57  ;;  %v3618_v24 = vld [vmem:[%s9789_s3 + $0x60] sm:$0xff] }
 0x3b0   :  { %v1586_v45 = vadd.f32 %v1538_v29, %v1200_v61  ;;  %v1199_v42 = vadd.f32 %v1151_v1, %v813_v3  ;;  %v8586_v29 = vpop.f32.mrf.mxu0  ;;  %v1863_v61 = vpop.permute.xlu2 %1862 }
 0x3b1   :  { %2997 = vst.msk [vmem:[#allocation2 + $0xb8] sm:$0xff] %vm2968_vm0, %v2964_v2  ;;  %6417 = vmatmul.msk.f32.gmra.mxu0 %vm2968_vm0, %v8550_v44  ;;  %v8588_v2 = vpop.f32.mrf.mxu1  ;;  %3709 = vmatpush.msrb.mxu3 %v3618_v24  ;;  %v8605_v3 = vpop.f32.mrf.mxu2 }
 0x3b2   :  { %v1972_v0 = vadd.f32 %v1924_v50, %v1586_v45  ;;  %9972 = vst [vmem:[#allocation40_spill] sm:$0xff] %v8588_v2  ;;  %v1585_v57 = vadd.f32 %v1537_v15, %v1199_v42 }
 0x3b4   :  { %v1971_v16 = vadd.f32 %v1923_v63, %v1585_v57  ;;  %v9974_v57 = vld [vmem:[#allocation75_spill] sm:$0xff] }
 0x3b5   :  { %v2244_v51 = vpop.permute.xlu1 %2243  ;;  %v2239_v4 = vpop.permute.xlu0 %2238 }
 0x3b6   :  { %v2310_v6 = vmul.f32 %v7407_v53, %v2244_v51  ;;  %v2309_v47 = vmul.f32 %v7407_v53, %v2239_v4  ;;  %v8611_v4 = vld [vmem:[#allocation2 + $0x40] sm:$0xff] }
 0x3b8   :  { %v2358_v13 = vadd.f32 %v2310_v6, %v1972_v0  ;;  %v8581_v23 = vld [vmem:[#allocation2 + $0xb8] sm:$0xff]  ;;  %v2357_v45 = vadd.f32 %v2309_v47, %v1971_v16  ;;  %v8607_v33 = vpop.f32.mrf.mxu0  ;;  %v9975_v16 = vld [vmem:[#allocation66_spill] sm:$0xff] }
 0x3b9   :  { %6341 = vmatmul.msk.f32.vlgmr.msra.gmra.mxu3 %vm2968_vm0, %v8581_v23  ;;  %6366 = vmatmul.msk.f32.gmra.mxu1 %vm2968_vm0, %v8581_v23  ;;  %4570 = vst.msk [vmem:[#allocation2 + $0xb8] sm:$0xff] %vm2968_vm0, %v9889_v8  ;;  %v8609_v51 = vpop.f32.mrf.mxu1  ;;  %v8620_v47 = vpop.f32.mrf.mxu2 }
 0x3ba   :  { %v2744_v38 = vadd.f32 %v2696_v26, %v2358_v13  ;;  %6388 = vmatmul.msk.f32.gmra.mxu2 %vm2968_vm0, %v8581_v23  ;;  %6418 = vmatmul.msk.f32.gmra.mxu0 %vm2968_vm0, %v8594_v35  ;;  %9973 = vst [vmem:[#allocation44_spill] sm:$0xff] %v8609_v51  ;;  %v2254_v26 = vpop.permute.xlu2 %2253 }
 0x3bc   :  { %v2795_v62 = vadd.f32 %v8343_v36, %v2744_v38  ;;  %v768_v38 = vmul.f32 %v7368_v20, %v9974_v57 }
 0x3bd   :  { %v2625_v43 = vpop.permute.xlu1 %2624  ;;  %v1096_v1 = vpop.permute.xlu0 %1095 }
 0x3be   :  { %v2695_v25 = vmul.f32 %v7411_v5, %v2625_v43  ;;  %v2891_v42 = vmul.f32 0.2, %v2795_v62  ;;  %vm2843_vm13 = vcmp.ge.f32.partialorder %v2795_v62, 0.0  ;;  %v767_v43 = vmul.f32 %v7368_v20, %v9975_v16 }
 0x3c0   :  { %v2743_v50 = vadd.f32 %v2695_v25, %v2357_v45  ;;  %v2939_v13 = vsel %vm2843_vm13, %v2795_v62, %v2891_v42  ;;  %v8624_v45 = vpop.f32.mrf.mxu0  ;;  %v9978_v62 = vld [vmem:[#allocation39_spill] sm:$0xff] }
 0x3c1   :  { %6439 = vmatmul.msk.f32.vlgmr.msrb.gmra.mxu1 %vm2968_vm0, %v8524_v22  ;;  %9976 = vst [vmem:[#allocation5_spill] sm:$0xff] %v8624_v45  ;;  %v8626_v25 = vpop.f32.mrf.mxu1  ;;  %v382_v42 = vmul.f32 %v7373_v9, %v9978_v62  ;;  %v8645_v2 = vpop.f32.mrf.mxu2 }
 0x3c2   :  { %v2794_v0 = vadd.f32 %v8343_v36, %v2743_v50  ;;  %6419 = vmatmul.msk.f32.gmra.mxu0 %vm2968_vm0, %v8611_v4  ;;  %9977 = vst [vmem:[#allocation9_spill] sm:$0xff] %v8626_v25  ;;  %v8629_v50 = vld [vmem:[#allocation2 + $0x48] sm:$0xff]  ;;  %v1101_v7 = vpop.permute.xlu2 %1100 }
 0x3c4   :  { %vm2842_vm14 = vcmp.ge.f32.partialorder %v2794_v0, 0.0  ;;  %v2890_v6 = vmul.f32 0.2, %v2794_v0 }
 0x3c5   :  { %v1482_v54 = vpop.permute.xlu1 %1481  ;;  %v1477_v15 = vpop.permute.xlu0 %1476 }
 0x3c6   :  { %v2938_v63 = vsel %vm2842_vm14, %v2794_v0, %v2890_v6  ;;  %v1154_v0 = vmul.f32 %v7377_v11, %v1096_v1  ;;  %v9979_v6 = vld [vmem:[#allocation31_spill] sm:$0xff]  ;;  %v1540_v57 = vmul.f32 %v7385_v18, %v1482_v54  ;;  %v1539_v12 = vmul.f32 %v7385_v18, %v1477_v15 }
 0x3c7   :  { %v2965_v24 = vmax.f32 %v2938_v63, %v2939_v13  ;;  %v381_v63 = vmul.f32 %v7373_v9, %v9979_v6  ;;  %v1153_v13 = vmul.f32 %v7377_v11, %v8522_v10  ;;  %v8657_v15 = vld [vmem:[#allocation2 + $0x50] sm:$0xff] }
 0x3c8   :  { %v8649_v45 = vpop.f32.mrf.mxu0 }
 0x3c9   :  { %2998 = vst.msk [vmem:[#allocation2 + $0xc0] sm:$0xff] %vm2968_vm0, %v2965_v24  ;;  %6440 = vmatmul.msk.f32.gmra.mxu1 %vm2968_vm0, %v8550_v44  ;;  %v816_v24 = vadd.f32 %v768_v38, %v382_v42  ;;  %v815_v16 = vadd.f32 %v767_v43, %v381_v63  ;;  %v8651_v10 = vpop.f32.mrf.mxu1  ;;  %v2312_v43 = vmul.f32 %v7407_v53, %v2254_v26  ;;  %v8677_v26 = vld [vmem:[#allocation2 + $0x58] sm:$0xff] }
 0x3ca   :  { %6420 = vmatmul.msk.f32.gmra.mxu0 %vm2968_vm0, %v8629_v50  ;;  %9980 = vst [vmem:[#allocation76_spill] sm:$0xff] %v8651_v10  ;;  %v9987_v10 = vld [vmem:[#allocation38_spill] sm:$0xff] }
 0x3cb   :  { %v1202_v62 = vadd.f32 %v1154_v0, %v816_v24  ;;  %v1201_v51 = vadd.f32 %v1153_v13, %v815_v16 }
 0x3cd   :  { %v2249_v34 = vpop.permute.xlu1 %2248  ;;  %v1868_v25 = vpop.permute.xlu0 %1867  ;;  %v1588_v30 = vadd.f32 %v1540_v57, %v1202_v62  ;;  %v1587_v54 = vadd.f32 %v1539_v12, %v1201_v51  ;;  %v1925_v12 = vmul.f32 %v7402_v49, %v1863_v61  ;;  %v3594_v62 = vld [vmem:[#allocation2 + $0x18] sm:$0xff] }
 0x3ce   :  { %v1926_v1 = vmul.f32 %v7402_v49, %v1868_v25  ;;  %v2311_v51 = vmul.f32 %v7407_v53, %v2249_v34  ;;  %v8670_v57 = vpop.f32.mrf.mxu2 }
 0x3cf   :  { %v1973_v25 = vadd.f32 %v1925_v12, %v1587_v54  ;;  %v1492_v54 = vpop.permute.xlu2 %1491 }
 0x3d0   :  { %v8647_v6 = vld [vmem:[#allocation2 + $0xc0] sm:$0xff]  ;;  %v1974_v38 = vadd.f32 %v1926_v1, %v1588_v30  ;;  %v8672_v1 = vpop.f32.mrf.mxu0 }
 0x3d1   :  { %6342 = vmatmul.msk.f32.gmra.mxu3 %vm2968_vm0, %v8647_v6  ;;  %6389 = vmatmul.msk.f32.gmra.mxu2 %vm2968_vm0, %v8647_v6  ;;  %4571 = vst.msk [vmem:[#allocation2 + $0xc0] sm:$0xff] %vm2968_vm0, %v9889_v8  ;;  %v2359_v24 = vadd.f32 %v2311_v51, %v1973_v25  ;;  %v8674_v61 = vpop.f32.mrf.mxu1 }
 0x3d2   :  { %6421 = vmatmul.msk.f32.gmra.mxu0 %vm2968_vm0, %v8657_v15  ;;  %6441 = vmatmul.msk.f32.gmra.mxu1 %vm2968_vm0, %v8594_v35  ;;  %v2360_v0 = vadd.f32 %v2312_v43, %v1974_v38  ;;  %9981 = vst [vmem:[#allocation80_spill] sm:$0xff] %v8672_v1 }
 0x3d3   :  { %9982 = vst [vmem:[#allocation48_spill] sm:$0xff] %v8674_v61 }
 0x3d5   :  { %v2640_v42 = vpop.permute.xlu1 %2639  ;;  %v2635_v13 = vpop.permute.xlu0 %2634 }
 0x3d6   :  { %v2698_v63 = vmul.f32 %v7411_v5, %v2640_v42  ;;  %v2697_v30 = vmul.f32 %v7411_v5, %v2635_v13  ;;  %v9983_v13 = vld [vmem:[#allocation74_spill] sm:$0xff] }
 0x3d8   :  { %v2746_v16 = vadd.f32 %v2698_v63, %v2360_v0  ;;  %v2745_v34 = vadd.f32 %v2697_v30, %v2359_v24  ;;  %v769_v24 = vmul.f32 %v7368_v20, %v9983_v13  ;;  %v8687_v30 = vpop.f32.mrf.mxu2  ;;  %v9989_v13 = vld [vmem:[#allocation34_spill] sm:$0xff] }
 0x3d9   :  { %6391 = vmatmul.msk.f32.vlgmr.msrb.gmra.mxu3 %vm2968_vm0, %v3594_v62  ;;  %9984 = vst [vmem:[#allocation13_spill] sm:$0xff] %v8687_v30  ;;  %v8689_v62 = vpop.f32.mrf.mxu0  ;;  %v8691_v61 = vpop.f32.mrf.mxu1 }
 0x3da   :  { %v2797_v38 = vadd.f32 %v8343_v36, %v2746_v16  ;;  %6422 = vmatmul.msk.f32.gmra.mxu0 %vm2968_vm0, %v8677_v26  ;;  %6442 = vmatmul.msk.f32.gmra.mxu1 %vm2968_vm0, %v8611_v4  ;;  %v2796_v12 = vadd.f32 %v8343_v36, %v2745_v34  ;;  %9985 = vst [vmem:[#allocation84_spill] sm:$0xff] %v8689_v62  ;;  %v8695_v34 = vld [vmem:[#allocation2 + $0x60] sm:$0xff] }
 0x3db   :  { %9986 = vst [vmem:[#allocation47_spill] sm:$0xff] %v8691_v61 }
 0x3dc   :  { %vm2845_vm15 = vcmp.ge.f32.partialorder %v2797_v38, 0.0  ;;  %v2893_v51 = vmul.f32 0.2, %v2797_v38  ;;  %vm2844_vm1 = vcmp.ge.f32.partialorder %v2796_v12, 0.0  ;;  %v2892_v43 = vmul.f32 0.2, %v2796_v12 }
 0x3dd   :  { %v1487_v25 = vpop.permute.xlu1 %1486  ;;  %v1106_v0 = vpop.permute.xlu0 %1105 }
 0x3de   :  { %v2941_v42 = vsel %vm2845_vm15, %v2797_v38, %v2893_v51  ;;  %v2940_v63 = vsel %vm2844_vm1, %v2796_v12, %v2892_v43  ;;  %v383_v38 = vmul.f32 %v7373_v9, %v9987_v10  ;;  %v1155_v12 = vmul.f32 %v7377_v11, %v1101_v7  ;;  %v9988_v51 = vld [vmem:[#allocation69_spill] sm:$0xff] }
 0x3df   :  { %v2966_v16 = vmax.f32 %v2940_v63, %v2941_v42  ;;  %v770_v43 = vmul.f32 %v7368_v20, %v9988_v51  ;;  %v1541_v63 = vmul.f32 %v7385_v18, %v1487_v25  ;;  %v384_v10 = vmul.f32 %v7373_v9, %v9989_v13 }
 0x3e0   :  { %v817_v42 = vadd.f32 %v769_v24, %v383_v38  ;;  %v1156_v7 = vmul.f32 %v7377_v11, %v1106_v0  ;;  %v8715_v24 = vpop.f32.mrf.mxu2  ;;  %v8725_v0 = vld [vmem:[#allocation2 + $0x68] sm:$0xff] }
 0x3e1   :  { %6392 = vmatmul.msk.f32.gmra.mxu3 %vm2968_vm0, %v8500_v19  ;;  %2999 = vst.msk [vmem:[#allocation2 + $0xc8] sm:$0xff] %vm2968_vm0, %v2966_v16  ;;  %v2259_v19 = vpop.permute.xlu2 %2258  ;;  %v4617_v16 = vld [vmem:[%s9790_s5 + $0x38] sm:$0xff]  ;;  %v818_v30 = vadd.f32 %v770_v43, %v384_v10  ;;  %v8717_v25 = vpop.f32.mrf.mxu0 }
 0x3e2   :  { %6423 = vmatmul.msk.f32.gmra.mxu0 %vm2968_vm0, %v8695_v34  ;;  %6443 = vmatmul.msk.f32.gmra.mxu1 %vm2968_vm0, %v8629_v50  ;;  %v1203_v62 = vadd.f32 %v1155_v12, %v817_v42  ;;  %v8719_v51 = vpop.f32.mrf.mxu1 }
 0x3e3   :  { %4666 = vmatpush.msra.mxu3 %v4617_v16  ;;  %v1204_v9 = vadd.f32 %v1156_v7, %v818_v30 }
 0x3e4   :  { %v1589_v38 = vadd.f32 %v1541_v63, %v1203_v62 }
 0x3e5   :  { %v1878_v61 = vpop.permute.xlu1 %1877  ;;  %v1873_v1 = vpop.permute.xlu0 %1872 }
 0x3e6   :  { %v1927_v20 = vmul.f32 %v7402_v49, %v1873_v1  ;;  %v1542_v1 = vmul.f32 %v7385_v18, %v1492_v54  ;;  %v1928_v30 = vmul.f32 %v7402_v49, %v1878_v61 }
 0x3e8   :  { %v8721_v11 = vld [vmem:[#allocation2 + $0xc8] sm:$0xff]  ;;  %v1975_v12 = vadd.f32 %v1927_v20, %v1589_v38  ;;  %v1590_v62 = vadd.f32 %v1542_v1, %v1204_v9  ;;  %v8740_v20 = vpop.f32.mrf.mxu2  ;;  %v8749_v38 = vld [vmem:[#allocation2 + $0x70] sm:$0xff] }
 0x3e9   :  { %6393 = vmatmul.msk.f32.gmra.mxu3 %vm2968_vm0, %v8524_v22  ;;  %6390 = vmatmul.msk.f32.gmra.mxu2 %vm2968_vm0, %v8721_v11  ;;  %4572 = vst.msk [vmem:[#allocation2 + $0xc8] sm:$0xff] %vm2968_vm0, %v9889_v8  ;;  %v2313_v22 = vmul.f32 %v7407_v53, %v2259_v19  ;;  %v2650_v42 = vpop.permute.xlu2 %2649  ;;  %v8742_v54 = vpop.f32.mrf.mxu0 }
 0x3ea   :  { %6424 = vmatmul.msk.f32.gmra.mxu0 %vm2968_vm0, %v8725_v0  ;;  %6444 = vmatmul.msk.f32.gmra.mxu1 %vm2968_vm0, %v8657_v15  ;;  %v1976_v7 = vadd.f32 %v1928_v30, %v1590_v62  ;;  %v8744_v49 = vpop.f32.mrf.mxu1  ;;  %v2700_v61 = vmul.f32 %v7411_v5, %v2650_v42 }
 0x3eb   :  { %v2361_v63 = vadd.f32 %v2313_v22, %v1975_v12 }
 0x3ed   :  { %v2645_v43 = vpop.permute.xlu1 %2644  ;;  %v2264_v10 = vpop.permute.xlu0 %2263 }
 0x3ee   :  { %v2699_v13 = vmul.f32 %v7411_v5, %v2645_v43  ;;  %v2314_v16 = vmul.f32 %v7407_v53, %v2264_v10 }
 0x3f0   :  { %v2747_v18 = vadd.f32 %v2699_v13, %v2361_v63  ;;  %v2362_v19 = vadd.f32 %v2314_v16, %v1976_v7  ;;  %v8759_v30 = vpop.f32.mrf.mxu2 }
 0x3f1   :  { %6394 = vmatmul.msk.f32.gmra.mxu3 %vm2968_vm0, %v8550_v44  ;;  %6463 = vmatmul.msk.f32.vlgmr.msra.gmra.mxu2 %vm2968_vm0, %v8550_v44  ;;  %v8761_v22 = vpop.f32.mrf.mxu0 }
 0x3f2   :  { %v2798_v9 = vadd.f32 %v8343_v36, %v2747_v18  ;;  %6425 = vmatmul.msk.f32.gmra.mxu0 %vm2968_vm0, %v8749_v38  ;;  %v2748_v53 = vadd.f32 %v2700_v61, %v2362_v19  ;;  %6445 = vmatmul.msk.f32.gmra.mxu1 %vm2968_vm0, %v8677_v26  ;;  %v8763_v62 = vpop.f32.mrf.mxu1 }
 0x3f4   :  { %v2894_v12 = vmul.f32 0.2, %v2798_v9  ;;  %v2799_v5 = vadd.f32 %v8343_v36, %v2748_v53  ;;  %vm2846_vm2 = vcmp.ge.f32.partialorder %v2798_v9, 0.0 }
 0x3f6   :  { %vm2847_vm3 = vcmp.ge.f32.partialorder %v2799_v5, 0.0  ;;  %v2895_v1 = vmul.f32 0.2, %v2799_v5  ;;  %v2942_v43 = vsel %vm2846_vm2, %v2798_v9, %v2894_v12 }
 0x3f8   :  { %v2943_v42 = vsel %vm2847_vm3, %v2799_v5, %v2895_v1  ;;  %v8774_v36 = vpop.f32.mrf.mxu2 }
 0x3f9   :  { %6395 = vmatmul.msk.f32.gmra.mxu3 %vm2968_vm0, %v8594_v35  ;;  %v2967_v44 = vmax.f32 %v2942_v43, %v2943_v42  ;;  %6464 = vmatmul.msk.f32.gmra.mxu2 %vm2968_vm0, %v8594_v35  ;;  %v8776_v63 = vpop.f32.mrf.mxu0 }
 0x3fa   :  { %6426 = vmatmul.msk.f32.gmra.mxu0 %vm2968_vm0, %v8200_v21  ;;  %6446 = vmatmul.msk.f32.gmra.mxu1 %vm2968_vm0, %v8695_v34  ;;  %v8778_v13 = vpop.f32.mrf.mxu1 }
 0x3fb   :  { %3000 = vst.msk [vmem:[#allocation2 + $0xd0] sm:$0xff] %vm2968_vm0, %v2967_v44 }
 0x3fc   :  { %9990 = vst [vmem:[#allocation12_spill] sm:$0xff] %v8778_v13  ;;  %v4925_v13 = vld [vmem:[%s9790_s5 + $0x60] sm:$0xff] }
 0x400   :  { %v8792_v10 = vpop.f32.mrf.mxu2 }
 0x401   :  { %6396 = vmatmul.msk.f32.gmra.mxu3 %vm2968_vm0, %v8611_v4  ;;  %6465 = vmatmul.msk.f32.gmra.mxu2 %vm2968_vm0, %v8611_v4  ;;  %v8794_v7 = vpop.f32.mrf.mxu0 }
 0x402   :  { %6427 = vmatmul.msk.f32.gmra.mxu0 %vm2968_vm0, %v8236_v59  ;;  %6447 = vmatmul.msk.f32.gmra.mxu1 %vm2968_vm0, %v8725_v0  ;;  %v8788_v35 = vld [vmem:[#allocation2 + $0xd0] sm:$0xff]  ;;  %v8796_v16 = vpop.f32.mrf.mxu1 }
 0x403   :  { %4573 = vst.msk [vmem:[#allocation2 + $0xd0] sm:$0xff] %vm2968_vm0, %v9889_v8 }
 0x404   :  { %9991 = vst [vmem:[#allocation83_spill] sm:$0xff] %v8796_v16  ;;  %v8974_v16 = vld [vmem:[#allocation2 + $0x10] sm:$0xff] }
 0x408   :  { %v8806_v4 = vpop.f32.mrf.mxu2 }
 0x409   :  { %6397 = vmatmul.msk.f32.gmra.mxu3 %vm2968_vm0, %v8629_v50  ;;  %6466 = vmatmul.msk.f32.gmra.mxu2 %vm2968_vm0, %v8629_v50  ;;  %v8808_v18 = vpop.f32.mrf.mxu0  ;;  %v4616_v50 = vld [vmem:[%s9790_s5 + $0x30] sm:$0xff] }
 0x40a   :  { %6428 = vmatmul.msk.f32.gmra.mxu0 %vm2968_vm0, %v8310_v37  ;;  %6448 = vmatmul.msk.f32.gmra.mxu1 %vm2968_vm0, %v8749_v38  ;;  %v8810_v61 = vpop.f32.mrf.mxu1 }
 0x40b   :  { %9992 = vst [vmem:[#allocation41_spill] sm:$0xff] %v8810_v61  ;;  %4667 = vmatpush.msra.mxu3 %v4616_v50 }
 0x410   :  { %v8823_v19 = vpop.f32.mrf.mxu2 }
 0x411   :  { %6398 = vmatmul.msk.f32.gmra.mxu3 %vm2968_vm0, %v8657_v15  ;;  %6467 = vmatmul.msk.f32.gmra.mxu2 %vm2968_vm0, %v8657_v15  ;;  %v8825_v9 = vpop.f32.mrf.mxu0 }
 0x412   :  { %6429 = vmatmul.msk.f32.gmra.mxu0 %vm2968_vm0, %v8377_v52  ;;  %6449 = vmatmul.msk.f32.gmra.mxu1 %vm2968_vm0, %v8200_v21  ;;  %v8827_v53 = vpop.f32.mrf.mxu1 }
 0x413   :  { %9993 = vst [vmem:[#allocation6_spill] sm:$0xff] %v8827_v53 }
 0x418   :  { %v8837_v15 = vpop.f32.mrf.mxu2 }
 0x419   :  { %6399 = vmatmul.msk.f32.gmra.mxu3 %vm2968_vm0, %v8677_v26  ;;  %6468 = vmatmul.msk.f32.gmra.mxu2 %vm2968_vm0, %v8677_v26  ;;  %v8839_v12 = vpop.f32.mrf.mxu0 }
 0x41a   :  { %6430 = vmatmul.msk.f32.gmra.mxu0 %vm2968_vm0, %v8431_v55  ;;  %6450 = vmatmul.msk.f32.gmra.mxu1 %vm2968_vm0, %v8236_v59  ;;  %9994 = vst [vmem:[#allocation77_spill] sm:$0xff] %v8839_v12  ;;  %v8841_v5 = vpop.f32.mrf.mxu1 }
 0x41b   :  { %9995 = vst [vmem:[#allocation51_spill] sm:$0xff] %v8841_v5 }
 0x420   :  { %v8851_v26 = vpop.f32.mrf.mxu2 }
 0x421   :  { %6400 = vmatmul.msk.f32.gmra.mxu3 %vm2968_vm0, %v8695_v34  ;;  %6469 = vmatmul.msk.f32.gmra.mxu2 %vm2968_vm0, %v8695_v34  ;;  %v8853_v1 = vpop.f32.mrf.mxu0 }
 0x422   :  { %6431 = vmatmul.msk.f32.gmra.mxu0 %vm2968_vm0, %v8468_v58  ;;  %6451 = vmatmul.msk.f32.gmra.mxu1 %vm2968_vm0, %v8310_v37  ;;  %9996 = vst [vmem:[#allocation16_spill] sm:$0xff] %v8853_v1  ;;  %v8861_v43 = vpop.f32.mrf.mxu1 }
 0x423   :  { %9997 = vst [vmem:[#allocation86_spill] sm:$0xff] %v8861_v43  ;;  %v4615_v43 = vld [vmem:[%s9790_s5 + $0x28] sm:$0xff] }
 0x424   :  { %4668 = vmatpush.msra.mxu3 %v4615_v43 }
 0x428   :  { %v8865_v34 = vpop.f32.mrf.mxu2 }
 0x429   :  { %6401 = vmatmul.msk.f32.gmra.mxu3 %vm2968_vm0, %v8725_v0  ;;  %6470 = vmatmul.msk.f32.gmra.mxu2 %vm2968_vm0, %v8725_v0  ;;  %9998 = vst [vmem:[#allocation42_spill] sm:$0xff] %v8865_v34  ;;  %v8867_v37 = vpop.f32.mrf.mxu0 }
 0x42a   :  { %6432 = vmatmul.msk.f32.gmra.mxu0 %vm2968_vm0, %v7493_v27  ;;  %6452 = vmatmul.msk.f32.gmra.mxu1 %vm2968_vm0, %v8377_v52  ;;  %9999 = vst [vmem:[#allocation50_spill] sm:$0xff] %v8867_v37  ;;  %v8877_v0 = vpop.f32.mrf.mxu1  ;;  %v8949_v37 = vld [vmem:[#allocation2 + $0xd8] sm:$0xff] }
 0x42b   :  { %10000 = vst [vmem:[#allocation7_spill] sm:$0xff] %v8877_v0 }
 0x430   :  { %v8879_v42 = vpop.f32.mrf.mxu2 }
 0x431   :  { %6402 = vmatmul.msk.f32.gmra.mxu3 %vm2968_vm0, %v8749_v38  ;;  %6471 = vmatmul.msk.f32.gmra.mxu2 %vm2968_vm0, %v8749_v38  ;;  %10001 = vst [vmem:[#allocation78_spill] sm:$0xff] %v8879_v42  ;;  %v8881_v44 = vpop.f32.mrf.mxu0 }
 0x432   :  { %6433 = vmatmul.msk.f32.gmra.mxu0 %vm2968_vm0, %v7566_v39  ;;  %6453 = vmatmul.msk.f32.gmra.mxu1 %vm2968_vm0, %v8431_v55  ;;  %10002 = vst [vmem:[#allocation15_spill] sm:$0xff] %v8881_v44  ;;  %v4811_v44 = vld [vmem:[%s9790_s5 + $0x58] sm:$0xff] }
 0x433   :  { %4860 = vmatpush.msra.mxu0 %v4811_v44 }
 0x436   :  { %v3377_v38 = vpop.f32.mrf.mxu1 }
 0x438   :  { %v8891_v50 = vpop.f32.mrf.mxu2 }
 0x439   :  { %6403 = vmatmul.msk.f32.gmra.mxu3 %vm2968_vm0, %v8200_v21  ;;  %6472 = vmatmul.msk.f32.gmra.mxu2 %vm2968_vm0, %v8200_v21  ;;  %10003 = vst [vmem:[#allocation85_spill] sm:$0xff] %v8891_v50  ;;  %v8899_v0 = vpop.f32.mrf.mxu0 }
 0x43a   :  { %6434 = vmatmul.msk.f32.gmra.mxu0 %vm2968_vm0, %v8581_v23  ;;  %6454 = vmatmul.msk.f32.gmra.mxu1 %vm2968_vm0, %v8468_v58 }
 0x43c   :  { %v8918_v5 = vpop.f32.mrf.mxu3 }
 0x43d   :  { %10005 = vst [vmem:[#allocation19_spill] sm:$0xff] %v8918_v5 }
 0x43e   :  { %v8903_v21 = vpop.f32.mrf.mxu1 }
 0x441   :  { %6404 = vmatmul.msk.f32.gmra.mxu3 %vm2968_vm0, %v8236_v59  ;;  %6473 = vmatmul.msk.f32.gmra.mxu2 %vm2968_vm0, %v8236_v59  ;;  %v8914_v59 = vpop.f32.mrf.mxu2  ;;  %v8920_v53 = vpop.f32.mrf.mxu0 }
 0x442   :  { %6435 = vmatmul.msk.f32.gmra.mxu0 %vm2968_vm0, %v8647_v6  ;;  %6455 = vmatmul.msk.f32.gmra.mxu1 %vm2968_vm0, %v7493_v27  ;;  %10004 = vst [vmem:[#allocation54_spill] sm:$0xff] %v8914_v59 }
 0x446   :  { %v8925_v50 = vpop.f32.mrf.mxu1 }
 0x449   :  { %6405 = vmatmul.msk.f32.gmra.mxu3 %vm2968_vm0, %v8312_v14  ;;  %6474 = vmatmul.msk.f32.gmra.mxu2 %vm2968_vm0, %v8312_v14  ;;  %v8935_v43 = vpop.f32.mrf.mxu2  ;;  %v8937_v59 = vpop.f32.mrf.mxu0 }
 0x44a   :  { %6436 = vmatmul.msk.f32.gmra.mxu0 %vm2968_vm0, %v8721_v11  ;;  %6456 = vmatmul.msk.f32.gmra.mxu1 %vm2968_vm0, %v7566_v39  ;;  %10006 = vst [vmem:[#allocation88_spill] sm:$0xff] %v8935_v43 }
 0x44f   :  { %v8943_v44 = vpop.f32.mrf.mxu1 }
 0x451   :  { %6406 = vmatmul.msk.f32.gmra.mxu3 %vm2968_vm0, %v8377_v52  ;;  %6475 = vmatmul.msk.f32.gmra.mxu2 %vm2968_vm0, %v8377_v52  ;;  %v8947_v61 = vpop.f32.mrf.mxu2 }
 0x452   :  { %6437 = vmatmul.msk.f32.gmra.mxu0 %vm2968_vm0, %v8788_v35  ;;  %6457 = vmatmul.msk.f32.gmra.mxu1 %vm2968_vm0, %v8581_v23  ;;  %10007 = vst [vmem:[#allocation53_spill] sm:$0xff] %v8947_v61  ;;  %v4809_v61 = vld [vmem:[%s9790_s5 + $0x48] sm:$0xff] }
 0x454   :  { %v3216_v14 = vpop.f32.mrf.mxu3 }
 0x455   :  { %v3378_v5 = vadd.f32 %v3377_v38, %v3216_v14  ;;  %v8953_v38 = vpop.f32.mrf.mxu0 }
 0x457   :  { %v8969_v42 = vpop.f32.mrf.mxu1 }
 0x459   :  { %6407 = vmatmul.msk.f32.gmra.mxu3 %vm2968_vm0, %v8431_v55  ;;  %6476 = vmatmul.msk.f32.gmra.mxu2 %vm2968_vm0, %v8431_v55  ;;  %v4810_v55 = vld [vmem:[%s9790_s5 + $0x50] sm:$0xff]  ;;  %v8967_v43 = vpop.f32.mrf.mxu2 }
 0x45a   :  { %6458 = vmatmul.msk.f32.gmra.mxu1 %vm2968_vm0, %v8647_v6  ;;  %6438 = vmatmul.msk.f32.gmra.mxu0 %vm2968_vm0, %v8949_v37  ;;  %10008 = vst [vmem:[#allocation18_spill] sm:$0xff] %v8967_v43  ;;  %v4928_v43 = vld [vmem:[%s9790_s5 + $0x78] sm:$0xff] }
 0x45b   :  { %4861 = vmatpush.msra.mxu0 %v4810_v55  ;;  %v3309_v55 = vadd.f32 %v8423_v56, %v8490_v17  ;;  %4977 = vmatpush.msra.mxu1 %v4928_v43  ;;  %v4926_v43 = vld [vmem:[%s9790_s5 + $0x68] sm:$0xff] }
 0x45c   :  { %v3711_v52 = vpop.f32.mrf.mxu3 }
 0x45d   :  { %4862 = vmatpush.msra.mxu0 %v4809_v61  ;;  %v4927_v61 = vld [vmem:[%s9790_s5 + $0x70] sm:$0xff]  ;;  %v3570_v56 = vadd.f32 %v8545_v40, %v3309_v55 }
 0x45e   :  { %4978 = vmatpush.msra.mxu1 %v4927_v61 }
 0x45f   :  { %v3783_v8 = vadd.f32 %v3711_v52, %v3570_v56  ;;  %v9005_v12 = vpop.f32.mrf.mxu1 }
 0x460   :  { %4979 = vmatpush.msra.mxu1 %v4926_v43 }
 0x461   :  { %6408 = vmatmul.msk.f32.gmra.mxu3 %vm2968_vm0, %v8468_v58  ;;  %6477 = vmatmul.msk.f32.gmra.mxu2 %vm2968_vm0, %v8468_v58  ;;  %v4808_v58 = vld [vmem:[%s9790_s5 + $0x40] sm:$0xff]  ;;  %v3997_v55 = vadd.f32 %v8899_v0, %v3783_v8 }
 0x462   :  { %6459 = vmatmul.msk.f32.gmra.mxu1 %vm2968_vm0, %v8721_v11  ;;  %4863 = vmatpush.msra.mxu0 %v4808_v58  ;;  %v8990_v58 = vpop.f32.mrf.mxu0  ;;  %v9022_v8 = vld [vmem:[%s9791_s4] ss:$0 sm:$0xff] }
 0x463   :  { %6511 = vmatmul.msk.f32.vlgmr.msra.gmra.mxu0 %vm2968_vm0, %v8974_v16  ;;  %4980 = vmatpush.msra.mxu1 %v4925_v13  ;;  %v4211_v13 = vadd.f32 %v8903_v21, %v3997_v55  ;;  %v4614_v0 = vld [vmem:[%s9790_s5 + $0x20] sm:$0xff] }
 0x464   :  { %v3714_v14 = vpop.f32.mrf.mxu3  ;;  %4669 = vmatpush.msra.mxu3 %v4614_v0 }
 0x469   :  { %6409 = vmatmul.msk.f32.gmra.mxu3 %vm2968_vm0, %v7493_v27  ;;  %6478 = vmatmul.msk.f32.gmra.mxu2 %vm2968_vm0, %v7493_v27  ;;  %v3312_v27 = vadd.f32 %v8451_v28, %v8520_v60 }
 0x46a   :  { %6460 = vmatmul.msk.f32.gmra.mxu1 %vm2968_vm0, %v8788_v35 }
 0x46b   :  { %v3571_v40 = vadd.f32 %v8575_v48, %v3312_v27  ;;  %v9024_v48 = vld [vmem:[#allocation2 + $0xe0] sm:$0xff] }
 0x46c   :  { %v3717_v17 = vpop.f32.mrf.mxu3  ;;  %v3567_v1 = vpop.f32.mrf.mxu2 }
 0x46d   :  { %v9000_v34 = vadd.f32 %v3567_v1, %v3378_v5  ;;  %v3784_v28 = vadd.f32 %v3714_v14, %v3571_v40  ;;  %v9015_v5 = vpop.f32.mrf.mxu0 }
 0x46f   :  { %v3998_v52 = vadd.f32 %v8920_v53, %v3784_v28  ;;  %v3315_v53 = vadd.f32 %v8459_v41, %v8552_v32  ;;  %v3318_v41 = vadd.f32 %v8472_v46, %v8586_v29 }
 0x471   :  { %6410 = vmatmul.msk.f32.gmra.mxu3 %vm2968_vm0, %v7566_v39  ;;  %6479 = vmatmul.msk.f32.gmra.mxu2 %vm2968_vm0, %v7566_v39  ;;  %v9026_v39 = vpop.f32.mrf.mxu1  ;;  %v3572_v21 = vadd.f32 %v8605_v3, %v3315_v53  ;;  %v4212_v43 = vadd.f32 %v8925_v50, %v3998_v52  ;;  %v3573_v3 = vadd.f32 %v8620_v47, %v3318_v41  ;;  %v10010_v41 = vld [vmem:[#allocation10_spill] sm:$0xff] }
 0x472   :  { %6461 = vmatmul.msk.f32.gmra.mxu1 %vm2968_vm0, %v8949_v37 }
 0x473   :  { %v3785_v40 = vadd.f32 %v3717_v17, %v3572_v21 }
 0x474   :  { %v3720_v60 = vpop.f32.mrf.mxu3  ;;  %v4353_v1 = vpop.f32.mrf.mxu2 }
 0x475   :  { %v4425_v61 = vadd.f32 %v4353_v1, %v4211_v13  ;;  %v9042_v28 = vpop.f32.mrf.mxu0  ;;  %v3999_v1 = vadd.f32 %v8937_v59, %v3785_v40  ;;  %v3786_v13 = vadd.f32 %v3720_v60, %v3573_v3  ;;  %v5042_v3 = vld [vmem:[%s9790_s5 + $0x80] sm:$0xff] }
 0x477   :  { %v4453_v14 = vadd.f32 %v9022_v8, %v4425_v61  ;;  %v4213_v53 = vadd.f32 %v8943_v44, %v3999_v1  ;;  %v4000_v47 = vadd.f32 %v8953_v38, %v3786_v13  ;;  %v5045_v44 = vld [vmem:[%s9790_s5 + $0x98] sm:$0xff] }
 0x478   :  { %5094 = vmatpush.msrb.mxu2 %v5045_v44  ;;  %v9101_v44 = vld [vmem:[#allocation2 + $0x8] sm:$0xff] }
 0x479   :  { %6411 = vmatmul.msk.f32.gmra.mxu3 %vm2968_vm0, %v8581_v23  ;;  %6480 = vmatmul.msk.f32.gmra.mxu2 %vm2968_vm0, %v8581_v23  ;;  %v4501_v32 = vmul.f32 0.2, %v4453_v14  ;;  %vm4477_vm4 = vcmp.ge.f32.partialorder %v4453_v14, 0.0  ;;  %v9053_v17 = vpop.f32.mrf.mxu1 }
 0x47a   :  { %6462 = vmatmul.msk.f32.gmra.mxu1 %vm2968_vm0, %v9024_v48 }
 0x47b   :  { %v4525_v46 = vsel %vm4477_vm4, %v4453_v14, %v4501_v32 }
 0x47c   :  { %v3723_v56 = vpop.f32.mrf.mxu3  ;;  %v4356_v27 = vpop.f32.mrf.mxu2 }
 0x47d   :  { %v4426_v55 = vadd.f32 %v4356_v27, %v4212_v43  ;;  %v9058_v21 = vpop.f32.mrf.mxu0  ;;  %v4214_v43 = vadd.f32 %v8969_v42, %v4000_v47  ;;  %v10009_v42 = vld [vmem:[#allocation5_spill] sm:$0xff] }
 0x47e   :  { %v3324_v32 = vadd.f32 %v10010_v41, %v10009_v42 }
 0x47f   :  { %v4454_v23 = vadd.f32 %v9022_v8, %v4426_v55 }
 0x480   :  { %v3575_v1 = vadd.f32 %v8670_v57, %v3324_v32 }
 0x481   :  { %6412 = vmatmul.msk.f32.gmra.mxu3 %vm2968_vm0, %v8647_v6  ;;  %vm4478_vm5 = vcmp.ge.f32.partialorder %v4454_v23, 0.0  ;;  %v4502_v50 = vmul.f32 0.2, %v4454_v23  ;;  %6481 = vmatmul.msk.f32.gmra.mxu2 %vm2968_vm0, %v8647_v6  ;;  %v3321_v6 = vadd.f32 %v8505_v31, %v8607_v33  ;;  %v9072_v27 = vpop.f32.mrf.mxu1  ;;  %v5044_v31 = vld [vmem:[%s9790_s5 + $0x90] sm:$0xff] }
 0x482   :  { %5095 = vmatpush.msrb.mxu2 %v5044_v31 }
 0x483   :  { %v4526_v29 = vsel %vm4478_vm5, %v4454_v23, %v4502_v50  ;;  %v3574_v60 = vadd.f32 %v8645_v2, %v3321_v6  ;;  %v5043_v2 = vld [vmem:[%s9790_s5 + $0x88] sm:$0xff] }
 0x484   :  { %v3726_v52 = vpop.f32.mrf.mxu3  ;;  %v4549_v61 = vmax.f32 %v4525_v46, %v4526_v29  ;;  %v4359_v0 = vpop.f32.mrf.mxu2  ;;  %5096 = vmatpush.msrb.mxu2 %v5043_v2 }
 0x485   :  { %v4427_v59 = vadd.f32 %v4359_v0, %v4213_v53  ;;  %v3787_v33 = vadd.f32 %v3723_v56, %v3574_v60  ;;  %v9098_v46 = vpop.f32.mrf.mxu0  ;;  %v3788_v29 = vadd.f32 %v3726_v52, %v3575_v1  ;;  %v10011_v52 = vld [vmem:[#allocation81_spill] sm:$0xff] }
 0x486   :  { %4574 = vst.msk [vmem:[#allocation2 + $0x18] sm:$0xff] %vm2968_vm0, %v4549_v61  ;;  %5097 = vmatpush.msrb.mxu2 %v5042_v3  ;;  %v3327_v60 = vadd.f32 %v10011_v52, %v8649_v45  ;;  %v10013_v45 = vld [vmem:[#allocation80_spill] sm:$0xff] }
 0x487   :  { %v4455_v38 = vadd.f32 %v9022_v8, %v4427_v59  ;;  %v4001_v50 = vadd.f32 %v8990_v58, %v3787_v33  ;;  %v4002_v58 = vadd.f32 %v9015_v5, %v3788_v29 }
 0x489   :  { %6413 = vmatmul.msk.f32.gmra.mxu3 %vm2968_vm0, %v8721_v11  ;;  %6482 = vmatmul.msk.f32.gmra.mxu2 %vm2968_vm0, %v8721_v11  ;;  %v4503_v23 = vmul.f32 0.2, %v4455_v38  ;;  %vm4479_vm6 = vcmp.ge.f32.partialorder %v4455_v38, 0.0  ;;  %v4215_v6 = vadd.f32 %v9005_v12, %v4001_v50  ;;  %v9103_v57 = vpop.f32.mrf.mxu1  ;;  %v4216_v31 = vadd.f32 %v9026_v39, %v4002_v58 }
 0x48b   :  { %v4527_v61 = vsel %vm4479_vm6, %v4455_v38, %v4503_v23  ;;  %v10012_v38 = vld [vmem:[#allocation13_spill] sm:$0xff] }
 0x48c   :  { %v3729_v14 = vpop.f32.mrf.mxu3  ;;  %v4362_v40 = vpop.f32.mrf.mxu2  ;;  %v3576_v12 = vadd.f32 %v10012_v38, %v3327_v60 }
 0x48d   :  { %v4428_v11 = vadd.f32 %v4362_v40, %v4214_v43  ;;  %v9077_v55 = vld [vmem:[#allocation2 + $0x18] sm:$0xff]  ;;  %v9116_v33 = vpop.f32.mrf.mxu0 }
 0x48e   :  { %6512 = vmatmul.msk.f32.gmra.mxu0 %vm2968_vm0, %v9077_v55  ;;  %6523 = vmatmul.msk.f32.vlgmr.msra.gmra.mxu1 %vm2968_vm0, %v9077_v55 }
 0x48f   :  { %v4456_v56 = vadd.f32 %v9022_v8, %v4428_v11  ;;  %v3789_v11 = vadd.f32 %v3729_v14, %v3576_v12 }
 0x491   :  { %6414 = vmatmul.msk.f32.gmra.mxu3 %vm2968_vm0, %v8788_v35  ;;  %vm4480_vm7 = vcmp.ge.f32.partialorder %v4456_v56, 0.0  ;;  %v4504_v13 = vmul.f32 0.2, %v4456_v56  ;;  %6483 = vmatmul.msk.f32.gmra.mxu2 %vm2968_vm0, %v8788_v35  ;;  %v9127_v39 = vpop.f32.mrf.mxu1 }
 0x493   :  { %v4528_v0 = vsel %vm4480_vm7, %v4456_v56, %v4504_v13  ;;  %v4003_v56 = vadd.f32 %v9042_v28, %v3789_v11 }
 0x494   :  { %v3732_v53 = vpop.f32.mrf.mxu3  ;;  %v4550_v47 = vmax.f32 %v4527_v61, %v4528_v0  ;;  %v4365_v59 = vpop.f32.mrf.mxu2 }
 0x495   :  { %v4429_v35 = vadd.f32 %v4365_v59, %v4215_v6  ;;  %v9136_v59 = vpop.f32.mrf.mxu0 }
 0x496   :  { %4575 = vst.msk [vmem:[#allocation2 + $0x20] sm:$0xff] %vm2968_vm0, %v4550_v47  ;;  %v4217_v47 = vadd.f32 %v9053_v17, %v4003_v56 }
 0x497   :  { %v4457_v43 = vadd.f32 %v9022_v8, %v4429_v35 }
 0x499   :  { %6487 = vmatmul.msk.f32.vlgmr.msra.gmra.mxu3 %vm2968_vm0, %v9101_v44  ;;  %6484 = vmatmul.msk.f32.gmra.mxu2 %vm2968_vm0, %v8949_v37  ;;  %v10014_v37 = vld [vmem:[#allocation40_spill] sm:$0xff]  ;;  %v4505_v32 = vmul.f32 0.2, %v4457_v43  ;;  %vm4481_vm8 = vcmp.ge.f32.partialorder %v4457_v43, 0.0  ;;  %v9145_v35 = vpop.f32.mrf.mxu1 }
 0x49a   :  { %v3330_v41 = vadd.f32 %v10014_v37, %v10013_v45 }
 0x49b   :  { %v4529_v50 = vsel %vm4481_vm8, %v4457_v43, %v4505_v32 }
 0x49c   :  { %v3735_v40 = vpop.f32.mrf.mxu3  ;;  %v4368_v5 = vpop.f32.mrf.mxu2  ;;  %v3577_v14 = vadd.f32 %v8715_v24, %v3330_v41  ;;  %v4259_v24 = vld [vmem:[#allocation2 + $0xe8] sm:$0xff] }
 0x49d   :  { %v4430_v2 = vadd.f32 %v4368_v5, %v4216_v31  ;;  %v9118_v42 = vld [vmem:[#allocation2 + $0x20] sm:$0xff]  ;;  %v3958_v45 = vpop.f32.mrf.mxu0 }
 0x49e   :  { %6513 = vmatmul.msk.f32.gmra.mxu0 %vm2968_vm0, %v9118_v42  ;;  %6524 = vmatmul.msk.f32.gmra.mxu1 %vm2968_vm0, %v9118_v42  ;;  %v3790_v1 = vadd.f32 %v3732_v53, %v3577_v14  ;;  %v10016_v53 = vld [vmem:[#allocation44_spill] sm:$0xff] }
 0x49f   :  { %v4458_v23 = vadd.f32 %v9022_v8, %v4430_v2 }
 0x4a0   :  { %v4004_v28 = vadd.f32 %v9058_v21, %v3790_v1  ;;  %v4601_v21 = vld [vmem:[%s9790_s5 + $0x18] sm:$0xff] }
 0x4a1   :  { %6488 = vmatmul.msk.f32.gmra.mxu3 %vm2968_vm0, %v8974_v16  ;;  %vm4482_vm9 = vcmp.ge.f32.partialorder %v4458_v23, 0.0  ;;  %v4506_v3 = vmul.f32 0.2, %v4458_v23  ;;  %6485 = vmatmul.msk.f32.gmra.mxu2 %vm2968_vm0, %v9024_v48  ;;  %v10015_v48 = vld [vmem:[#allocation84_spill] sm:$0xff]  ;;  %v4172_v56 = vpop.f32.mrf.mxu1 }
 0x4a2   :  { %v3333_v58 = vadd.f32 %v10016_v53, %v10015_v48  ;;  %v4218_v38 = vadd.f32 %v9072_v27, %v4004_v28  ;;  %4755 = vmatpush.msrb.mxu3 %v4601_v21 }
 0x4a3   :  { %v4530_v13 = vsel %vm4482_vm9, %v4458_v23, %v4506_v3 }
 0x4a4   :  { %v3738_v29 = vpop.f32.mrf.mxu3  ;;  %v4551_v61 = vmax.f32 %v4529_v50, %v4530_v13  ;;  %v4371_v0 = vpop.f32.mrf.mxu2  ;;  %v3578_v17 = vadd.f32 %v8740_v20, %v3333_v58  ;;  %v10017_v20 = vld [vmem:[#allocation9_spill] sm:$0xff] }
 0x4a5   :  { %v4431_v6 = vadd.f32 %v4371_v0, %v4217_v47  ;;  %v3336_v11 = vadd.f32 %v10017_v20, %v8717_v25 }
 0x4a6   :  { %4576 = vst.msk [vmem:[#allocation2 + $0x28] sm:$0xff] %vm2968_vm0, %v4551_v61  ;;  %v3791_v43 = vadd.f32 %v3735_v40, %v3578_v17 }
 0x4a7   :  { %v4459_v52 = vadd.f32 %v9022_v8, %v4431_v6  ;;  %v3579_v40 = vadd.f32 %v8759_v30, %v3336_v11 }
 0x4a8   :  { %v4005_v37 = vadd.f32 %v9098_v46, %v3791_v43  ;;  %v10018_v46 = vld [vmem:[#allocation76_spill] sm:$0xff] }
 0x4a9   :  { %6489 = vmatmul.msk.f32.gmra.mxu3 %vm2968_vm0, %v9077_v55  ;;  %6486 = vmatmul.msk.f32.gmra.mxu2 %vm2968_vm0, %v4259_v24  ;;  %v4507_v27 = vmul.f32 0.2, %v4459_v52  ;;  %vm4483_vm10 = vcmp.ge.f32.partialorder %v4459_v52, 0.0  ;;  %v3792_v32 = vadd.f32 %v3738_v29, %v3579_v40  ;;  %v3339_v61 = vadd.f32 %v10018_v46, %v8742_v54  ;;  %v3961_v29 = vpop.f32.mrf.mxu0  ;;  %v4175_v53 = vpop.f32.mrf.mxu1  ;;  %v10019_v54 = vld [vmem:[#allocation48_spill] sm:$0xff]  ;;  %v10020_v40 = vld [vmem:[#allocation47_spill] sm:$0xff] }
 0x4aa   :  { %v4219_v50 = vadd.f32 %v9103_v57, %v4005_v37  ;;  %v3345_v37 = vadd.f32 %v10020_v40, %v8776_v63  ;;  %v3348_v63 = vadd.f32 %v8719_v51, %v8794_v7 }
 0x4ab   :  { %v4531_v23 = vsel %vm4483_vm10, %v4459_v52, %v4507_v27  ;;  %v4006_v30 = vadd.f32 %v9116_v33, %v3792_v32  ;;  %v3580_v0 = vadd.f32 %v8774_v36, %v3339_v61  ;;  %v3342_v36 = vadd.f32 %v10019_v54, %v8761_v22 }
 0x4ac   :  { %v3741_v60 = vpop.f32.mrf.mxu3  ;;  %v4374_v12 = vpop.f32.mrf.mxu2  ;;  %v3351_v54 = vadd.f32 %v8744_v49, %v8808_v18  ;;  %v3354_v49 = vadd.f32 %v8763_v62, %v8825_v9 }
 0x4ad   :  { %v4432_v31 = vadd.f32 %v4374_v12, %v4218_v38  ;;  %v9153_v5 = vld [vmem:[#allocation2 + $0x28] sm:$0xff]  ;;  %v4220_v24 = vadd.f32 %v9127_v39, %v4006_v30  ;;  %v3793_v33 = vadd.f32 %v3741_v60, %v3580_v0  ;;  %v3581_v39 = vadd.f32 %v8792_v10, %v3342_v36  ;;  %v4600_v10 = vld [vmem:[%s9790_s5 + $0x10] sm:$0xff] }
 0x4ae   :  { %6514 = vmatmul.msk.f32.gmra.mxu0 %vm2968_vm0, %v9153_v5  ;;  %6525 = vmatmul.msk.f32.gmra.mxu1 %vm2968_vm0, %v9153_v5 }
 0x4af   :  { %v4460_v2 = vadd.f32 %v9022_v8, %v4432_v31  ;;  %v4007_v52 = vadd.f32 %v9136_v59, %v3793_v33  ;;  %4756 = vmatpush.msrb.mxu3 %v4600_v10 }
 0x4b1   :  { %6490 = vmatmul.msk.f32.gmra.mxu3 %vm2968_vm0, %v9118_v42  ;;  %vm4484_vm11 = vcmp.ge.f32.partialorder %v4460_v2, 0.0  ;;  %v4508_v41 = vmul.f32 0.2, %v4460_v2  ;;  %6535 = vmatmul.msk.f32.vlgmr.msrb.gmra.mxu2 %vm2968_vm0, %v9118_v42  ;;  %v3964_v43 = vpop.f32.mrf.mxu0  ;;  %v4221_v11 = vadd.f32 %v9145_v35, %v4007_v52 }
 0x4b3   :  { %v4532_v25 = vsel %vm4484_vm11, %v4460_v2, %v4508_v41  ;;  %v4178_v2 = vpop.f32.mrf.mxu1  ;;  %v3582_v41 = vadd.f32 %v8806_v4, %v3345_v37  ;;  %v10021_v37 = vld [vmem:[#allocation77_spill] sm:$0xff] }
 0x4b4   :  { %v3744_v14 = vpop.f32.mrf.mxu3  ;;  %v4552_v3 = vmax.f32 %v4531_v23, %v4532_v25  ;;  %v4377_v1 = vpop.f32.mrf.mxu2 }
 0x4b5   :  { %v4433_v13 = vadd.f32 %v4377_v1, %v4219_v50  ;;  %v3794_v38 = vadd.f32 %v3744_v14, %v3581_v39 }
 0x4b6   :  { %4577 = vst.msk [vmem:[#allocation2 + $0x30] sm:$0xff] %vm2968_vm0, %v4552_v3 }
 0x4b7   :  { %v4461_v47 = vadd.f32 %v9022_v8, %v4433_v13  ;;  %v4008_v59 = vadd.f32 %v3958_v45, %v3794_v38 }
 0x4b9   :  { %6491 = vmatmul.msk.f32.gmra.mxu3 %vm2968_vm0, %v9153_v5  ;;  %6536 = vmatmul.msk.f32.gmra.mxu2 %vm2968_vm0, %v9153_v5  ;;  %v4509_v58 = vmul.f32 0.2, %v4461_v47  ;;  %vm4485_vm12 = vcmp.ge.f32.partialorder %v4461_v47, 0.0  ;;  %v4222_v25 = vadd.f32 %v4172_v56, %v4008_v59  ;;  %v3967_v50 = vpop.f32.mrf.mxu0  ;;  %v3583_v56 = vadd.f32 %v8823_v19, %v3348_v63 }
 0x4ba   :  { %v3584_v19 = vadd.f32 %v8837_v15, %v3351_v54 }
 0x4bb   :  { %v4533_v21 = vsel %vm4485_vm12, %v4461_v47, %v4509_v58  ;;  %v4181_v46 = vpop.f32.mrf.mxu1 }
 0x4bc   :  { %v3747_v57 = vpop.f32.mrf.mxu3  ;;  %v4380_v28 = vpop.f32.mrf.mxu2 }
 0x4bd   :  { %v4434_v6 = vadd.f32 %v4380_v28, %v4220_v24  ;;  %v9180_v48 = vld [vmem:[#allocation2 + $0x30] sm:$0xff]  ;;  %v3795_v14 = vadd.f32 %v3747_v57, %v3582_v41 }
 0x4be   :  { %6515 = vmatmul.msk.f32.gmra.mxu0 %vm2968_vm0, %v9180_v48  ;;  %6526 = vmatmul.msk.f32.gmra.mxu1 %vm2968_vm0, %v9180_v48  ;;  %v10022_v41 = vld [vmem:[#allocation12_spill] sm:$0xff] }
 0x4bf   :  { %v4462_v17 = vadd.f32 %v9022_v8, %v4434_v6  ;;  %v4009_v30 = vadd.f32 %v3961_v29, %v3795_v14 }
 0x4c1   :  { %6492 = vmatmul.msk.f32.gmra.mxu3 %vm2968_vm0, %v9180_v48  ;;  %vm4486_vm13 = vcmp.ge.f32.partialorder %v4462_v17, 0.0  ;;  %v4510_v60 = vmul.f32 0.2, %v4462_v17  ;;  %6537 = vmatmul.msk.f32.gmra.mxu2 %vm2968_vm0, %v9180_v48  ;;  %v4223_v24 = vadd.f32 %v4175_v53, %v4009_v30  ;;  %v3970_v6 = vpop.f32.mrf.mxu0  ;;  %v10025_v30 = vld [vmem:[#allocation16_spill] sm:$0xff] }
 0x4c3   :  { %v4534_v12 = vsel %vm4486_vm13, %v4462_v17, %v4510_v60  ;;  %v4599_v17 = vld [vmem:[%s9790_s5 + $0x8] sm:$0xff]  ;;  %v4184_v39 = vpop.f32.mrf.mxu1 }
 0x4c4   :  { %v3750_v22 = vpop.f32.mrf.mxu3  ;;  %v4553_v31 = vmax.f32 %v4533_v21, %v4534_v12  ;;  %v4383_v20 = vpop.f32.mrf.mxu2  ;;  %4757 = vmatpush.msrb.mxu3 %v4599_v17  ;;  %v3585_v21 = vadd.f32 %v8851_v26, %v3354_v49  ;;  %v10023_v26 = vld [vmem:[#allocation42_spill] sm:$0xff] }
 0x4c5   :  { %v4435_v27 = vadd.f32 %v4383_v20, %v4221_v11  ;;  %v3796_v61 = vadd.f32 %v3750_v22, %v3583_v56  ;;  %v10024_v56 = vmov 0.0  }
 0x4c6   :  { %4578 = vst.msk [vmem:[#allocation2 + $0x38] sm:$0xff] %vm2968_vm0, %v4553_v31 }
 0x4c7   :  { %v4463_v32 = vadd.f32 %v9022_v8, %v4435_v27  ;;  %v4010_v28 = vadd.f32 %v3964_v43, %v3796_v61 }
 0x4c9   :  { %v4511_v4 = vmul.f32 0.2, %v4463_v32  ;;  %vm4487_vm14 = vcmp.ge.f32.partialorder %v4463_v32, 0.0  ;;  %v4224_v58 = vadd.f32 %v4178_v2, %v4010_v28  ;;  %v3973_v43 = vpop.f32.mrf.mxu0 }
 0x4cb   :  { %v4535_v0 = vsel %vm4487_vm14, %v4463_v32, %v4511_v4  ;;  %v4187_v27 = vpop.f32.mrf.mxu1  ;;  %v3357_v32 = vadd.f32 %v10022_v41, %v10021_v37 }
 0x4cc   :  { %v3753_v23 = vpop.f32.mrf.mxu3  ;;  %v4386_v35 = vpop.f32.mrf.mxu2 }
 0x4cd   :  { %v4436_v3 = vadd.f32 %v4386_v35, %v4222_v25  ;;  %v9204_v1 = vld [vmem:[#allocation2 + $0x38] sm:$0xff]  ;;  %v3797_v52 = vadd.f32 %v3753_v23, %v3584_v19  ;;  %v3586_v23 = vadd.f32 %v10023_v26, %v3357_v32 }
 0x4ce   :  { %6493 = vmatmul.msk.f32.gmra.mxu3 %vm2968_vm0, %v9204_v1  ;;  %6516 = vmatmul.msk.f32.gmra.mxu0 %vm2968_vm0, %v9204_v1 }
 0x4cf   :  { %v4464_v45 = vadd.f32 %v9022_v8, %v4436_v3  ;;  %6527 = vmatmul.msk.f32.gmra.mxu1 %vm2968_vm0, %v9204_v1  ;;  %6538 = vmatmul.msk.f32.gmra.mxu2 %vm2968_vm0, %v9204_v1  ;;  %v4011_v12 = vadd.f32 %v3967_v50, %v3797_v52  ;;  %v10028_v52 = vld [vmem:[#allocation50_spill] sm:$0xff] }
 0x4d1   :  { %vm4488_vm15 = vcmp.ge.f32.partialorder %v4464_v45, 0.0  ;;  %v4512_v13 = vmul.f32 0.2, %v4464_v45  ;;  %v4225_v59 = vadd.f32 %v4181_v46, %v4011_v12  ;;  %v3976_v14 = vpop.f32.mrf.mxu0 }
 0x4d3   :  { %v4536_v47 = vsel %vm4488_vm15, %v4464_v45, %v4512_v13  ;;  %v10026_v13 = vld [vmem:[#allocation83_spill] sm:$0xff] }
 0x4d4   :  { %v3756_v51 = vpop.f32.mrf.mxu3  ;;  %v4554_v7 = vmax.f32 %v4535_v0, %v4536_v47  ;;  %v4389_v57 = vpop.f32.mrf.mxu2  ;;  %v3360_v46 = vadd.f32 %v10026_v13, %v10025_v30  ;;  %v10034_v13 = vld [vmem:[#allocation73_spill] sm:$0xff] }
 0x4d5   :  { %v4437_v33 = vadd.f32 %v4389_v57, %v4223_v24  ;;  %v3798_v31 = vadd.f32 %v3756_v51, %v3585_v21  ;;  %v4190_v47 = vpop.f32.mrf.mxu1  ;;  %v10027_v51 = vld [vmem:[#allocation78_spill] sm:$0xff] }
 0x4d6   :  { %4579 = vst.msk [vmem:[#allocation2 + $0x40] sm:$0xff] %vm2968_vm0, %v4554_v7  ;;  %v3587_v7 = vadd.f32 %v10027_v51, %v3360_v46  ;;  %v10035_v46 = vld [vmem:[#allocation51_spill] sm:$0xff] }
 0x4d7   :  { %v4465_v29 = vadd.f32 %v9022_v8, %v4437_v33  ;;  %v4012_v2 = vadd.f32 %v3970_v6, %v3798_v31 }
 0x4d9   :  { %v4513_v18 = vmul.f32 0.2, %v4465_v29  ;;  %vm4489_vm1 = vcmp.ge.f32.partialorder %v4465_v29, 0.0  ;;  %v4226_v35 = vadd.f32 %v4184_v39, %v4012_v2 }
 0x4db   :  { %v4537_v20 = vsel %vm4489_vm1, %v4465_v29, %v4513_v18 }
 0x4dc   :  { %v3759_v36 = vpop.f32.mrf.mxu3  ;;  %v4392_v53 = vpop.f32.mrf.mxu2 }
 0x4dd   :  { %v4438_v60 = vadd.f32 %v4392_v53, %v4224_v58  ;;  %v9226_v38 = vld [vmem:[#allocation2 + $0x40] sm:$0xff]  ;;  %v3799_v50 = vadd.f32 %v3759_v36, %v3586_v23  ;;  %v3979_v36 = vpop.f32.mrf.mxu0  ;;  %v4193_v18 = vpop.f32.mrf.mxu1 }
 0x4de   :  { %6494 = vmatmul.msk.f32.gmra.mxu3 %vm2968_vm0, %v9226_v38  ;;  %6517 = vmatmul.msk.f32.gmra.mxu0 %vm2968_vm0, %v9226_v38  ;;  %v4598_v58 = vld [vmem:[%s9790_s5] sm:$0xff] }
 0x4df   :  { %v4466_v15 = vadd.f32 %v9022_v8, %v4438_v60  ;;  %6528 = vmatmul.msk.f32.gmra.mxu1 %vm2968_vm0, %v9226_v38  ;;  %6539 = vmatmul.msk.f32.gmra.mxu2 %vm2968_vm0, %v9226_v38  ;;  %v4013_v57 = vadd.f32 %v3973_v43, %v3799_v50  ;;  %v10029_v60 = vld [vmem:[#allocation41_spill] sm:$0xff] }
 0x4e0   :  { %4758 = vmatpush.msrb.mxu3 %v4598_v58  ;;  %v3363_v49 = vadd.f32 %v10029_v60, %v10028_v52  ;;  %v10038_v58 = vld [vmem:[#allocation86_spill] sm:$0xff]  ;;  %v5279_v52 = vld [vmem:[%s9790_s5 + $0xd8] sm:$0xff] }
 0x4e1   :  { %vm4490_vm2 = vcmp.ge.f32.partialorder %v4466_v15, 0.0  ;;  %v4514_v22 = vmul.f32 0.2, %v4466_v15  ;;  %v4227_v29 = vadd.f32 %v4187_v27, %v4013_v57  ;;  %5328 = vmatpush.msrb.mxu0 %v5279_v52  ;;  %v10039_v60 = vld [vmem:[#allocation53_spill] sm:$0xff] }
 0x4e3   :  { %v4538_v11 = vsel %vm4490_vm2, %v4466_v15, %v4514_v22  ;;  %v10030_v15 = vld [vmem:[#allocation85_spill] sm:$0xff] }
 0x4e4   :  { %v4555_v62 = vmax.f32 %v4537_v20, %v4538_v11  ;;  %v3762_v9 = vpop.f32.mrf.mxu3  ;;  %v4395_v10 = vpop.f32.mrf.mxu2  ;;  %v3588_v21 = vadd.f32 %v10030_v15, %v3363_v49 }
 0x4e5   :  { %v4439_v40 = vadd.f32 %v4395_v10, %v4225_v59  ;;  %v3800_v28 = vadd.f32 %v3762_v9, %v3587_v7  ;;  %v10032_v9 = vld [vmem:[#allocation6_spill] sm:$0xff]  ;;  %v3982_v2 = vpop.f32.mrf.mxu0 }
 0x4e6   :  { %4580 = vst.msk [vmem:[#allocation2 + $0x48] sm:$0xff] %vm2968_vm0, %v4555_v62  ;;  %v10031_v62 = vld [vmem:[#allocation15_spill] sm:$0xff] }
 0x4e7   :  { %v4467_v25 = vadd.f32 %v9022_v8, %v4439_v40  ;;  %v4014_v17 = vadd.f32 %v3976_v14, %v3800_v28  ;;  %v3366_v10 = vadd.f32 %v10032_v9, %v10031_v62  ;;  %v10033_v40 = vld [vmem:[#allocation54_spill] sm:$0xff]  ;;  %v4196_v14 = vpop.f32.mrf.mxu1 }
 0x4e9   :  { %v4515_v61 = vmul.f32 0.2, %v4467_v25  ;;  %vm4491_vm3 = vcmp.ge.f32.partialorder %v4467_v25, 0.0  ;;  %v4228_v22 = vadd.f32 %v4190_v47, %v4014_v17  ;;  %v3589_v37 = vadd.f32 %v10033_v40, %v3366_v10  ;;  %v10036_v47 = vld [vmem:[#allocation88_spill] sm:$0xff] }
 0x4eb   :  { %v4539_v33 = vsel %vm4491_vm3, %v4467_v25, %v4515_v61  ;;  %v3369_v61 = vadd.f32 %v10035_v46, %v10034_v13 }
 0x4ec   :  { %v4398_v3 = vpop.f32.mrf.mxu2  ;;  %v3765_v45 = vpop.f32.mrf.mxu3 }
 0x4ed   :  { %v4440_v63 = vadd.f32 %v4398_v3, %v4226_v35  ;;  %v9245_v4 = vld [vmem:[#allocation2 + $0x48] sm:$0xff]  ;;  %v3801_v31 = vadd.f32 %v3765_v45, %v3588_v21  ;;  %v3590_v51 = vadd.f32 %v10036_v47, %v3369_v61  ;;  %v5278_v21 = vld [vmem:[%s9790_s5 + $0xd0] sm:$0xff] }
 0x4ee   :  { %6495 = vmatmul.msk.f32.gmra.mxu3 %vm2968_vm0, %v9245_v4  ;;  %6518 = vmatmul.msk.f32.gmra.mxu0 %vm2968_vm0, %v9245_v4  ;;  %5440 = vst.msk [vmem:[#allocation2 + $0x48] sm:$0xff] %vm2968_vm0, %v10024_v56  ;;  %v5161_v61 = vld [vmem:[%s9790_s5 + $0xb0] sm:$0xff] }
 0x4ef   :  { %v4468_v0 = vadd.f32 %v9022_v8, %v4440_v63  ;;  %6529 = vmatmul.msk.f32.gmra.mxu1 %vm2968_vm0, %v9245_v4  ;;  %6540 = vmatmul.msk.f32.gmra.mxu2 %vm2968_vm0, %v9245_v4  ;;  %v4015_v41 = vadd.f32 %v3979_v36, %v3801_v31  ;;  %v10037_v36 = vld [vmem:[#allocation45_spill] sm:$0xff]  ;;  %v5277_v31 = vld [vmem:[%s9790_s5 + $0xc8] sm:$0xff] }
 0x4f0   :  { %v3372_v17 = vadd.f32 %v10038_v58, %v10037_v36  ;;  %5329 = vmatpush.msrb.mxu0 %v5278_v21 }
 0x4f1   :  { %vm4492_vm4 = vcmp.ge.f32.partialorder %v4468_v0, 0.0  ;;  %v4516_v24 = vmul.f32 0.2, %v4468_v0  ;;  %v4229_v63 = vadd.f32 %v4193_v18, %v4015_v41  ;;  %v10040_v41 = vld [vmem:[#allocation19_spill] sm:$0xff] }
 0x4f2   :  { %v3591_v49 = vadd.f32 %v10039_v60, %v3372_v17  ;;  %5330 = vmatpush.msrb.mxu0 %v5277_v31 }
 0x4f3   :  { %v4540_v6 = vsel %vm4492_vm4, %v4468_v0, %v4516_v24  ;;  %v3985_v0 = vpop.f32.mrf.mxu0  ;;  %v5162_v24 = vld [vmem:[%s9790_s5 + $0xb8] sm:$0xff] }
 0x4f4   :  { %v4556_v54 = vmax.f32 %v4539_v33, %v4540_v6  ;;  %v4401_v19 = vpop.f32.mrf.mxu2  ;;  %v3768_v53 = vpop.f32.mrf.mxu3  ;;  %5211 = vmatpush.msra.mxu3 %v5162_v24 }
 0x4f5   :  { %v4441_v39 = vadd.f32 %v4401_v19, %v4227_v29  ;;  %v3802_v23 = vadd.f32 %v3768_v53, %v3589_v37  ;;  %v4199_v29 = vpop.f32.mrf.mxu1 }
 0x4f6   :  { %4581 = vst.msk [vmem:[#allocation2 + $0x50] sm:$0xff] %vm2968_vm0, %v4556_v54  ;;  %5212 = vmatpush.msra.mxu3 %v5161_v61  ;;  %v5586_v61 = vld [vmem:[%s9793_s7 + $0x50] sm:$0xff] }
 0x4f7   :  { %v4469_v12 = vadd.f32 %v9022_v8, %v4441_v39  ;;  %v4016_v45 = vadd.f32 %v3982_v2, %v3802_v23  ;;  %v10042_v23 = vld [vmem:[#allocation18_spill] sm:$0xff] }
 0x4f9   :  { %v4517_v59 = vmul.f32 0.2, %v4469_v12  ;;  %vm4493_vm5 = vcmp.ge.f32.partialorder %v4469_v12, 0.0  ;;  %v4230_v57 = vadd.f32 %v4196_v14, %v4016_v45 }
 0x4fb   :  { %v4541_v25 = vsel %vm4493_vm5, %v4469_v12, %v4517_v59  ;;  %v5276_v59 = vld [vmem:[%s9790_s5 + $0xc0] sm:$0xff] }
 0x4fc   :  { %v4404_v43 = vpop.f32.mrf.mxu2  ;;  %v3771_v26 = vpop.f32.mrf.mxu3  ;;  %5331 = vmatpush.msrb.mxu0 %v5276_v59 }
 0x4fd   :  { %v4442_v20 = vadd.f32 %v4404_v43, %v4228_v22  ;;  %v9269_v11 = vld [vmem:[#allocation2 + $0x50] sm:$0xff]  ;;  %v3803_v6 = vadd.f32 %v3771_v26, %v3590_v51  ;;  %v4202_v37 = vpop.f32.mrf.mxu1 }
 0x4fe   :  { %6496 = vmatmul.msk.f32.gmra.mxu3 %vm2968_vm0, %v9269_v11  ;;  %6519 = vmatmul.msk.f32.gmra.mxu0 %vm2968_vm0, %v9269_v11  ;;  %5441 = vst.msk [vmem:[#allocation2 + $0x50] sm:$0xff] %vm2968_vm0, %v10024_v56 }
 0x4ff   :  { %v4470_v27 = vadd.f32 %v9022_v8, %v4442_v20  ;;  %6530 = vmatmul.msk.f32.gmra.mxu1 %vm2968_vm0, %v9269_v11  ;;  %6541 = vmatmul.msk.f32.gmra.mxu2 %vm2968_vm0, %v9269_v11  ;;  %v4017_v18 = vadd.f32 %v3985_v0, %v3803_v6  ;;  %v3988_v20 = vpop.f32.mrf.mxu0 }
 0x501   :  { %vm4494_vm6 = vcmp.ge.f32.partialorder %v4470_v27, 0.0  ;;  %v4518_v32 = vmul.f32 0.2, %v4470_v27  ;;  %v4231_v10 = vadd.f32 %v4199_v29, %v4017_v18 }
 0x503   :  { %v4542_v35 = vsel %vm4494_vm6, %v4470_v27, %v4518_v32  ;;  %v10041_v32 = vld [vmem:[#allocation7_spill] sm:$0xff] }
 0x504   :  { %v4557_v3 = vmax.f32 %v4541_v25, %v4542_v35  ;;  %v4407_v50 = vpop.f32.mrf.mxu2  ;;  %v3774_v28 = vpop.f32.mrf.mxu3  ;;  %v3375_v26 = vadd.f32 %v10041_v32, %v10040_v41 }
 0x505   :  { %v4443_v30 = vadd.f32 %v4407_v50, %v4229_v63  ;;  %v3804_v12 = vadd.f32 %v3774_v28, %v3591_v49  ;;  %v4205_v0 = vpop.f32.mrf.mxu1 }
 0x506   :  { %4582 = vst.msk [vmem:[#allocation2 + $0x58] sm:$0xff] %vm2968_vm0, %v4557_v3  ;;  %v3592_v25 = vadd.f32 %v10042_v23, %v3375_v26 }
 0x507   :  { %v4471_v7 = vadd.f32 %v9022_v8, %v4443_v30  ;;  %v4018_v2 = vadd.f32 %v3988_v20, %v3804_v12  ;;  %v3991_v30 = vpop.f32.mrf.mxu0  ;;  %v5041_v20 = vld [vmem:[#allocation2 + $0x78] sm:$0xff] }
 0x509   :  { %v4519_v39 = vmul.f32 0.2, %v4471_v7  ;;  %vm4495_vm7 = vcmp.ge.f32.partialorder %v4471_v7, 0.0  ;;  %v4232_v14 = vadd.f32 %v4202_v37, %v4018_v2 }
 0x50b   :  { %v4543_v22 = vsel %vm4495_vm7, %v4471_v7, %v4519_v39 }
 0x50c   :  { %v4410_v33 = vpop.f32.mrf.mxu2  ;;  %v3777_v27 = vpop.f32.mrf.mxu3 }
 0x50d   :  { %v4444_v54 = vadd.f32 %v4410_v33, %v4230_v57  ;;  %v9293_v19 = vld [vmem:[#allocation2 + $0x58] sm:$0xff]  ;;  %v3805_v50 = vadd.f32 %v3777_v27, %v3592_v25  ;;  %v9343_v33 = vld [vmem:[#allocation2] sm:$0xff]  ;;  %v4208_v39 = vpop.f32.mrf.mxu1 }
 0x50e   :  { %6497 = vmatmul.msk.f32.gmra.mxu3 %vm2968_vm0, %v9293_v19  ;;  %6520 = vmatmul.msk.f32.gmra.mxu0 %vm2968_vm0, %v9293_v19  ;;  %5442 = vst.msk [vmem:[#allocation2 + $0x58] sm:$0xff] %vm2968_vm0, %v10024_v56 }
 0x50f   :  { %v4472_v53 = vadd.f32 %v9022_v8, %v4444_v54  ;;  %6531 = vmatmul.msk.f32.gmra.mxu1 %vm2968_vm0, %v9293_v19  ;;  %6542 = vmatmul.msk.f32.gmra.mxu2 %vm2968_vm0, %v9293_v19  ;;  %v4019_v51 = vadd.f32 %v3991_v30, %v3805_v50  ;;  %v3994_v36 = vpop.f32.mrf.mxu0  ;;  %v5275_v50 = vld [vmem:[#allocation2 + $0x88] sm:$0xff] }
 0x511   :  { %vm4496_vm8 = vcmp.ge.f32.partialorder %v4472_v53, 0.0  ;;  %v4520_v15 = vmul.f32 0.2, %v4472_v53  ;;  %v4233_v29 = vadd.f32 %v4205_v0, %v4019_v51  ;;  %v5470_v0 = vld [vmem:[%s9793_s7 + $0x30] sm:$0xff] }
 0x513   :  { %v4544_v43 = vsel %vm4496_vm8, %v4472_v53, %v4520_v15 }
 0x514   :  { %v4558_v62 = vmax.f32 %v4543_v22, %v4544_v43  ;;  %v4413_v9 = vpop.f32.mrf.mxu2  ;;  %v3780_v47 = vpop.f32.mrf.mxu3 }
 0x515   :  { %v4445_v40 = vadd.f32 %v4413_v9, %v4231_v10  ;;  %v3806_v57 = vadd.f32 %v3780_v47, %v9000_v34 }
 0x516   :  { %4583 = vst.msk [vmem:[#allocation2 + $0x60] sm:$0xff] %vm2968_vm0, %v4558_v62 }
 0x517   :  { %v4473_v35 = vadd.f32 %v9022_v8, %v4445_v40  ;;  %v4020_v58 = vadd.f32 %v3994_v36, %v3806_v57  ;;  %v9439_v2 = vpop.f32.mrf.mxu0  ;;  %v5585_v36 = vld [vmem:[%s9793_s7 + $0x48] sm:$0xff] }
 0x519   :  { %v4521_v13 = vmul.f32 0.2, %v4473_v35  ;;  %vm4497_vm9 = vcmp.ge.f32.partialorder %v4473_v35, 0.0  ;;  %v4234_v52 = vadd.f32 %v4208_v39, %v4020_v58  ;;  %v5469_v58 = vld [vmem:[%s9793_s7 + $0x28] sm:$0xff] }
 0x51b   :  { %v4545_v24 = vsel %vm4497_vm9, %v4473_v35, %v4521_v13  ;;  %v5587_v35 = vld [vmem:[%s9793_s7 + $0x58] sm:$0xff] }
 0x51c   :  { %v4416_v3 = vpop.f32.mrf.mxu2 }
 0x51d   :  { %v4446_v63 = vadd.f32 %v4416_v3, %v4232_v14  ;;  %v9326_v45 = vld [vmem:[#allocation2 + $0x60] sm:$0xff] }
 0x51e   :  { %6498 = vmatmul.msk.f32.gmra.mxu3 %vm2968_vm0, %v9326_v45  ;;  %6521 = vmatmul.msk.f32.gmra.mxu0 %vm2968_vm0, %v9326_v45  ;;  %5443 = vst.msk [vmem:[#allocation2 + $0x60] sm:$0xff] %vm2968_vm0, %v10024_v56 }
 0x51f   :  { %v4474_v46 = vadd.f32 %v9022_v8, %v4446_v63  ;;  %6532 = vmatmul.msk.f32.gmra.mxu1 %vm2968_vm0, %v9326_v45  ;;  %6543 = vmatmul.msk.f32.gmra.mxu2 %vm2968_vm0, %v9326_v45  ;;  %v9447_v41 = vpop.f32.mrf.mxu0 }
 0x521   :  { %vm4498_vm10 = vcmp.ge.f32.partialorder %v4474_v46, 0.0  ;;  %v4522_v7 = vmul.f32 0.2, %v4474_v46 }
 0x523   :  { %v4546_v28 = vsel %vm4498_vm10, %v4474_v46, %v4522_v7  ;;  %v5460_v46 = vld [vmem:[%s9793_s7 + $0x10] sm:$0xff] }
 0x524   :  { %v4559_v6 = vmax.f32 %v4545_v24, %v4546_v28  ;;  %v4419_v54 = vpop.f32.mrf.mxu2  ;;  %v5459_v28 = vld [vmem:[%s9793_s7 + $0x8] sm:$0xff] }
 0x525   :  { %v4447_v17 = vadd.f32 %v4419_v54, %v4233_v29  ;;  %v5458_v54 = vld [vmem:[%s9793_s7] sm:$0xff] }
 0x526   :  { %4584 = vst.msk [vmem:[#allocation2 + $0x68] sm:$0xff] %vm2968_vm0, %v4559_v6  ;;  %6499 = vmatmul.msk.f32.vlgmr.msrb.gmra.mxu3 %vm2968_vm0, %v9343_v33 }
 0x527   :  { %v4475_v53 = vadd.f32 %v9022_v8, %v4447_v17  ;;  %v9453_v32 = vpop.f32.mrf.mxu0  ;;  %v5468_v17 = vld [vmem:[%s9793_s7 + $0x20] sm:$0xff] }
 0x529   :  { %v4523_v18 = vmul.f32 0.2, %v4475_v53  ;;  %vm4499_vm11 = vcmp.ge.f32.partialorder %v4475_v53, 0.0 }
 0x52b   :  { %v4547_v12 = vsel %vm4499_vm11, %v4475_v53, %v4523_v18  ;;  %v5462_v53 = vld [vmem:[#allocation2 + $0x8] sm:$0xff] }
 0x52c   :  { %v4422_v34 = vpop.f32.mrf.mxu2 }
 0x52d   :  { %v4448_v60 = vadd.f32 %v4422_v34, %v4234_v52  ;;  %v9349_v49 = vld [vmem:[#allocation2 + $0x68] sm:$0xff]  ;;  %v5584_v34 = vld [vmem:[%s9793_s7 + $0x40] sm:$0xff] }
 0x52e   :  { %6500 = vmatmul.msk.f32.gmra.mxu3 %vm2968_vm0, %v9101_v44  ;;  %6522 = vmatmul.msk.f32.gmra.mxu0 %vm2968_vm0, %v9349_v49  ;;  %5444 = vst.msk [vmem:[#allocation2 + $0x68] sm:$0xff] %vm2968_vm0, %v10024_v56 }
 0x52f   :  { %v4476_v15 = vadd.f32 %v9022_v8, %v4448_v60  ;;  %6533 = vmatmul.msk.f32.gmra.mxu1 %vm2968_vm0, %v9349_v49  ;;  %6544 = vmatmul.msk.f32.gmra.mxu2 %vm2968_vm0, %v9349_v49  ;;  %v5160_v8 = vld [vmem:[%s9790_s5 + $0xa8] sm:$0xff]  ;;  %v9457_v26 = vpop.f32.mrf.mxu0  ;;  %v5863_v60 = vld [vmem:[%s9793_s7 + $0xd8] sm:$0xff] }
 0x530   :  { %5213 = vmatpush.msra.mxu3 %v5160_v8  ;;  %5894 = vmatpush.msra.mxu0 %v5863_v60 }
 0x531   :  { %vm4500_vm12 = vcmp.ge.f32.partialorder %v4476_v15, 0.0  ;;  %v4524_v21 = vmul.f32 0.2, %v4476_v15 }
 0x533   :  { %v4548_v44 = vsel %vm4500_vm12, %v4476_v15, %v4524_v21 }
 0x534   :  { %v4560_v22 = vmax.f32 %v4547_v12, %v4548_v44  ;;  %v5099_v21 = vpop.f32.mrf.mxu2  ;;  %v4982_v44 = vpop.f32.mrf.mxu1 }
 0x536   :  { %4585 = vst.msk [vmem:[#allocation2 + $0x70] sm:$0xff] %vm2968_vm0, %v4560_v22  ;;  %6501 = vmatmul.msk.f32.gmra.mxu3 %vm2968_vm0, %v8974_v16  ;;  %6559 = vmatmul.msk.f32.vlgmr.msrb.gmra.mxu0 %vm2968_vm0, %v9180_v48  ;;  %v9378_v16 = vpop.f32.mrf.mxu3 }
 0x53b   :  { %v9463_v23 = vpop.f32.mrf.mxu0 }
 0x53d   :  { %v9370_v43 = vld [vmem:[#allocation2 + $0x70] sm:$0xff] }
 0x53e   :  { %6502 = vmatmul.msk.f32.gmra.mxu3 %vm2968_vm0, %v9077_v55  ;;  %6534 = vmatmul.msk.f32.gmra.mxu1 %vm2968_vm0, %v9370_v43  ;;  %5445 = vst.msk [vmem:[#allocation2 + $0x70] sm:$0xff] %vm2968_vm0, %v10024_v56  ;;  %v9388_v55 = vpop.f32.mrf.mxu3  ;;  %v5159_v56 = vld [vmem:[%s9790_s5 + $0xa0] sm:$0xff]  ;;  %s6641_s5 = smov 64  }
 0x53f   :  { %6545 = vmatmul.msk.f32.gmra.mxu2 %vm2968_vm0, %v9370_v43  ;;  %6560 = vmatmul.msk.f32.gmra.mxu0 %vm2968_vm0, %v9204_v1 }
 0x540   :  { %5214 = vmatpush.msra.mxu3 %v5159_v56 }
 0x542   :  { %5618 = vmatpush.msrb.mxu3 %v5587_v35  ;;  %v5102_v35 = vpop.f32.mrf.mxu2 }
 0x544   :  { %5619 = vmatpush.msrb.mxu3 %v5586_v61 }
 0x546   :  { %6503 = vmatmul.msk.f32.gmra.mxu3 %vm2968_vm0, %v9118_v42  ;;  %v9397_v31 = vpop.f32.mrf.mxu3 }
 0x547   :  { %6561 = vmatmul.msk.f32.gmra.mxu0 %vm2968_vm0, %v9226_v38  ;;  %6546 = vmatmul.msk.f32.gmra.mxu2 %vm2968_vm0, %v5041_v20 }
 0x548   :  { %5620 = vmatpush.msrb.mxu3 %v5585_v36 }
 0x54a   :  { %5621 = vmatpush.msrb.mxu3 %v5584_v34 }
 0x54b   :  { %v9469_v25 = vpop.f32.mrf.mxu0 }
 0x54e   :  { %6504 = vmatmul.msk.f32.gmra.mxu3 %vm2968_vm0, %v9153_v5  ;;  %v9403_v42 = vpop.f32.mrf.mxu3 }
 0x54f   :  { %6562 = vmatmul.msk.f32.gmra.mxu0 %vm2968_vm0, %v9245_v4 }
 0x556   :  { %6505 = vmatmul.msk.f32.gmra.mxu3 %vm2968_vm0, %v9180_v48  ;;  %v9412_v62 = vpop.f32.mrf.mxu3 }
 0x557   :  { %6563 = vmatmul.msk.f32.gmra.mxu0 %vm2968_vm0, %v9269_v11 }
 0x55b   :  { %v9485_v3 = vpop.f32.mrf.mxu0 }
 0x55e   :  { %6506 = vmatmul.msk.f32.gmra.mxu3 %vm2968_vm0, %v9204_v1  ;;  %v9420_v9 = vpop.f32.mrf.mxu3 }
 0x55f   :  { %6564 = vmatmul.msk.f32.gmra.mxu0 %vm2968_vm0, %v9293_v19 }
 0x566   :  { %6507 = vmatmul.msk.f32.gmra.mxu3 %vm2968_vm0, %v9226_v38  ;;  %v9426_v10 = vpop.f32.mrf.mxu3 }
 0x567   :  { %6565 = vmatmul.msk.f32.gmra.mxu0 %vm2968_vm0, %v9326_v45 }
 0x56e   :  { %6508 = vmatmul.msk.f32.gmra.mxu3 %vm2968_vm0, %v9245_v4  ;;  %v9431_v59 = vpop.f32.mrf.mxu3 }
 0x56f   :  { %6566 = vmatmul.msk.f32.gmra.mxu0 %vm2968_vm0, %v9349_v49 }
 0x576   :  { %6509 = vmatmul.msk.f32.gmra.mxu3 %vm2968_vm0, %v9269_v11  ;;  %v9435_v27 = vpop.f32.mrf.mxu3 }
 0x577   :  { %6567 = vmatmul.msk.f32.gmra.mxu0 %vm2968_vm0, %v9370_v43 }
 0x57e   :  { %6510 = vmatmul.msk.f32.gmra.mxu3 %vm2968_vm0, %v9293_v19 }
 0x57f   :  { %6568 = vmatmul.msk.f32.gmra.mxu0 %vm2968_vm0, %v5041_v20 }
 0x581   :  { %v9441_v40 = vpop.f32.mrf.mxu3 }
 0x586   :  { %6547 = vmatmul.msk.f32.vlgmr.msra.gmra.mxu3 %vm2968_vm0, %v9153_v5 }
 0x58e   :  { %6548 = vmatmul.msk.f32.gmra.mxu3 %vm2968_vm0, %v9180_v48 }
 0x591   :  { %v9445_v37 = vpop.f32.mrf.mxu3 }
 0x596   :  { %6549 = vmatmul.msk.f32.gmra.mxu3 %vm2968_vm0, %v9204_v1 }
 0x59e   :  { %6550 = vmatmul.msk.f32.gmra.mxu3 %vm2968_vm0, %v9226_v38 }
 0x5a1   :  { %v9451_v5 = vpop.f32.mrf.mxu3 }
 0x5a6   :  { %6551 = vmatmul.msk.f32.gmra.mxu3 %vm2968_vm0, %v9245_v4  ;;  %v5461_v4 = vld [vmem:[%s9793_s7 + $0x18] sm:$0xff] }
 0x5a7   :  { %5555 = vmatpush.msra.mxu2 %v5461_v4  ;;  %v4985_v4 = vpop.f32.mrf.mxu1 }
 0x5a9   :  { %v4760_v48 = vpop.f32.mrf.mxu3  ;;  %5556 = vmatpush.msra.mxu2 %v5460_v46 }
 0x5aa   :  { %v4761_v52 = vadd.f32 %v4760_v48, %v9378_v16 }
 0x5ab   :  { %5557 = vmatpush.msra.mxu2 %v5459_v28 }
 0x5ac   :  { %v4901_v15 = vadd.f32 %v9439_v2, %v4761_v52 }
 0x5ad   :  { %5558 = vmatpush.msra.mxu2 %v5458_v54 }
 0x5ae   :  { %6552 = vmatmul.msk.f32.gmra.mxu3 %vm2968_vm0, %v9269_v11  ;;  %v5158_v11 = vld [vmem:[#allocation2 + $0x80] sm:$0xff]  ;;  %6577 = vmatmul.msk.f32.vlgmr.msra.gmra.mxu2 %vm2968_vm0, %v9343_v33  ;;  %v5018_v8 = vadd.f32 %v4982_v44, %v4901_v15 }
 0x5af   :  { %6569 = vmatmul.msk.f32.gmra.mxu0 %vm2968_vm0, %v5158_v11  ;;  %v4988_v28 = vpop.f32.mrf.mxu1 }
 0x5b0   :  { %v5135_v16 = vadd.f32 %v5099_v21, %v5018_v8 }
 0x5b1   :  { %v9461_v1 = vpop.f32.mrf.mxu3 }
 0x5b2   :  { %v4764_v22 = vadd.f32 %v9461_v1, %v9388_v55 }
 0x5b6   :  { %6553 = vmatmul.msk.f32.gmra.mxu3 %vm2968_vm0, %v9293_v19  ;;  %v5471_v19 = vld [vmem:[%s9793_s7 + $0x38] sm:$0xff]  ;;  %6578 = vmatmul.msk.f32.gmra.mxu2 %vm2968_vm0, %v5462_v53 }
 0x5b7   :  { %5502 = vmatpush.msrb.mxu1 %v5471_v19  ;;  %6570 = vmatmul.msk.f32.gmra.mxu0 %vm2968_vm0, %v5275_v50  ;;  %v9567_v50 = vld [vmem:[%s9792_s6] ss:$0 sm:$0xff]  ;;  %v4991_v21 = vpop.f32.mrf.mxu1 }
 0x5b9   :  { %v9467_v38 = vpop.f32.mrf.mxu3  ;;  %5503 = vmatpush.msrb.mxu1 %v5470_v0  ;;  %v5862_v0 = vld [vmem:[%s9793_s7 + $0xd0] sm:$0xff] }
 0x5ba   :  { %5895 = vmatpush.msra.mxu0 %v5862_v0 }
 0x5bb   :  { %5504 = vmatpush.msrb.mxu1 %v5469_v58  ;;  %v5105_v58 = vpop.f32.mrf.mxu2 }
 0x5bd   :  { %5505 = vmatpush.msrb.mxu1 %v5468_v17 }
 0x5be   :  { %6554 = vmatmul.msk.f32.gmra.mxu3 %vm2968_vm0, %v9326_v45  ;;  %v9492_v45 = vpop.f32.mrf.mxu0  ;;  %6571 = vmatmul.msk.f32.vlgmr.msrb.gmra.mxu1 %vm2968_vm0, %v5462_v53 }
 0x5c1   :  { %v9483_v14 = vpop.f32.mrf.mxu3 }
 0x5c6   :  { %6555 = vmatmul.msk.f32.gmra.mxu3 %vm2968_vm0, %v9349_v49  ;;  %v9498_v13 = vpop.f32.mrf.mxu0  ;;  %v5463_v49 = vld [vmem:[#allocation2 + $0x10] sm:$0xff] }
 0x5c7   :  { %6572 = vmatmul.msk.f32.gmra.mxu1 %vm2968_vm0, %v5463_v49  ;;  %6579 = vmatmul.msk.f32.gmra.mxu2 %vm2968_vm0, %v5463_v49 }
 0x5c9   :  { %v9490_v63 = vpop.f32.mrf.mxu3 }
 0x5ce   :  { %6556 = vmatmul.msk.f32.gmra.mxu3 %vm2968_vm0, %v9370_v43  ;;  %v9512_v51 = vpop.f32.mrf.mxu0  ;;  %v4902_v43 = vadd.f32 %v9447_v41, %v4764_v22 }
 0x5d0   :  { %v5019_v2 = vadd.f32 %v4985_v4, %v4902_v43  ;;  %v5725_v4 = vld [vmem:[%s9793_s7 + $0x98] sm:$0xff] }
 0x5d1   :  { %v9496_v30 = vpop.f32.mrf.mxu3  ;;  %5756 = vmatpush.msrb.mxu2 %v5725_v4 }
 0x5d2   :  { %v5136_v1 = vadd.f32 %v5102_v35, %v5019_v2 }
 0x5d6   :  { %6557 = vmatmul.msk.f32.gmra.mxu3 %vm2968_vm0, %v5041_v20  ;;  %v9517_v57 = vpop.f32.mrf.mxu0 }
 0x5d9   :  { %v9510_v47 = vpop.f32.mrf.mxu3 }
 0x5de   :  { %6558 = vmatmul.msk.f32.gmra.mxu3 %vm2968_vm0, %v5158_v11  ;;  %v9524_v6 = vpop.f32.mrf.mxu0  ;;  %v4767_v11 = vadd.f32 %v9467_v38, %v9397_v31  ;;  %v4770_v38 = vadd.f32 %v9483_v14, %v9403_v42  ;;  %v4773_v42 = vadd.f32 %v9490_v63, %v9412_v62  ;;  %v5794_v62 = vld [vmem:[%s9793_s7 + $0xb8] sm:$0xff] }
 0x5df   :  { %v5656_v63 = vld [vmem:[%s9793_s7 + $0x78] sm:$0xff]  ;;  %5825 = vmatpush.msra.mxu3 %v5794_v62 }
 0x5e0   :  { %v4903_v55 = vadd.f32 %v9453_v32, %v4767_v11  ;;  %5687 = vmatpush.msra.mxu1 %v5656_v63 }
 0x5e1   :  { %v9515_v7 = vpop.f32.mrf.mxu3 }
 0x5e2   :  { %v5020_v36 = vadd.f32 %v4988_v28, %v4903_v55 }
 0x5e4   :  { %v5137_v52 = vadd.f32 %v5105_v58, %v5020_v36 }
 0x5e6   :  { %v5333_v39 = vpop.f32.mrf.mxu0  ;;  %6583 = vmatmul.msk.f32.vlgmr.msrb.gmra.mxu3 %vm2968_vm0, %v5463_v49 }
 0x5e9   :  { %v9519_v24 = vpop.f32.mrf.mxu3 }
 0x5ee   :  { %v5336_v18 = vpop.f32.mrf.mxu0 }
 0x5f1   :  { %v9531_v29 = vpop.f32.mrf.mxu3 }
 0x5f6   :  { %v5339_v56 = vpop.f32.mrf.mxu0 }
 0x5f9   :  { %v9544_v33 = vpop.f32.mrf.mxu3 }
 0x5fe   :  { %v5342_v31 = vpop.f32.mrf.mxu0 }
 0x601   :  { %v9557_v12 = vpop.f32.mrf.mxu3 }
 0x606   :  { %v5345_v22 = vpop.f32.mrf.mxu0 }
 0x609   :  { %v5216_v20 = vpop.f32.mrf.mxu3 }
 0x60a   :  { %v5252_v48 = vadd.f32 %v5216_v20, %v5135_v16 }
 0x60c   :  { %v5369_v19 = vadd.f32 %v5333_v39, %v5252_v48  ;;  %v4904_v39 = vadd.f32 %v9457_v26, %v4770_v38  ;;  %v4905_v26 = vadd.f32 %v9463_v23, %v4773_v42  ;;  %v4776_v23 = vadd.f32 %v9496_v30, %v9420_v9 }
 0x60e   :  { %v5385_v46 = vadd.f32 %v9567_v50, %v5369_v19  ;;  %v5021_v14 = vadd.f32 %v4991_v21, %v4904_v39  ;;  %v4906_v9 = vadd.f32 %v9469_v25, %v4776_v23  ;;  %v4779_v25 = vadd.f32 %v9510_v47, %v9426_v10  ;;  %v5793_v10 = vld [vmem:[%s9793_s7 + $0xb0] sm:$0xff] }
 0x60f   :  { %v5655_v47 = vld [vmem:[%s9793_s7 + $0x70] sm:$0xff]  ;;  %5826 = vmatpush.msra.mxu3 %v5793_v10 }
 0x610   :  { %v5409_v17 = vmul.f32 0.2, %v5385_v46  ;;  %vm5397_vm13 = vcmp.ge.f32.partialorder %v5385_v46, 0.0  ;;  %5688 = vmatpush.msra.mxu1 %v5655_v47  ;;  %v4791_v47 = vadd.f32 %v9544_v33, %v9445_v37  ;;  %v4794_v37 = vadd.f32 %v9557_v12, %v9451_v5 }
 0x611   :  { %v5219_v41 = vpop.f32.mrf.mxu3 }
 0x612   :  { %v5253_v61 = vadd.f32 %v5219_v41, %v5136_v1  ;;  %v5421_v60 = vsel %vm5397_vm13, %v5385_v46, %v5409_v17  ;;  %v5348_v41 = vpop.f32.mrf.mxu0  ;;  %v4912_v5 = vadd.f32 %v9524_v6, %v4794_v37 }
 0x614   :  { %v5370_v54 = vadd.f32 %v5336_v18, %v5253_v61  ;;  %v5108_v18 = vpop.f32.mrf.mxu2  ;;  %v5724_v61 = vld [vmem:[%s9793_s7 + $0x90] sm:$0xff] }
 0x615   :  { %v5138_v43 = vadd.f32 %v5108_v18, %v5021_v14  ;;  %5757 = vmatpush.msrb.mxu2 %v5724_v61 }
 0x616   :  { %v5386_v32 = vadd.f32 %v9567_v50, %v5370_v54  ;;  %v5723_v54 = vld [vmem:[%s9793_s7 + $0x88] sm:$0xff] }
 0x617   :  { %5758 = vmatpush.msrb.mxu2 %v5723_v54 }
 0x618   :  { %vm5398_vm14 = vcmp.ge.f32.partialorder %v5386_v32, 0.0  ;;  %v5410_v53 = vmul.f32 0.2, %v5386_v32 }
 0x619   :  { %v5222_v34 = vpop.f32.mrf.mxu3 }
 0x61a   :  { %v5422_v49 = vsel %vm5398_vm14, %v5386_v32, %v5410_v53  ;;  %v5254_v15 = vadd.f32 %v5222_v34, %v5137_v52  ;;  %v5722_v32 = vld [vmem:[%s9793_s7 + $0x80] sm:$0xff]  ;;  %v5861_v53 = vld [vmem:[%s9793_s7 + $0xc8] sm:$0xff]  ;;  %v4907_v34 = vadd.f32 %v9485_v3, %v4779_v25  ;;  %v4782_v3 = vadd.f32 %v9515_v7, %v9431_v59 }
 0x61b   :  { %v5433_v44 = vmax.f32 %v5421_v60, %v5422_v49  ;;  %5759 = vmatpush.msrb.mxu2 %v5722_v32  ;;  %5896 = vmatpush.msra.mxu0 %v5861_v53  ;;  %v5351_v49 = vpop.f32.mrf.mxu0 }
 0x61c   :  { %v5371_v8 = vadd.f32 %v5339_v56, %v5254_v15  ;;  %v4994_v56 = vpop.f32.mrf.mxu1  ;;  %v5111_v19 = vpop.f32.mrf.mxu2  ;;  %v4908_v59 = vadd.f32 %v9492_v45, %v4782_v3  ;;  %v5653_v45 = vld [vmem:[%s9793_s7 + $0x60] sm:$0xff] }
 0x61d   :  { %5446 = vst.msk [vmem:[#allocation2 + $0x18] sm:$0xff] %vm2968_vm0, %v5433_v44  ;;  %v5022_v2 = vadd.f32 %v4994_v56, %v4905_v26  ;;  %v5654_v56 = vld [vmem:[%s9793_s7 + $0x68] sm:$0xff] }
 0x61e   :  { %v5387_v20 = vadd.f32 %v9567_v50, %v5371_v8  ;;  %v5860_v8 = vld [vmem:[%s9793_s7 + $0xc0] sm:$0xff]  ;;  %5689 = vmatpush.msra.mxu1 %v5654_v56 }
 0x61f   :  { %v5139_v46 = vadd.f32 %v5111_v19, %v5022_v2  ;;  %5897 = vmatpush.msra.mxu0 %v5860_v8  ;;  %v4785_v19 = vadd.f32 %v9519_v24, %v9435_v27 }
 0x620   :  { %v5411_v55 = vmul.f32 0.2, %v5387_v20  ;;  %vm5399_vm15 = vcmp.ge.f32.partialorder %v5387_v20, 0.0  ;;  %5690 = vmatpush.msra.mxu1 %v5653_v45 }
 0x621   :  { %v5225_v16 = vpop.f32.mrf.mxu3 }
 0x622   :  { %v5255_v48 = vadd.f32 %v5225_v16, %v5138_v43  ;;  %v5423_v28 = vsel %vm5399_vm15, %v5387_v20, %v5411_v55  ;;  %vm5959_vm15 = vcmask 523520  }
 0x624   :  { %v5372_v35 = vadd.f32 %v5342_v31, %v5255_v48  ;;  %v9594_v11 = vld [vmem:[#allocation2 + $0x18] sm:$0xff]  ;;  %v4997_v36 = vpop.f32.mrf.mxu1  ;;  %v5114_v39 = vpop.f32.mrf.mxu2 }
 0x625   :  { %6573 = vmatmul.msk.f32.gmra.mxu1 %vm2968_vm0, %v9594_v11  ;;  %6580 = vmatmul.msk.f32.gmra.mxu2 %vm2968_vm0, %v9594_v11  ;;  %v5023_v17 = vadd.f32 %v4997_v36, %v4906_v9 }
 0x626   :  { %v5388_v1 = vadd.f32 %v9567_v50, %v5372_v35  ;;  %6584 = vmatmul.msk.f32.gmra.mxu3 %vm2968_vm0, %v9594_v11  ;;  %v5354_v35 = vpop.f32.mrf.mxu0 }
 0x627   :  { %v5140_v60 = vadd.f32 %v5114_v39, %v5023_v17 }
 0x628   :  { %vm5400_vm1 = vcmp.ge.f32.partialorder %v5388_v1, 0.0  ;;  %v5412_v30 = vmul.f32 0.2, %v5388_v1 }
 0x629   :  { %v5228_v0 = vpop.f32.mrf.mxu3 }
 0x62a   :  { %v5424_v31 = vsel %vm5400_vm1, %v5388_v1, %v5412_v30  ;;  %v5256_v38 = vadd.f32 %v5228_v0, %v5139_v46  ;;  %v4909_v30 = vadd.f32 %v9498_v13, %v4785_v19  ;;  %v5791_v0 = vld [vmem:[%s9793_s7 + $0xa0] sm:$0xff]  ;;  %vm5965_vm1 = vcmask 785920  }
 0x62b   :  { %v5434_v58 = vmax.f32 %v5423_v28, %v5424_v31  ;;  %v4788_v31 = vadd.f32 %v9531_v29, %v9441_v40 }
 0x62c   :  { %v5373_v52 = vadd.f32 %v5345_v22, %v5256_v38  ;;  %v5000_v42 = vpop.f32.mrf.mxu1  ;;  %v5117_v26 = vpop.f32.mrf.mxu2 }
 0x62d   :  { %5447 = vst.msk [vmem:[#allocation2 + $0x20] sm:$0xff] %vm2968_vm0, %v5434_v58  ;;  %v5024_v22 = vadd.f32 %v5000_v42, %v4907_v34  ;;  %v4910_v40 = vadd.f32 %v9512_v51, %v4788_v31  ;;  %v5859_v31 = vld [vmem:[#allocation2 + $0x58] sm:$0xff] }
 0x62e   :  { %v5389_v21 = vadd.f32 %v9567_v50, %v5373_v52  ;;  %v5357_v13 = vpop.f32.mrf.mxu0 }
 0x62f   :  { %v5141_v20 = vadd.f32 %v5117_v26, %v5024_v22 }
 0x630   :  { %v5413_v43 = vmul.f32 0.2, %v5389_v21  ;;  %vm5401_vm2 = vcmp.ge.f32.partialorder %v5389_v21, 0.0 }
 0x631   :  { %v5231_v15 = vpop.f32.mrf.mxu3 }
 0x632   :  { %v5257_v44 = vadd.f32 %v5231_v15, %v5140_v60  ;;  %v5425_v4 = vsel %vm5401_vm2, %v5389_v21, %v5413_v43  ;;  %vm5984_vm2 = vcmask 785408  }
 0x634   :  { %v5374_v14 = vadd.f32 %v5348_v41, %v5257_v44  ;;  %v9629_v18 = vld [vmem:[#allocation2 + $0x20] sm:$0xff]  ;;  %v5003_v23 = vpop.f32.mrf.mxu1  ;;  %v5120_v1 = vpop.f32.mrf.mxu2  ;;  %v5792_v41 = vld [vmem:[%s9793_s7 + $0xa8] sm:$0xff]  ;;  %v4911_v44 = vadd.f32 %v9517_v57, %v4791_v47 }
 0x635   :  { %6574 = vmatmul.msk.f32.gmra.mxu1 %vm2968_vm0, %v9629_v18  ;;  %6581 = vmatmul.msk.f32.gmra.mxu2 %vm2968_vm0, %v9629_v18  ;;  %v5025_v55 = vadd.f32 %v5003_v23, %v4908_v59 }
 0x636   :  { %v5390_v16 = vadd.f32 %v9567_v50, %v5374_v14  ;;  %6585 = vmatmul.msk.f32.gmra.mxu3 %vm2968_vm0, %v9629_v18  ;;  %v5360_v51 = vpop.f32.mrf.mxu0 }
 0x637   :  { %5827 = vmatpush.msra.mxu3 %v5792_v41  ;;  %v5142_v46 = vadd.f32 %v5120_v1, %v5025_v55 }
 0x638   :  { %vm5402_vm3 = vcmp.ge.f32.partialorder %v5390_v16, 0.0  ;;  %v5414_v7 = vmul.f32 0.2, %v5390_v16 }
 0x639   :  { %v5234_v48 = vpop.f32.mrf.mxu3  ;;  %5828 = vmatpush.msra.mxu3 %v5791_v0 }
 0x63a   :  { %v5426_v62 = vsel %vm5402_vm3, %v5390_v16, %v5414_v7  ;;  %v5258_v63 = vadd.f32 %v5234_v48, %v5141_v20 }
 0x63b   :  { %v5435_v2 = vmax.f32 %v5425_v4, %v5426_v62 }
 0x63c   :  { %v5375_v9 = vadd.f32 %v5351_v49, %v5258_v63  ;;  %v5006_v28 = vpop.f32.mrf.mxu1  ;;  %v5123_v58 = vpop.f32.mrf.mxu2 }
 0x63d   :  { %5448 = vst.msk [vmem:[#allocation2 + $0x28] sm:$0xff] %vm2968_vm0, %v5435_v2  ;;  %v5026_v36 = vadd.f32 %v5006_v28, %v4909_v30  ;;  %v5790_v28 = vld [vmem:[#allocation2 + $0x50] sm:$0xff] }
 0x63e   :  { %v5391_v27 = vadd.f32 %v9567_v50, %v5375_v9  ;;  %v5363_v7 = vpop.f32.mrf.mxu0 }
 0x63f   :  { %v5143_v32 = vadd.f32 %v5123_v58, %v5026_v36 }
 0x640   :  { %v5415_v25 = vmul.f32 0.2, %v5391_v27  ;;  %vm5403_vm4 = vcmp.ge.f32.partialorder %v5391_v27, 0.0 }
 0x641   :  { %v5237_v61 = vpop.f32.mrf.mxu3 }
 0x642   :  { %v5259_v24 = vadd.f32 %v5237_v61, %v5142_v46  ;;  %v5427_v53 = vsel %vm5403_vm4, %v5391_v27, %v5415_v25  ;;  %vm6016_vm4 = vcmask 523264  }
 0x644   :  { %v5376_v38 = vadd.f32 %v5354_v35, %v5259_v24  ;;  %v9661_v54 = vld [vmem:[#allocation2 + $0x28] sm:$0xff]  ;;  %v5009_v60 = vpop.f32.mrf.mxu1  ;;  %v5126_v15 = vpop.f32.mrf.mxu2 }
 0x645   :  { %6575 = vmatmul.msk.f32.gmra.mxu1 %vm2968_vm0, %v9661_v54  ;;  %6582 = vmatmul.msk.f32.gmra.mxu2 %vm2968_vm0, %v9661_v54  ;;  %v5027_v49 = vadd.f32 %v5009_v60, %v4910_v40 }
 0x646   :  { %v5392_v17 = vadd.f32 %v9567_v50, %v5376_v38  ;;  %6586 = vmatmul.msk.f32.gmra.mxu3 %vm2968_vm0, %v9661_v54  ;;  %v5366_v45 = vpop.f32.mrf.mxu0 }
 0x647   :  { %v5144_v42 = vadd.f32 %v5126_v15, %v5027_v49 }
 0x648   :  { %vm5404_vm5 = vcmp.ge.f32.partialorder %v5392_v17, 0.0  ;;  %v5416_v29 = vmul.f32 0.2, %v5392_v17 }
 0x649   :  { %v5240_v39 = vpop.f32.mrf.mxu3 }
 0x64a   :  { %v5428_v52 = vsel %vm5404_vm5, %v5392_v17, %v5416_v29  ;;  %v5260_v34 = vadd.f32 %v5240_v39, %v5143_v32  ;;  %vm6025_vm5 = vcmask 7168  }
 0x64b   :  { %v5436_v10 = vmax.f32 %v5427_v53, %v5428_v52 }
 0x64c   :  { %v5377_v21 = vadd.f32 %v5357_v13, %v5260_v34  ;;  %v5012_v8 = vpop.f32.mrf.mxu1  ;;  %v5129_v16 = vpop.f32.mrf.mxu2 }
 0x64d   :  { %5449 = vst.msk [vmem:[#allocation2 + $0x30] sm:$0xff] %vm2968_vm0, %v5436_v10  ;;  %6595 = vmatmul.msk.f32.vlgmr.msrb.gmra.mxu2 %vm2968_vm0, %v9629_v18  ;;  %v5028_v43 = vadd.f32 %v5012_v8, %v4911_v44 }
 0x64e   :  { %v5393_v14 = vadd.f32 %v9567_v50, %v5377_v21 }
 0x64f   :  { %v5145_v20 = vadd.f32 %v5129_v16, %v5028_v43 }
 0x650   :  { %v5417_v59 = vmul.f32 0.2, %v5393_v14  ;;  %vm5405_vm6 = vcmp.ge.f32.partialorder %v5393_v14, 0.0 }
 0x651   :  { %v5243_v3 = vpop.f32.mrf.mxu3 }
 0x652   :  { %v5261_v22 = vadd.f32 %v5243_v3, %v5144_v42  ;;  %v5429_v4 = vsel %vm5405_vm6, %v5393_v14, %v5417_v59 }
 0x654   :  { %v5378_v33 = vadd.f32 %v5360_v51, %v5261_v22  ;;  %v5467_v26 = vld [vmem:[#allocation2 + $0x30] sm:$0xff]  ;;  %v5015_v56 = vpop.f32.mrf.mxu1  ;;  %v5132_v2 = vpop.f32.mrf.mxu2 }
 0x655   :  { %6576 = vmatmul.msk.f32.gmra.mxu1 %vm2968_vm0, %v5467_v26  ;;  %6587 = vmatmul.msk.f32.gmra.mxu3 %vm2968_vm0, %v5467_v26  ;;  %v5029_v35 = vadd.f32 %v5015_v56, %v4912_v5  ;;  %v9726_v5 = vld [vmem:[%s9794_s8] ss:$0 sm:$0xff] }
 0x656   :  { %v5394_v57 = vadd.f32 %v9567_v50, %v5378_v33  ;;  %6596 = vmatmul.msk.f32.gmra.mxu2 %vm2968_vm0, %v9661_v54  ;;  %6607 = vmatmul.msk.f32.vlgmr.msra.gmra.mxu0 %vm2968_vm0, %v5467_v26 }
 0x657   :  { %v5146_v6 = vadd.f32 %v5132_v2, %v5029_v35 }
 0x658   :  { %vm5406_vm7 = vcmp.ge.f32.partialorder %v5394_v57, 0.0  ;;  %v5418_v12 = vmul.f32 0.2, %v5394_v57 }
 0x659   :  { %v5246_v48 = vpop.f32.mrf.mxu3 }
 0x65a   :  { %v5430_v62 = vsel %vm5406_vm7, %v5394_v57, %v5418_v12  ;;  %v5262_v63 = vadd.f32 %v5246_v48, %v5145_v20 }
 0x65b   :  { %v5437_v23 = vmax.f32 %v5429_v4, %v5430_v62 }
 0x65c   :  { %v5379_v19 = vadd.f32 %v5363_v7, %v5262_v63  ;;  %v5507_v38 = vpop.f32.mrf.mxu1 }
 0x65d   :  { %5450 = vst.msk [vmem:[#allocation2 + $0x38] sm:$0xff] %vm2968_vm0, %v5437_v23  ;;  %6589 = vmatmul.msk.f32.vlgmr.msra.gmra.mxu1 %vm2968_vm0, %v9594_v11 }
 0x65e   :  { %6597 = vmatmul.msk.f32.gmra.mxu2 %vm2968_vm0, %v5467_v26  ;;  %v5395_v1 = vadd.f32 %v9567_v50, %v5379_v19 }
 0x660   :  { %v5419_v46 = vmul.f32 0.2, %v5395_v1  ;;  %vm5407_vm8 = vcmp.ge.f32.partialorder %v5395_v1, 0.0 }
 0x661   :  { %v5249_v55 = vpop.f32.mrf.mxu3 }
 0x662   :  { %v5263_v41 = vadd.f32 %v5249_v55, %v5146_v6  ;;  %v5431_v27 = vsel %vm5407_vm8, %v5395_v1, %v5419_v46 }
 0x664   :  { %v5380_v9 = vadd.f32 %v5366_v45, %v5263_v41  ;;  %v5583_v30 = vld [vmem:[#allocation2 + $0x38] sm:$0xff]  ;;  %v5510_v36 = vpop.f32.mrf.mxu1 }
 0x665   :  { %6588 = vmatmul.msk.f32.gmra.mxu3 %vm2968_vm0, %v5583_v30  ;;  %6590 = vmatmul.msk.f32.gmra.mxu1 %vm2968_vm0, %v9629_v18 }
 0x666   :  { %v5396_v61 = vadd.f32 %v9567_v50, %v5380_v9  ;;  %6598 = vmatmul.msk.f32.gmra.mxu2 %vm2968_vm0, %v5583_v30  ;;  %6608 = vmatmul.msk.f32.gmra.mxu0 %vm2968_vm0, %v5583_v30  ;;  %v5721_v50 = vld [vmem:[#allocation2 + $0x48] sm:$0xff] }
 0x668   :  { %vm5408_vm9 = vcmp.ge.f32.partialorder %v5396_v61, 0.0  ;;  %v5420_v11 = vmul.f32 0.2, %v5396_v61 }
 0x669   :  { %v5623_v25 = vpop.f32.mrf.mxu3 }
 0x66a   :  { %v5432_v24 = vsel %vm5408_vm9, %v5396_v61, %v5420_v11 }
 0x66b   :  { %v5438_v0 = vmax.f32 %v5431_v27, %v5432_v24 }
 0x66d   :  { %5451 = vst.msk [vmem:[#allocation2 + $0x40] sm:$0xff] %vm2968_vm0, %v5438_v0  ;;  %6591 = vmatmul.msk.f32.gmra.mxu1 %vm2968_vm0, %v9661_v54  ;;  %6601 = vmatmul.msk.f32.vlgmr.msra.gmra.mxu3 %vm2968_vm0, %v9661_v54  ;;  %v5560_v54 = vpop.f32.mrf.mxu2 }
 0x66e   :  { %v5561_v15 = vadd.f32 %v5560_v54, %v5507_v38  ;;  %v5977_v54 = vld [vmem:[%s9795_s9 + $0x48] sm:$0xff] }
 0x670   :  { %v5641_v42 = vadd.f32 %v5623_v25, %v5561_v15  ;;  %v5976_v25 = vld [vmem:[%s9795_s9 + $0x40] sm:$0xff] }
 0x674   :  { %v5720_v18 = vld [vmem:[#allocation2 + $0x40] sm:$0xff] }
 0x675   :  { %6592 = vmatmul.msk.f32.gmra.mxu1 %vm2968_vm0, %v5467_v26  ;;  %6599 = vmatmul.msk.f32.gmra.mxu2 %vm2968_vm0, %v5720_v18  ;;  %v5563_v58 = vpop.f32.mrf.mxu2 }
 0x676   :  { %6602 = vmatmul.msk.f32.gmra.mxu3 %vm2968_vm0, %v5467_v26  ;;  %6609 = vmatmul.msk.f32.gmra.mxu0 %vm2968_vm0, %v5720_v18  ;;  %v5564_v22 = vadd.f32 %v5563_v58, %v5510_v36 }
 0x67d   :  { %6593 = vmatmul.msk.f32.gmra.mxu1 %vm2968_vm0, %v5583_v30  ;;  %6600 = vmatmul.msk.f32.gmra.mxu2 %vm2968_vm0, %v5721_v50  ;;  %v5566_v17 = vpop.f32.mrf.mxu2 }
 0x67e   :  { %6603 = vmatmul.msk.f32.gmra.mxu3 %vm2968_vm0, %v5583_v30  ;;  %6610 = vmatmul.msk.f32.gmra.mxu0 %vm2968_vm0, %v5721_v50 }
 0x685   :  { %6594 = vmatmul.msk.f32.gmra.mxu1 %vm2968_vm0, %v5720_v18 }
 0x686   :  { %6604 = vmatmul.msk.f32.gmra.mxu3 %vm2968_vm0, %v5720_v18  ;;  %6611 = vmatmul.msk.f32.gmra.mxu0 %vm2968_vm0, %v5790_v28 }
 0x68e   :  { %6605 = vmatmul.msk.f32.gmra.mxu3 %vm2968_vm0, %v5721_v50  ;;  %6612 = vmatmul.msk.f32.gmra.mxu0 %vm2968_vm0, %v5859_v31  ;;  %v5979_v50 = vld [vmem:[%s9795_s9 + $0x58] sm:$0xff] }
 0x68f   :  { %5992 = vmatpush.msrb.mxu1 %v5979_v50 }
 0x696   :  { %6606 = vmatmul.msk.f32.gmra.mxu3 %vm2968_vm0, %v5790_v28  ;;  %v5978_v28 = vld [vmem:[%s9795_s9 + $0x50] sm:$0xff] }
 0x697   :  { %5993 = vmatpush.msrb.mxu1 %v5978_v28 }
 0x699   :  { %5994 = vmatpush.msrb.mxu1 %v5977_v54 }
 0x69b   :  { %5995 = vmatpush.msrb.mxu1 %v5976_v25 }
 0x6a2   :  { %v5513_v13 = vpop.f32.mrf.mxu1 }
 0x6a3   :  { %v5567_v12 = vadd.f32 %v5566_v17, %v5513_v13 }
 0x6a8   :  { %v5569_v32 = vpop.f32.mrf.mxu2 }
 0x6a9   :  { %v5626_v29 = vpop.f32.mrf.mxu3 }
 0x6aa   :  { %v5642_v26 = vadd.f32 %v5626_v29, %v5564_v22 }
 0x6b2   :  { %v5516_v40 = vpop.f32.mrf.mxu1 }
 0x6b3   :  { %v5570_v45 = vadd.f32 %v5569_v32, %v5516_v40  ;;  %v5975_v32 = vld [vmem:[%s9795_s9 + $0x38] sm:$0xff] }
 0x6b4   :  { %5996 = vmatpush.msrb.mxu1 %v5975_v32 }
 0x6b8   :  { %v5572_v52 = vpop.f32.mrf.mxu2 }
 0x6b9   :  { %v5629_v53 = vpop.f32.mrf.mxu3 }
 0x6ba   :  { %v5643_v4 = vadd.f32 %v5629_v53, %v5567_v12 }
 0x6c2   :  { %v5519_v39 = vpop.f32.mrf.mxu1 }
 0x6c3   :  { %v5573_v36 = vadd.f32 %v5572_v52, %v5519_v39  ;;  %v5974_v52 = vld [vmem:[%s9795_s9 + $0x30] sm:$0xff] }
 0x6c4   :  { %5997 = vmatpush.msrb.mxu1 %v5974_v52 }
 0x6c8   :  { %v9719_v10 = vpop.f32.mrf.mxu2 }
 0x6c9   :  { %v5632_v60 = vpop.f32.mrf.mxu3 }
 0x6ca   :  { %v5644_v30 = vadd.f32 %v5632_v60, %v5570_v45 }
 0x6d0   :  { %v5761_v51 = vpop.f32.mrf.mxu2 }
 0x6d2   :  { %v9717_v34 = vpop.f32.mrf.mxu1 }
 0x6d3   :  { %v5899_v14 = vpop.f32.mrf.mxu0 }
 0x6d8   :  { %v5635_v49 = vpop.f32.mrf.mxu3 }
 0x6d9   :  { %v5764_v33 = vpop.f32.mrf.mxu2  ;;  %v5645_v17 = vadd.f32 %v5635_v49, %v5573_v36 }
 0x6da   :  { %v5692_v47 = vpop.f32.mrf.mxu1 }
 0x6db   :  { %v5710_v3 = vadd.f32 %v5692_v47, %v5641_v42 }
 0x6dd   :  { %v5779_v8 = vadd.f32 %v5761_v51, %v5710_v3  ;;  %v5576_v51 = vadd.f32 %v9719_v10, %v9717_v34 }
 0x6e1   :  { %v5767_v56 = vpop.f32.mrf.mxu2 }
 0x6e2   :  { %v5695_v44 = vpop.f32.mrf.mxu1 }
 0x6e3   :  { %v5711_v59 = vadd.f32 %v5695_v44, %v5642_v26  ;;  %v5902_v57 = vpop.f32.mrf.mxu0 }
 0x6e5   :  { %v5780_v20 = vadd.f32 %v5764_v33, %v5711_v59 }
 0x6e8   :  { %v9721_v21 = vpop.f32.mrf.mxu3 }
 0x6e9   :  { %v5770_v0 = vpop.f32.mrf.mxu2  ;;  %v5646_v22 = vadd.f32 %v9721_v21, %v5576_v51 }
 0x6ea   :  { %v5698_v16 = vpop.f32.mrf.mxu1 }
 0x6eb   :  { %v5712_v23 = vadd.f32 %v5698_v16, %v5643_v4 }
 0x6ed   :  { %v5781_v41 = vadd.f32 %v5767_v56, %v5712_v23  ;;  %v5973_v23 = vld [vmem:[%s9795_s9 + $0x28] sm:$0xff] }
 0x6ee   :  { %5998 = vmatpush.msrb.mxu1 %v5973_v23 }
 0x6f0   :  { %v5830_v37 = vpop.f32.mrf.mxu3 }
 0x6f1   :  { %v5848_v43 = vadd.f32 %v5830_v37, %v5779_v8 }
 0x6f2   :  { %v5701_v2 = vpop.f32.mrf.mxu1 }
 0x6f3   :  { %v5917_v7 = vadd.f32 %v5899_v14, %v5848_v43  ;;  %v5905_v19 = vpop.f32.mrf.mxu0  ;;  %v5713_v24 = vadd.f32 %v5701_v2, %v5644_v30  ;;  %v5970_v2 = vld [vmem:[%s9795_s9 + $0x10] sm:$0xff] }
 0x6f5   :  { %v5927_v62 = vadd.f32 %v9726_v5, %v5917_v7  ;;  %v5782_v58 = vadd.f32 %v5770_v0, %v5713_v24 }
 0x6f7   :  { %v5939_v6 = vmul.f32 0.2, %v5927_v62  ;;  %vm5933_vm10 = vcmp.ge.f32.partialorder %v5927_v62, 0.0 }
 0x6f8   :  { %v5773_v39 = vpop.f32.mrf.mxu2 }
 0x6f9   :  { %v5833_v48 = vpop.f32.mrf.mxu3  ;;  %v5945_v61 = vsel %vm5933_vm10, %v5927_v62, %v5939_v6  ;;  %v5968_v6 = vld [vmem:[%s9795_s9] sm:$0xff] }
 0x6fa   :  { %v5849_v63 = vadd.f32 %v5833_v48, %v5780_v20  ;;  %v5704_v38 = vpop.f32.mrf.mxu1 }
 0x6fb   :  { %v5908_v18 = vpop.f32.mrf.mxu0  ;;  %v5714_v53 = vadd.f32 %v5704_v38, %v5645_v17 }
 0x6fc   :  { %v5918_v35 = vadd.f32 %v5902_v57, %v5849_v63 }
 0x6fd   :  { %v5783_v42 = vadd.f32 %v5773_v39, %v5714_v53 }
 0x6fe   :  { %v5928_v55 = vadd.f32 %v9726_v5, %v5918_v35  ;;  %v5972_v35 = vld [vmem:[%s9795_s9 + $0x20] sm:$0xff] }
 0x6ff   :  { %5999 = vmatpush.msrb.mxu1 %v5972_v35 }
 0x700   :  { %vm5934_vm11 = vcmp.ge.f32.partialorder %v5928_v55, 0.0  ;;  %v5940_v1 = vmul.f32 0.2, %v5928_v55  ;;  %v5776_v16 = vpop.f32.mrf.mxu2 }
 0x701   :  { %v5836_v9 = vpop.f32.mrf.mxu3 }
 0x702   :  { %v5850_v46 = vadd.f32 %v5836_v9, %v5781_v41  ;;  %v5946_v11 = vsel %vm5934_vm11, %v5928_v55, %v5940_v1  ;;  %v5707_v3 = vpop.f32.mrf.mxu1  ;;  %v18_v41 = vstv %s9798_s12  ;;  %v6633_v9 = vld [vmem:[%s9796_s10] ss:$0 sm:$0xff] }
 0x703   :  { %v5951_v27 = vmax.f32 %v5945_v61, %v5946_v11  ;;  %v5911_v49 = vpop.f32.mrf.mxu0  ;;  %v5715_v43 = vadd.f32 %v5707_v3, %v5646_v22  ;;  %19 = vst [vmem:[#allocation4] sm:$0x1] %v18_v41  ;;  %v6634_v61 = vld [vmem:[%s9797_s11] ss:$0 sm:$0xff] }
 0x704   :  { %v5919_v31 = vadd.f32 %v5905_v19, %v5850_v46  ;;  %v5969_v19 = vld [vmem:[%s9795_s9 + $0x8] sm:$0xff] }
 0x705   :  { %5954 = vst.msk [vmem:[#allocation3] sm:$0xff] %vm2968_vm0, %v5951_v27  ;;  %v5784_v57 = vadd.f32 %v5776_v16, %v5715_v43 }
 0x706   :  { %v5929_v40 = vadd.f32 %v9726_v5, %v5919_v31 }
 0x708   :  { %v5941_v47 = vmul.f32 0.2, %v5929_v40  ;;  %vm5935_vm0 = vcmp.ge.f32.partialorder %v5929_v40, 0.0 }
 0x709   :  { %v5839_v13 = vpop.f32.mrf.mxu3 }
 0x70a   :  { %v5851_v29 = vadd.f32 %v5839_v13, %v5782_v58  ;;  %v5947_v33 = vsel %vm5935_vm0, %v5929_v40, %v5941_v47 }
 0x70b   :  { %v5914_v34 = vpop.f32.mrf.mxu0 }
 0x70c   :  { %v5920_v60 = vadd.f32 %v5908_v18, %v5851_v29  ;;  %v6635_v18 = vld [vmem:[#allocation4] ss:$0 sm:$0xff] }
 0x70e   :  { %v5930_v15 = vadd.f32 %v9726_v5, %v5920_v60 }
 0x710   :  { %vm5936_vm12 = vcmp.ge.f32.partialorder %v5930_v15, 0.0  ;;  %v5942_v44 = vmul.f32 0.2, %v5930_v15 }
 0x711   :  { %v5842_v14 = vpop.f32.mrf.mxu3 }
 0x712   :  { %v5948_v8 = vsel %vm5936_vm12, %v5930_v15, %v5942_v44  ;;  %v5852_v37 = vadd.f32 %v5842_v14, %v5783_v42 }
 0x713   :  { %v5952_v26 = vmax.f32 %v5947_v33, %v5948_v8 }
 0x714   :  { %v5921_v59 = vadd.f32 %v5911_v49, %v5852_v37 }
 0x715   :  { %5956 = vrot.lane.b32.xlu0 %v5952_v26, %s6640_s16 }
 0x716   :  { %v5931_v10 = vadd.f32 %v9726_v5, %v5921_v59 }
 0x718   :  { %v5943_v48 = vmul.f32 0.2, %v5931_v10  ;;  %vm5937_vm13 = vcmp.ge.f32.partialorder %v5931_v10, 0.0 }
 0x719   :  { %v5845_v7 = vpop.f32.mrf.mxu3 }
 0x71a   :  { %v5853_v12 = vadd.f32 %v5845_v7, %v5784_v57  ;;  %v5949_v62 = vsel %vm5937_vm13, %v5931_v10, %v5943_v48 }
 0x71c   :  { %v5922_v20 = vadd.f32 %v5914_v34, %v5853_v12 }
 0x71e   :  { %v5932_v4 = vadd.f32 %v9726_v5, %v5922_v20  ;;  %v5971_v5 = vld [vmem:[%s9795_s9 + $0x18] sm:$0xff] }
 0x71f   :  { %6000 = vmatpush.msrb.mxu1 %v5971_v5 }
 0x720   :  { %vm5938_vm14 = vcmp.ge.f32.partialorder %v5932_v4, 0.0  ;;  %v5944_v21 = vmul.f32 0.2, %v5932_v4 }
 0x721   :  { %6001 = vmatpush.msrb.mxu1 %v5970_v2 }
 0x722   :  { %v5950_v63 = vsel %vm5938_vm14, %v5932_v4, %v5944_v21 }
 0x723   :  { %v5953_v56 = vmax.f32 %v5949_v62, %v5950_v63  ;;  %6002 = vmatpush.msrb.mxu1 %v5969_v19 }
 0x725   :  { %5962 = vrot.lane.b32.xlu1 %v5953_v56, %s6641_s5  ;;  %6003 = vmatpush.msrb.mxu1 %v5968_v6 }
 0x787   :  { %v5957_v55 = vpop.permute.xlu0 %5956 }
 0x788   :  { %5960 = vst.msk [vmem:[#allocation3] sm:$0xff] %vm5959_vm15, %v5957_v55 }
 0x797   :  { %v5963_v45 = vpop.permute.xlu1 %5962 }
 0x798   :  { %5966 = vst.msk [vmem:[#allocation3] sm:$0xff] %vm5965_vm1, %v5963_v45 }
 0x79f   :  { %v5967_v1 = vld [vmem:[#allocation3] sm:$0xff] }
 0x7a0   :  { %6613 = vmatmul.msk.f32.vlgmr.msrb.gmra.mxu1 %vm5984_vm2, %v5967_v1 }
 0x81d   :  { %v6005_v30 = vpop.f32.mrf.mxu1 }
 0x81e   :  { %v6006_v46 = vadd.f32 %v6633_v9, %v6005_v30 }
 0x820   :  { %vm6008_vm3 = vcmp.ge.f32.partialorder %v6006_v46, 0.0  ;;  %v6009_v11 = vmul.f32 0.01, %v6006_v46 }
 0x822   :  { %v6010_v27 = vsel %vm6008_vm3, %v6006_v46, %v6009_v11 }
 0x823   :  { %v6015_v24 = vmul.f32 %v6634_v61, %v6010_v27 }
 0x825   :  { %v6017_v0 = vsel %vm6016_vm4, %v6015_v24, 0.0 }
 0x826   :  { %6018 = vadd.xlane.f32.xlu2 %v6017_v0 }
 0x899   :  { %v6019_v50 = vpop.xlane.xlu2 %6018 }
 0x89a   :  { %v6024_v28 = vadd.f32 %v6635_v18, %v6019_v50 }
 0x89c   :  { %6026 = vst.msk [vmem:[%s9799_s13] sm:$0xff] %vm6025_vm5, %v6024_v28 }

</bundles_post_ra>
